<compile_context>
chip_gen: v6e
topology: v6e:2x2x1
jax: 0.10.0
libtpu: 0.0.40
codegen_flags: <defaults>
</compile_context>

<pallas_src>
import numpy as np
import jax
import jax.numpy as jnp
from jax.experimental import pallas as pl
from jax.experimental.pallas import tpu as pltpu


# ------------------------------ Pallas kernel -------------------------------

def _spp_kernel(x2_ref, x3_ref, x4_ref, w_ref, b_ref,
                ah2_ref, awT2_ref, ah3_ref, awT3_ref, ah4_ref, awT4_ref,
                o_ref):
    """Fused maxpool(k) -> 1x1 conv (C->1) -> bilinear upsample, k in (2, 3, 4).

    xk_ref  : (1, Hk, k, Wk, k, C)  pre-windowed input for pool size k
    w_ref   : (1, C)  shared 1x1-conv weight;  b_ref: (1, 1) bias
    ahk_ref : (H, Hk) row-interpolation matrix; awTk_ref: (Wk, W) col matrix (transposed)
    o_ref   : (1, 3, H, W)  the three upsampled single-channel maps
    """
    w = w_ref[...]            # (1, C)   broadcasts over the lane (channel) axis
    b = b_ref[...]            # (1, 1)

    def branch(xw_ref, ah_ref, awT_ref, idx):
        xw = xw_ref[0]                                     # (Hk, k, Wk, k, C)
        pooled = jnp.max(jnp.max(xw, axis=3), axis=1)      # (Hk, Wk, C)
        # 1x1 conv to a single channel: weighted reduce over the lane axis (+ bias).
        pc = jnp.sum(pooled * w, axis=-1) + b              # (Hk, Wk)
        # Separable bilinear upsample: A_h @ pc @ A_w^T  (two small MXU dots).
        row = jnp.dot(pc, awT_ref[...],
                      preferred_element_type=jnp.float32)  # (Hk, W)
        up = jnp.dot(ah_ref[...], row,
                     preferred_element_type=jnp.float32)   # (H, W)
        o_ref[0, idx, :, :] = up

    branch(x2_ref, ah2_ref, awT2_ref, 0)   # pool1: 2x2 / stride 2
    branch(x3_ref, ah3_ref, awT3_ref, 1)   # pool2: 3x3 / stride 3
    branch(x4_ref, ah4_ref, awT4_ref, 2)   # pool3: 4x4 / stride 4


# ------------------------------ host helpers --------------------------------

def _bilinear_matrix(out_size, in_size):
    """PyTorch bilinear interpolation matrix (align_corners=False)."""
    a = np.zeros((out_size, in_size), np.float32)
    if in_size == 1:
        a[:, 0] = 1.0
        return a
    scale = in_size / out_size
    for o in range(out_size):
        src = max((o + 0.5) * scale - 0.5, 0.0)
        i0 = min(int(np.floor(src)), in_size - 1)
        i1 = min(i0 + 1, in_size - 1)
        lam = src - i0
        a[o, i0] += 1.0 - lam
        a[o, i1] += lam
    return a


def sppblock_forward(params, x_nchw):
    x_nchw = x_nchw.astype(jnp.float32)
    B, C, H, W = x_nchw.shape
    x = jnp.transpose(x_nchw, (0, 2, 3, 1))                 # NCHW -> NHWC

    # Pre-window the input for each pool size (pure slice/reshape glue, no compute).
    def windowed(k):
        Hk, Wk = H // k, W // k
        xw = x[:, :Hk * k, :Wk * k, :].reshape(B, Hk, k, Wk, k, C)
        return xw, Hk, Wk

    x2, H2, W2 = windowed(2)
    x3, H3, W3 = windowed(3)
    x4, H4, W4 = windowed(4)

    ah2 = jnp.asarray(_bilinear_matrix(H, H2)); awT2 = jnp.asarray(_bilinear_matrix(W, W2).T)
    ah3 = jnp.asarray(_bilinear_matrix(H, H3)); awT3 = jnp.asarray(_bilinear_matrix(W, W3).T)
    ah4 = jnp.asarray(_bilinear_matrix(H, H4)); awT4 = jnp.asarray(_bilinear_matrix(W, W4).T)

    layers = pl.pallas_call(
        _spp_kernel,
        out_shape=jax.ShapeDtypeStruct((B, 3, H, W), jnp.float32),
        grid=(B,),
        in_specs=[
            pl.BlockSpec((1, H2, 2, W2, 2, C), lambda b: (b, 0, 0, 0, 0, 0)),
            pl.BlockSpec((1, H3, 3, W3, 3, C), lambda b: (b, 0, 0, 0, 0, 0)),
            pl.BlockSpec((1, H4, 4, W4, 4, C), lambda b: (b, 0, 0, 0, 0, 0)),
            pl.BlockSpec((1, C), lambda b: (0, 0)),
            pl.BlockSpec((1, 1), lambda b: (0, 0)),
            pl.BlockSpec((H, H2), lambda b: (0, 0)),
            pl.BlockSpec((W2, W), lambda b: (0, 0)),
            pl.BlockSpec((H, H3), lambda b: (0, 0)),
            pl.BlockSpec((W3, W), lambda b: (0, 0)),
            pl.BlockSpec((H, H4), lambda b: (0, 0)),
            pl.BlockSpec((W4, W), lambda b: (0, 0)),
        ],
        out_specs=pl.BlockSpec((1, 3, H, W), lambda b: (b, 0, 0, 0)),
        compiler_params=pltpu.CompilerParams(
            dimension_semantics=("parallel",)),     # megacore sharding on v7x
    )(x2, x3, x4, params["w"], params["b"], ah2, awT2, ah3, awT3, ah4, awT4)

    # torch.cat([layer1, layer2, layer3, x], dim=1)  -- channel concat is glue.
    return jnp.concatenate([layers, x_nchw], axis=1)


# Plain-XLA reference of the same math (for an in-script correctness check).
def sppblock_reference(params, x_nchw):
    x = x_nchw.astype(jnp.float32)
    B, C, H, W = x.shape
    w = params["w"][0]
    b = params["b"][0, 0]
    outs = []
    for k in (2, 3, 4):
        Hk, Wk = H // k, W // k
        xw = x[:, :, :Hk * k, :Wk * k].reshape(B, C, Hk, k, Wk, k)
        pooled = xw.max(axis=5).max(axis=3)                          # (B, C, Hk, Wk)
        pc = jnp.einsum('bchw,c->bhw', pooled, w) + b                # (B, Hk, Wk)
        ah = jnp.asarray(_bilinear_matrix(H, Hk))
        awT = jnp.asarray(_bilinear_matrix(W, Wk).T)
        up = jnp.einsum('hi,bij,jw->bhw', ah, pc, awT)               # (B, H, W)
        outs.append(up[:, None])
    return jnp.concatenate(outs + [x], axis=1)


# ---------------------------------- main -------------------------------------

if __name__ == "__main__":
    key = jax.random.PRNGKey(0)
    kw, kb, kx = jax.random.split(key, 3)

    in_channels = 4
    bound = 1.0 / np.sqrt(in_channels)            # PyTorch Conv2d default init bound
    params = {
        "w": jax.random.uniform(kw, (1, in_channels), jnp.float32, -bound, bound),
        "b": jax.random.uniform(kb, (1, 1), jnp.float32, -bound, bound),
    }
    x = jax.random.normal(kx, (2, in_channels, 16, 16), dtype=jnp.float32)

    fwd = jax.jit(sppblock_forward)
    out = jax.block_until_ready(fwd(params, x))

    assert out.shape == (2, in_channels + 3, 16, 16), out.shape
    assert bool(jnp.all(jnp.isfinite(out)))
    # passthrough channels must equal the input exactly
    assert bool(jnp.allclose(out[:, 3:], x))
    # compare the three pooled/conved/upsampled maps against a plain-XLA reference
    ref = sppblock_reference(params, x)
    assert bool(jnp.allclose(out, ref, atol=1e-4, rtol=1e-4)), float(
        jnp.max(jnp.abs(out - ref)))
    print("KERNEL_OK")
</pallas_src>

<mosaic_0001>
module attributes {stable_mosaic.version = 11 : i64} {
  func.func @_spp_kernel(%arg0: i32, %arg1: memref<1x8x2x8x2x4xf32, #tpu.memory_space<vmem>>, %arg2: memref<1x5x3x5x3x4xf32, #tpu.memory_space<vmem>>, %arg3: memref<1x4x4x4x4x4xf32, #tpu.memory_space<vmem>>, %arg4: memref<1x4xf32, #tpu.memory_space<vmem>>, %arg5: memref<1x1xf32, #tpu.memory_space<vmem>>, %arg6: memref<16x8xf32, #tpu.memory_space<vmem>>, %arg7: memref<8x16xf32, #tpu.memory_space<vmem>>, %arg8: memref<16x5xf32, #tpu.memory_space<vmem>>, %arg9: memref<5x16xf32, #tpu.memory_space<vmem>>, %arg10: memref<16x4xf32, #tpu.memory_space<vmem>>, %arg11: memref<4x16xf32, #tpu.memory_space<vmem>>, %arg12: memref<1x3x16x16xf32, #tpu.memory_space<vmem>>) attributes {dimension_semantics = [#tpu.dimension_semantics<parallel>], iteration_bounds = array<i64: 2>, scalar_prefetch = 0 : i64, scratch_operands = 0 : i64, tpu.core_type = #tpu.core_type<tc>, window_params = [{transform_indices = @transform_0, window_bounds = array<i64: 1, 8, 2, 8, 2, 4>}, {transform_indices = @transform_1, window_bounds = array<i64: 1, 5, 3, 5, 3, 4>}, {transform_indices = @transform_2, window_bounds = array<i64: 1, 4, 4, 4, 4, 4>}, {pipeline_mode = #tpu.pipeline_mode<synchronous>, transform_indices = @transform_3, window_bounds = array<i64: 1, 4>}, {pipeline_mode = #tpu.pipeline_mode<synchronous>, transform_indices = @transform_4, window_bounds = array<i64: 1, 1>}, {pipeline_mode = #tpu.pipeline_mode<synchronous>, transform_indices = @transform_5, window_bounds = array<i64: 16, 8>}, {pipeline_mode = #tpu.pipeline_mode<synchronous>, transform_indices = @transform_6, window_bounds = array<i64: 8, 16>}, {pipeline_mode = #tpu.pipeline_mode<synchronous>, transform_indices = @transform_7, window_bounds = array<i64: 16, 5>}, {pipeline_mode = #tpu.pipeline_mode<synchronous>, transform_indices = @transform_8, window_bounds = array<i64: 5, 16>}, {pipeline_mode = #tpu.pipeline_mode<synchronous>, transform_indices = @transform_9, window_bounds = array<i64: 16, 4>}, {pipeline_mode = #tpu.pipeline_mode<synchronous>, transform_indices = @transform_10, window_bounds = array<i64: 4, 16>}, {transform_indices = @transform_11, window_bounds = array<i64: 1, 3, 16, 16>}]} {
    %c0 = arith.constant 0 : index
    %c0_0 = arith.constant 0 : index
    %0 = vector.load %arg4[%c0, %c0_0] : memref<1x4xf32, #tpu.memory_space<vmem>>, vector<1x4xf32>
    %c0_1 = arith.constant 0 : index
    %c0_2 = arith.constant 0 : index
    %1 = vector.load %arg5[%c0_1, %c0_2] : memref<1x1xf32, #tpu.memory_space<vmem>>, vector<1x1xf32>
    %c0_3 = arith.constant 0 : index
    %c0_4 = arith.constant 0 : index
    %c0_5 = arith.constant 0 : index
    %c0_6 = arith.constant 0 : index
    %c0_7 = arith.constant 0 : index
    %c0_8 = arith.constant 0 : index
    %2 = vector.load %arg1[%c0_3, %c0_4, %c0_5, %c0_6, %c0_7, %c0_8] : memref<1x8x2x8x2x4xf32, #tpu.memory_space<vmem>>, vector<1x8x2x8x2x4xf32>
    %3 = vector.shape_cast %2 : vector<1x8x2x8x2x4xf32> to vector<8x2x8x2x4xf32>
    %cst = arith.constant dense<0xFF800000> : vector<8x2x8x4xf32>
    %4 = vector.multi_reduction <maximumf>, %3, %cst [3] : vector<8x2x8x2x4xf32> to vector<8x2x8x4xf32>
    %cst_9 = arith.constant dense<0xFF800000> : vector<8x8x4xf32>
    %5 = vector.multi_reduction <maximumf>, %4, %cst_9 [1] : vector<8x2x8x4xf32> to vector<8x8x4xf32>
    %6 = vector.shape_cast %0 : vector<1x4xf32> to vector<1x1x4xf32>
    %7 = vector.broadcast %6 : vector<1x1x4xf32> to vector<8x8x4xf32>
    %8 = arith.mulf %5, %7 : vector<8x8x4xf32>
    %cst_10 = arith.constant dense<0.000000e+00> : vector<8x8xf32>
    %9 = vector.multi_reduction <add>, %8, %cst_10 [2] : vector<8x8x4xf32> to vector<8x8xf32>
    %10 = vector.broadcast %1 : vector<1x1xf32> to vector<8x8xf32>
    %11 = arith.addf %9, %10 : vector<8x8xf32>
    %c0_11 = arith.constant 0 : index
    %c0_12 = arith.constant 0 : index
    %12 = vector.load %arg7[%c0_11, %c0_12] : memref<8x16xf32, #tpu.memory_space<vmem>>, vector<8x16xf32>
    %cst_13 = arith.constant dense<0.000000e+00> : vector<8x16xf32>
    %13 = tpu.matmul %11, %12, %cst_13 {dimension_numbers = #tpu.dot_dimension_numbers<[1], [0], [0], [1], [0, 0, 1, 1], [], []>} : vector<8x8xf32>, vector<8x16xf32>, vector<8x16xf32> -> vector<8x16xf32>
    %c0_14 = arith.constant 0 : index
    %c0_15 = arith.constant 0 : index
    %14 = vector.load %arg6[%c0_14, %c0_15] : memref<16x8xf32, #tpu.memory_space<vmem>>, vector<16x8xf32>
    %cst_16 = arith.constant dense<0.000000e+00> : vector<16x16xf32>
    %15 = tpu.matmul %14, %13, %cst_16 {dimension_numbers = #tpu.dot_dimension_numbers<[1], [0], [0], [1], [0, 0, 1, 1], [], []>} : vector<16x8xf32>, vector<8x16xf32>, vector<16x16xf32> -> vector<16x16xf32>
    %c0_17 = arith.constant 0 : index
    %c0_18 = arith.constant 0 : index
    %c0_19 = arith.constant 0 : index
    %c0_20 = arith.constant 0 : index
    %16 = vector.load %arg12[%c0_17, %c0_18, %c0_19, %c0_20] : memref<1x3x16x16xf32, #tpu.memory_space<vmem>>, vector<1x1x16x16xf32>
    %17 = vector.shape_cast %16 : vector<1x1x16x16xf32> to vector<16x16xf32>
    %18 = vector.shape_cast %15 : vector<16x16xf32> to vector<1x1x16x16xf32>
    tpu.vector_store %arg12[%c0_17, %c0_18, %c0_19, %c0_20], %18 {strides = array<i32>} : memref<1x3x16x16xf32, #tpu.memory_space<vmem>>, vector<1x1x16x16xf32>,
    %c0_21 = arith.constant 0 : index
    %c0_22 = arith.constant 0 : index
    %c0_23 = arith.constant 0 : index
    %c0_24 = arith.constant 0 : index
    %c0_25 = arith.constant 0 : index
    %c0_26 = arith.constant 0 : index
    %19 = vector.load %arg2[%c0_21, %c0_22, %c0_23, %c0_24, %c0_25, %c0_26] : memref<1x5x3x5x3x4xf32, #tpu.memory_space<vmem>>, vector<1x5x3x5x3x4xf32>
    %20 = vector.shape_cast %19 : vector<1x5x3x5x3x4xf32> to vector<5x3x5x3x4xf32>
    %cst_27 = arith.constant dense<0xFF800000> : vector<5x3x5x4xf32>
    %21 = vector.multi_reduction <maximumf>, %20, %cst_27 [3] : vector<5x3x5x3x4xf32> to vector<5x3x5x4xf32>
    %cst_28 = arith.constant dense<0xFF800000> : vector<5x5x4xf32>
    %22 = vector.multi_reduction <maximumf>, %21, %cst_28 [1] : vector<5x3x5x4xf32> to vector<5x5x4xf32>
    %23 = vector.shape_cast %0 : vector<1x4xf32> to vector<1x1x4xf32>
    %24 = vector.broadcast %23 : vector<1x1x4xf32> to vector<5x5x4xf32>
    %25 = arith.mulf %22, %24 : vector<5x5x4xf32>
    %cst_29 = arith.constant dense<0.000000e+00> : vector<5x5xf32>
    %26 = vector.multi_reduction <add>, %25, %cst_29 [2] : vector<5x5x4xf32> to vector<5x5xf32>
    %27 = vector.broadcast %1 : vector<1x1xf32> to vector<5x5xf32>
    %28 = arith.addf %26, %27 : vector<5x5xf32>
    %c0_30 = arith.constant 0 : index
    %c0_31 = arith.constant 0 : index
    %29 = vector.load %arg9[%c0_30, %c0_31] : memref<5x16xf32, #tpu.memory_space<vmem>>, vector<5x16xf32>
    %cst_32 = arith.constant dense<0.000000e+00> : vector<5x16xf32>
    %30 = tpu.matmul %28, %29, %cst_32 {dimension_numbers = #tpu.dot_dimension_numbers<[1], [0], [0], [1], [0, 0, 1, 1], [], []>} : vector<5x5xf32>, vector<5x16xf32>, vector<5x16xf32> -> vector<5x16xf32>
    %c0_33 = arith.constant 0 : index
    %c0_34 = arith.constant 0 : index
    %31 = vector.load %arg8[%c0_33, %c0_34] : memref<16x5xf32, #tpu.memory_space<vmem>>, vector<16x5xf32>
    %cst_35 = arith.constant dense<0.000000e+00> : vector<16x16xf32>
    %32 = tpu.matmul %31, %30, %cst_35 {dimension_numbers = #tpu.dot_dimension_numbers<[1], [0], [0], [1], [0, 0, 1, 1], [], []>} : vector<16x5xf32>, vector<5x16xf32>, vector<16x16xf32> -> vector<16x16xf32>
    %c0_36 = arith.constant 0 : index
    %c1 = arith.constant 1 : index
    %c0_37 = arith.constant 0 : index
    %c0_38 = arith.constant 0 : index
    %33 = vector.load %arg12[%c0_36, %c1, %c0_37, %c0_38] : memref<1x3x16x16xf32, #tpu.memory_space<vmem>>, vector<1x1x16x16xf32>
    %34 = vector.shape_cast %33 : vector<1x1x16x16xf32> to vector<16x16xf32>
    %35 = vector.shape_cast %32 : vector<16x16xf32> to vector<1x1x16x16xf32>
    tpu.vector_store %arg12[%c0_36, %c1, %c0_37, %c0_38], %35 {strides = array<i32>} : memref<1x3x16x16xf32, #tpu.memory_space<vmem>>, vector<1x1x16x16xf32>,
    %c0_39 = arith.constant 0 : index
    %c0_40 = arith.constant 0 : index
    %c0_41 = arith.constant 0 : index
    %c0_42 = arith.constant 0 : index
    %c0_43 = arith.constant 0 : index
    %c0_44 = arith.constant 0 : index
    %36 = vector.load %arg3[%c0_39, %c0_40, %c0_41, %c0_42, %c0_43, %c0_44] : memref<1x4x4x4x4x4xf32, #tpu.memory_space<vmem>>, vector<1x4x4x4x4x4xf32>
    %37 = vector.shape_cast %36 : vector<1x4x4x4x4x4xf32> to vector<4x4x4x4x4xf32>
    %cst_45 = arith.constant dense<0xFF800000> : vector<4x4x4x4xf32>
    %38 = vector.multi_reduction <maximumf>, %37, %cst_45 [3] : vector<4x4x4x4x4xf32> to vector<4x4x4x4xf32>
    %cst_46 = arith.constant dense<0xFF800000> : vector<4x4x4xf32>
    %39 = vector.multi_reduction <maximumf>, %38, %cst_46 [1] : vector<4x4x4x4xf32> to vector<4x4x4xf32>
    %40 = vector.shape_cast %0 : vector<1x4xf32> to vector<1x1x4xf32>
    %41 = vector.broadcast %40 : vector<1x1x4xf32> to vector<4x4x4xf32>
    %42 = arith.mulf %39, %41 : vector<4x4x4xf32>
    %cst_47 = arith.constant dense<0.000000e+00> : vector<4x4xf32>
    %43 = vector.multi_reduction <add>, %42, %cst_47 [2] : vector<4x4x4xf32> to vector<4x4xf32>
    %44 = vector.broadcast %1 : vector<1x1xf32> to vector<4x4xf32>
    %45 = arith.addf %43, %44 : vector<4x4xf32>
    %c0_48 = arith.constant 0 : index
    %c0_49 = arith.constant 0 : index
    %46 = vector.load %arg11[%c0_48, %c0_49] : memref<4x16xf32, #tpu.memory_space<vmem>>, vector<4x16xf32>
    %cst_50 = arith.constant dense<0.000000e+00> : vector<4x16xf32>
    %47 = tpu.matmul %45, %46, %cst_50 {dimension_numbers = #tpu.dot_dimension_numbers<[1], [0], [0], [1], [0, 0, 1, 1], [], []>} : vector<4x4xf32>, vector<4x16xf32>, vector<4x16xf32> -> vector<4x16xf32>
    %c0_51 = arith.constant 0 : index
    %c0_52 = arith.constant 0 : index
    %48 = vector.load %arg10[%c0_51, %c0_52] : memref<16x4xf32, #tpu.memory_space<vmem>>, vector<16x4xf32>
    %cst_53 = arith.constant dense<0.000000e+00> : vector<16x16xf32>
    %49 = tpu.matmul %48, %47, %cst_53 {dimension_numbers = #tpu.dot_dimension_numbers<[1], [0], [0], [1], [0, 0, 1, 1], [], []>} : vector<16x4xf32>, vector<4x16xf32>, vector<16x16xf32> -> vector<16x16xf32>
    %c0_54 = arith.constant 0 : index
    %c2 = arith.constant 2 : index
    %c0_55 = arith.constant 0 : index
    %c0_56 = arith.constant 0 : index
    %50 = vector.load %arg12[%c0_54, %c2, %c0_55, %c0_56] : memref<1x3x16x16xf32, #tpu.memory_space<vmem>>, vector<1x1x16x16xf32>
    %51 = vector.shape_cast %50 : vector<1x1x16x16xf32> to vector<16x16xf32>
    %52 = vector.shape_cast %49 : vector<16x16xf32> to vector<1x1x16x16xf32>
    tpu.vector_store %arg12[%c0_54, %c2, %c0_55, %c0_56], %52 {strides = array<i32>} : memref<1x3x16x16xf32, #tpu.memory_space<vmem>>, vector<1x1x16x16xf32>,
    return
  }
  func.func @transform_0(%arg0: i32) -> (i32, i32, i32, i32, i32, i32) {
    %c0_i32 = arith.constant 0 : i32
    %c0_i32_0 = arith.constant 0 : i32
    %c0_i32_1 = arith.constant 0 : i32
    %c0_i32_2 = arith.constant 0 : i32
    %c0_i32_3 = arith.constant 0 : i32
    %c0_i32_4 = arith.constant 0 : i32
    return %arg0, %c0_i32, %c0_i32_0, %c0_i32_1, %c0_i32_2, %c0_i32_3 : i32, i32, i32, i32, i32, i32
  }
  func.func @transform_1(%arg0: i32) -> (i32, i32, i32, i32, i32, i32) {
    %c0_i32 = arith.constant 0 : i32
    %c0_i32_0 = arith.constant 0 : i32
    %c0_i32_1 = arith.constant 0 : i32
    %c0_i32_2 = arith.constant 0 : i32
    %c0_i32_3 = arith.constant 0 : i32
    %c0_i32_4 = arith.constant 0 : i32
    return %arg0, %c0_i32, %c0_i32_0, %c0_i32_1, %c0_i32_2, %c0_i32_3 : i32, i32, i32, i32, i32, i32
  }
  func.func @transform_2(%arg0: i32) -> (i32, i32, i32, i32, i32, i32) {
    %c0_i32 = arith.constant 0 : i32
    %c0_i32_0 = arith.constant 0 : i32
    %c0_i32_1 = arith.constant 0 : i32
    %c0_i32_2 = arith.constant 0 : i32
    %c0_i32_3 = arith.constant 0 : i32
    %c0_i32_4 = arith.constant 0 : i32
    return %arg0, %c0_i32, %c0_i32_0, %c0_i32_1, %c0_i32_2, %c0_i32_3 : i32, i32, i32, i32, i32, i32
  }
  func.func @transform_3(%arg0: i32) -> (i32, i32) {
    %c0_i32 = arith.constant 0 : i32
    %c0_i32_0 = arith.constant 0 : i32
    %c0_i32_1 = arith.constant 0 : i32
    return %c0_i32, %c0_i32_0 : i32, i32
  }
  func.func @transform_4(%arg0: i32) -> (i32, i32) {
    %c0_i32 = arith.constant 0 : i32
    %c0_i32_0 = arith.constant 0 : i32
    %c0_i32_1 = arith.constant 0 : i32
    return %c0_i32, %c0_i32_0 : i32, i32
  }
  func.func @transform_5(%arg0: i32) -> (i32, i32) {
    %c0_i32 = arith.constant 0 : i32
    %c0_i32_0 = arith.constant 0 : i32
    %c0_i32_1 = arith.constant 0 : i32
    return %c0_i32, %c0_i32_0 : i32, i32
  }
  func.func @transform_6(%arg0: i32) -> (i32, i32) {
    %c0_i32 = arith.constant 0 : i32
    %c0_i32_0 = arith.constant 0 : i32
    %c0_i32_1 = arith.constant 0 : i32
    return %c0_i32, %c0_i32_0 : i32, i32
  }
  func.func @transform_7(%arg0: i32) -> (i32, i32) {
    %c0_i32 = arith.constant 0 : i32
    %c0_i32_0 = arith.constant 0 : i32
    %c0_i32_1 = arith.constant 0 : i32
    return %c0_i32, %c0_i32_0 : i32, i32
  }
  func.func @transform_8(%arg0: i32) -> (i32, i32) {
    %c0_i32 = arith.constant 0 : i32
    %c0_i32_0 = arith.constant 0 : i32
    %c0_i32_1 = arith.constant 0 : i32
    return %c0_i32, %c0_i32_0 : i32, i32
  }
  func.func @transform_9(%arg0: i32) -> (i32, i32) {
    %c0_i32 = arith.constant 0 : i32
    %c0_i32_0 = arith.constant 0 : i32
    %c0_i32_1 = arith.constant 0 : i32
    return %c0_i32, %c0_i32_0 : i32, i32
  }
  func.func @transform_10(%arg0: i32) -> (i32, i32) {
    %c0_i32 = arith.constant 0 : i32
    %c0_i32_0 = arith.constant 0 : i32
    %c0_i32_1 = arith.constant 0 : i32
    return %c0_i32, %c0_i32_0 : i32, i32
  }
  func.func @transform_11(%arg0: i32) -> (i32, i32, i32, i32) {
    %c0_i32 = arith.constant 0 : i32
    %c0_i32_0 = arith.constant 0 : i32
    %c0_i32_1 = arith.constant 0 : i32
    %c0_i32_2 = arith.constant 0 : i32
    return %arg0, %c0_i32, %c0_i32_0, %c0_i32_1 : i32, i32, i32, i32
  }
}

</mosaic_0001>

<bundles_post_ra>
// kernel: sppblock_forward.1
= control target key start
LH: loop header
LB: loop body
LE: loop exit
PB: predicated region body
PF: predicated region fallthrough
CT: control target
= control target key end

     0   :  { %s4339_s19 = smov 0   ;;  %s5822_s0 = inlined_call_operand.vmem [shape: f32[2,8,2,8,2,4], index: 0, kind: input, shape index: {}, may-alias: {0,2}]   ;;  %s5823_s1 = inlined_call_operand.vmem [shape: f32[2,5,3,5,3,4], index: 1, kind: input, shape index: {}]   ;;  %s5824_s2 = inlined_call_operand.vmem [shape: f32[2,4,4,4,4,4], index: 2, kind: input, shape index: {}, may-alias: {0,2}]   ;;  %s5825_s3 = inlined_call_operand.vmem [shape: f32[1,4], index: 3, kind: input, shape index: {}]   ;;  %s5826_s4 = inlined_call_operand.<no memory space> [shape: f32[1,1], index: 4, kind: input, shape index: {}]   ;;  %s5827_s5 = inlined_call_operand.vmem [shape: f32[16,8], index: 5, kind: input, shape index: {}]   ;;  %s5828_s6 = inlined_call_operand.vmem [shape: f32[8,16], index: 6, kind: input, shape index: {}]   ;;  %s5829_s7 = inlined_call_operand.vmem [shape: f32[16,5], index: 7, kind: input, shape index: {}]   ;;  %s5830_s8 = inlined_call_operand.vmem [shape: f32[5,16], index: 8, kind: input, shape index: {}]   ;;  %s5831_s9 = inlined_call_operand.vmem [shape: f32[16,4], index: 9, kind: input, shape index: {}]   ;;  %s5832_s10 = inlined_call_operand.vmem [shape: f32[4,16], index: 10, kind: input, shape index: {}]   ;;  %s5833_s11 = inlined_call_operand.vmem [shape: f32[2,3,16,16], index: 11, kind: output, shape index: {}]  }
   0x1   :  { %v16_v0 = vstv %s5826_s4 }
   0x2   :  { %17 = vst [vmem:[#allocation2] sm:$0x1] %v16_v0 }
   0x3 LB: > { %s4167_s20 = sadd.s32 4294967295, %s4271_s19   ;;  %p4171_p0 = scmp.ge.s32.totalorder %s4271_s19, 1  ;;  %s4271_s19 = sphi %s4339_s19, %s23_s19  }
   0x4   : > { %p359_p1 = scmp.lt.s32.totalorder %s4271_s19, 3 }
   0x6   : > { %p360_p2 = pnand %p4171_p0, %p359_p1 }
   0x7   : > { %p409_p3 = scmp.lt.s32.totalorder (!%p360_p2), %s4167_s20, 1 }
   0x8   : > { %363 = sbr.rel (%p360_p2) target bundleno = 1209 (0x4b9), region = 64 }
   0xd   : > { %s5835_s20 = smov (!%p409_p3, %s4167_s20), 1  ;;  %vm559_vm0 = vcmask 25600   ;;  %vm1456_vm1 = vcmask 31744   ;;  %vm1784_vm2 = vcmask 1041409   ;;  %vm1787_vm3 = vcmask 1042434  }
   0xe   : > { %s4199_s4 = sshll.u32 %s5835_s20, 8  ;;  %vm1790_vm4 = vcmask 1043459   ;;  %vm1793_vm5 = vcmask 1044484   ;;  %vm1796_vm6 = vcmask 1045509   ;;  %vm1799_vm7 = vcmask 1046534   ;;  %s4246_s30 = smul.u32 300, %s5835_s20 }
   0xf   : > { %s4355_s23 = scalar_lea.vmem %s5822_s0, %s4199_s4  ;;  %vm1802_vm8 = vcmask 1047559   ;;  %vm2235_vm9 = vcmask 26624   ;;  %vm2981_vm10 = vcmask 28672   ;;  %s5391_s21 = scalar_lea.vmem %s5824_s2, %s4199_s4  ;;  %vm3262_vm11 = vcmask 27648  }
  0x10   : > { %v463_v1 = vld [vmem:[%s4355_s23 + $0x40] sm:$0x3]  ;;  %v464_v2 = vld [vmem:[%s4355_s23 + $0x42] sm:$0x3]  ;;  %v465_v3 = vld [vmem:[%s4355_s23 + $0x44] sm:$0x3]  ;;  %s5033_s14 = scalar_lea.vmem %s5823_s1, %s4246_s30 }
  0x11   : > { %v466_v4 = vld [vmem:[%s4355_s23 + $0x46] sm:$0x3]  ;;  %v467_v5 = vld [vmem:[%s4355_s23 + $0x48] sm:$0x3]  ;;  %v468_v6 = vld [vmem:[%s4355_s23 + $0x4a] sm:$0x3] }
  0x12   : > { %v469_v7 = vld [vmem:[%s4355_s23 + $0x4c] sm:$0x3]  ;;  %v470_v8 = vld [vmem:[%s4355_s23 + $0x4e] sm:$0x3]  ;;  %v784_v9 = vsel %vm559_vm0, %v463_v1, -inf  ;;  %v791_v10 = vsel %vm559_vm0, %v464_v2, -inf }
  0x13   : > { %v798_v11 = vsel %vm559_vm0, %v465_v3, -inf  ;;  %v805_v12 = vsel %vm559_vm0, %v466_v4, -inf  ;;  %v785_v13 = vrot.slane %v784_v9, 4  ;;  %v792_v14 = vrot.slane %v791_v10, 4  ;;  %v471_v45 = vld [vmem:[%s4355_s23 + $0x50] sm:$0x3] }
  0x14   : > { %v799_v15 = vrot.slane %v798_v11, 4  ;;  %v806_v16 = vrot.slane %v805_v12, 4  ;;  %v812_v17 = vsel %vm559_vm0, %v467_v5, -inf  ;;  %v819_v18 = vsel %vm559_vm0, %v468_v6, -inf  ;;  %v472_v50 = vld [vmem:[%s4355_s23 + $0x52] sm:$0x3] }
  0x15   : > { %v826_v19 = vsel %vm559_vm0, %v469_v7, -inf  ;;  %v833_v20 = vsel %vm559_vm0, %v470_v8, -inf  ;;  %v786_v21 = vmax.f32 %v784_v9, %v785_v13  ;;  %v793_v22 = vmax.f32 %v791_v10, %v792_v14  ;;  %v473_v51 = vld [vmem:[%s4355_s23 + $0x54] sm:$0x3]  ;;  %v474_v52 = vld [vmem:[%s4355_s23 + $0x56] sm:$0x3] }
  0x16   : > { %v800_v23 = vmax.f32 %v798_v11, %v799_v15  ;;  %v807_v24 = vmax.f32 %v805_v12, %v806_v16  ;;  %v813_v25 = vrot.slane %v812_v17, 4  ;;  %v820_v26 = vrot.slane %v819_v18, 4  ;;  %v475_v57 = vld [vmem:[%s4355_s23 + $0x58] sm:$0x3]  ;;  %v476_v58 = vld [vmem:[%s4355_s23 + $0x5a] sm:$0x3] }
  0x17   : > { %v827_v27 = vrot.slane %v826_v19, 4  ;;  %v834_v28 = vrot.slane %v833_v20, 4  ;;  %v787_v29 = vrot.slane %v786_v21, 2  ;;  %v794_v30 = vrot.slane %v793_v22, 2  ;;  %v477_v63 = vld [vmem:[%s4355_s23 + $0x5c] sm:$0x3] }
  0x18   : > { %v801_v31 = vrot.slane %v800_v23, 2  ;;  %v808_v32 = vrot.slane %v807_v24, 2  ;;  %v814_v33 = vmax.f32 %v812_v17, %v813_v25  ;;  %v821_v34 = vmax.f32 %v819_v18, %v820_v26  ;;  %v478_v4 = vld [vmem:[%s4355_s23 + $0x5e] sm:$0x3]  ;;  %s4247_s25 = smul.u32 48, %s5835_s20 }
  0x19   : > { %v828_v35 = vmax.f32 %v826_v19, %v827_v27  ;;  %v835_v36 = vmax.f32 %v833_v20, %v834_v28  ;;  %v788_v37 = vmax.f32 %v786_v21, %v787_v29  ;;  %v795_v38 = vmax.f32 %v793_v22, %v794_v30 }
  0x1a   : > { %v802_v39 = vmax.f32 %v800_v23, %v801_v31  ;;  %v809_v40 = vmax.f32 %v807_v24, %v808_v32  ;;  %v815_v41 = vrot.slane %v814_v33, 2  ;;  %v822_v42 = vrot.slane %v821_v34, 2  ;;  %s428_s28 = scalar_lea.vmem %s5833_s11, %s4247_s25 }
  0x1b   : > { %v829_v43 = vrot.slane %v828_v35, 2  ;;  %v836_v44 = vrot.slane %v835_v36, 2  ;;  %v789_v46 = vrot.slane %v788_v37, 1  ;;  %v796_v47 = vrot.slane %v795_v38, 1 }
  0x1c   : > { %v803_v48 = vrot.slane %v802_v39, 1  ;;  %v810_v49 = vrot.slane %v809_v40, 1  ;;  %v816_v53 = vmax.f32 %v814_v33, %v815_v41  ;;  %v823_v54 = vmax.f32 %v821_v34, %v822_v42 }
  0x1d   : > { %v830_v55 = vmax.f32 %v828_v35, %v829_v43  ;;  %v837_v56 = vmax.f32 %v835_v36, %v836_v44  ;;  %v4379_v59 = vmax.f32 %v788_v37, %v789_v46  ;;  %v4381_v60 = vmax.f32 %v795_v38, %v796_v47 }
  0x1e   : > { %v4383_v61 = vmax.f32 %v802_v39, %v803_v48  ;;  %v4385_v62 = vmax.f32 %v809_v40, %v810_v49  ;;  %v817_v0 = vrot.slane %v816_v53, 1  ;;  %v824_v1 = vrot.slane %v823_v54, 1 }
  0x1f   : > { %v831_v2 = vrot.slane %v830_v55, 1  ;;  %v838_v3 = vrot.slane %v837_v56, 1  ;;  %v840_v5 = vsel %vm559_vm0, %v471_v45, -inf  ;;  %v847_v6 = vsel %vm559_vm0, %v472_v50, -inf }
  0x20   : > { %v854_v7 = vsel %vm559_vm0, %v473_v51, -inf  ;;  %v861_v8 = vsel %vm559_vm0, %v474_v52, -inf  ;;  %v4393_v9 = vmax.f32 %v816_v53, %v817_v0  ;;  %v4395_v10 = vmax.f32 %v823_v54, %v824_v1 }
  0x21   : > { %v4397_v11 = vmax.f32 %v830_v55, %v831_v2  ;;  %v4399_v12 = vmax.f32 %v837_v56, %v838_v3  ;;  %v841_v13 = vrot.slane %v840_v5, 4  ;;  %v848_v14 = vrot.slane %v847_v6, 4 }
  0x22   : > { %v855_v15 = vrot.slane %v854_v7, 4  ;;  %v862_v16 = vrot.slane %v861_v8, 4  ;;  %v868_v17 = vsel %vm559_vm0, %v475_v57, -inf  ;;  %v875_v18 = vsel %vm559_vm0, %v476_v58, -inf }
  0x23   : > { %v882_v19 = vsel %vm559_vm0, %v477_v63, -inf  ;;  %v889_v20 = vsel %vm559_vm0, %v478_v4, -inf  ;;  %v842_v21 = vmax.f32 %v840_v5, %v841_v13  ;;  %v849_v22 = vmax.f32 %v847_v6, %v848_v14 }
  0x24   : > { %v856_v23 = vmax.f32 %v854_v7, %v855_v15  ;;  %v863_v24 = vmax.f32 %v861_v8, %v862_v16  ;;  %v869_v25 = vrot.slane %v868_v17, 4  ;;  %v876_v26 = vrot.slane %v875_v18, 4 }
  0x25   : > { %v883_v27 = vrot.slane %v882_v19, 4  ;;  %v890_v28 = vrot.slane %v889_v20, 4  ;;  %v843_v29 = vrot.slane %v842_v21, 2  ;;  %v850_v30 = vrot.slane %v849_v22, 2 }
  0x26   : > { %v857_v31 = vrot.slane %v856_v23, 2  ;;  %v864_v32 = vrot.slane %v863_v24, 2  ;;  %v870_v33 = vmax.f32 %v868_v17, %v869_v25  ;;  %v877_v34 = vmax.f32 %v875_v18, %v876_v26  ;;  %v431_v25 = vld [vmem:[%s4355_s23] sm:$0x3] }
  0x27   : > { %v884_v35 = vmax.f32 %v882_v19, %v883_v27  ;;  %v891_v36 = vmax.f32 %v889_v20, %v890_v28  ;;  %v844_v37 = vmax.f32 %v842_v21, %v843_v29  ;;  %v851_v38 = vmax.f32 %v849_v22, %v850_v30  ;;  %v4422_v19 = vld [vmem:[%s5825_s3] ss:$0 sm:$0xff] }
  0x28   : > { %v858_v39 = vmax.f32 %v856_v23, %v857_v31  ;;  %v865_v40 = vmax.f32 %v863_v24, %v864_v32  ;;  %v871_v41 = vrot.slane %v870_v33, 2  ;;  %v878_v42 = vrot.slane %v877_v34, 2  ;;  %v432_v32 = vld [vmem:[%s4355_s23 + $0x2] sm:$0x3] }
  0x29   : > { %v885_v43 = vrot.slane %v884_v35, 2  ;;  %v892_v44 = vrot.slane %v891_v36, 2  ;;  %v845_v45 = vrot.slane %v844_v37, 1  ;;  %v852_v46 = vrot.slane %v851_v38, 1 }
  0x2a   : > { %v859_v47 = vrot.slane %v858_v39, 1  ;;  %v866_v48 = vrot.slane %v865_v40, 1  ;;  %v872_v49 = vmax.f32 %v870_v33, %v871_v41  ;;  %v879_v50 = vmax.f32 %v877_v34, %v878_v42  ;;  %v435_v42 = vld [vmem:[%s4355_s23 + $0x8] sm:$0x3] }
  0x2b   : > { %v886_v51 = vmax.f32 %v884_v35, %v885_v43  ;;  %v893_v52 = vmax.f32 %v891_v36, %v892_v44  ;;  %v846_v53 = vmax.f32 %v844_v37, %v845_v45  ;;  %v853_v54 = vmax.f32 %v851_v38, %v852_v46  ;;  %v433_v35 = vld [vmem:[%s4355_s23 + $0x4] sm:$0x3]  ;;  %v434_v36 = vld [vmem:[%s4355_s23 + $0x6] sm:$0x3]  ;;  %v436_v46 = vld [vmem:[%s4355_s23 + $0xa] sm:$0x3] }
  0x2c   : > { %v860_v55 = vmax.f32 %v858_v39, %v859_v47  ;;  %v867_v56 = vmax.f32 %v865_v40, %v866_v48  ;;  %v873_v57 = vrot.slane %v872_v49, 1  ;;  %v880_v58 = vrot.slane %v879_v50, 1 }
  0x2d   : > { %v887_v63 = vrot.slane %v886_v51, 1  ;;  %v894_v0 = vrot.slane %v893_v52, 1  ;;  %v1505_v1 = vsel %vm1456_vm1, %v4379_v59, -inf  ;;  %v1506_v2 = vsel %vm1456_vm1, %v846_v53, -inf }
  0x2e   : > { %v1508_v3 = vsel %vm1456_vm1, %v4381_v60, -inf  ;;  %v1509_v4 = vsel %vm1456_vm1, %v853_v54, -inf  ;;  %v874_v5 = vmax.f32 %v872_v49, %v873_v57  ;;  %v881_v6 = vmax.f32 %v879_v50, %v880_v58 }
  0x2f   : > { %v888_v7 = vmax.f32 %v886_v51, %v887_v63  ;;  %v895_v8 = vmax.f32 %v893_v52, %v894_v0  ;;  %v1507_v13 = vmax.f32 %v1505_v1, %v1506_v2  ;;  %v1510_v14 = vmax.f32 %v1508_v3, %v1509_v4 }
  0x30   : > { %v1511_v15 = vsel %vm1456_vm1, %v4383_v61, -inf  ;;  %v1512_v59 = vsel %vm1456_vm1, %v860_v55, -inf  ;;  %v1514_v60 = vsel %vm1456_vm1, %v4385_v62, -inf  ;;  %v1515_v17 = vsel %vm1456_vm1, %v867_v56, -inf }
  0x31   : > { %v1513_v16 = vmax.f32 %v1511_v15, %v1512_v59  ;;  %v1517_v18 = vsel %vm1456_vm1, %v4393_v9, -inf  ;;  %v1516_v61 = vmax.f32 %v1514_v60, %v1515_v17  ;;  %v1518_v20 = vsel %vm1456_vm1, %v874_v5, -inf }
  0x32   : > { %v1520_v21 = vsel %vm1456_vm1, %v4395_v10, -inf  ;;  %v1521_v22 = vsel %vm1456_vm1, %v881_v6, -inf  ;;  %v1519_v62 = vmax.f32 %v1517_v18, %v1518_v20  ;;  %v1523_v9 = vsel %vm1456_vm1, %v4397_v11, -inf  ;;  %v438_v20 = vld [vmem:[%s4355_s23 + $0xe] sm:$0x3] }
  0x33   : > { %v1522_v23 = vmax.f32 %v1520_v21, %v1521_v22  ;;  %v1524_v24 = vsel %vm1456_vm1, %v888_v7, -inf  ;;  %v1526_v27 = vsel %vm1456_vm1, %v4399_v12, -inf  ;;  %v1527_v10 = vsel %vm1456_vm1, %v895_v8, -inf }
  0x34   : > { %v1525_v26 = vmax.f32 %v1523_v9, %v1524_v24  ;;  %v1671_v28 = vmul.f32 %v4422_v19, %v1507_v13  ;;  %v1528_v29 = vmax.f32 %v1526_v27, %v1527_v10  ;;  %v1672_v30 = vmul.f32 %v4422_v19, %v1510_v14  ;;  %v437_v13 = vld [vmem:[%s4355_s23 + $0xc] sm:$0x3] }
  0x35   : > { %v1673_v11 = vmul.f32 %v4422_v19, %v1513_v16  ;;  %v1674_v31 = vmul.f32 %v4422_v19, %v1516_v61  ;;  %v1675_v33 = vmul.f32 %v4422_v19, %v1519_v62  ;;  %v1676_v34 = vmul.f32 %v4422_v19, %v1522_v23 }
  0x36   : > { %v1677_v12 = vmul.f32 %v4422_v19, %v1525_v26  ;;  %v560_v37 = vsel %vm559_vm0, %v431_v25, -inf  ;;  %v1678_v38 = vmul.f32 %v4422_v19, %v1528_v29  ;;  %v1818_v39 = vrot.slane %v1672_v30, 7  ;;  %v439_v26 = vld [vmem:[%s4355_s23 + $0x10] sm:$0x3]  ;;  %v440_v30 = vld [vmem:[%s4355_s23 + $0x12] sm:$0x3] }
  0x37   : > { %v1820_v40 = vrot.slane %v1673_v11, 6  ;;  %v1822_v41 = vrot.slane %v1674_v31, 5  ;;  %v1824_v43 = vrot.slane %v1675_v33, 4  ;;  %v1826_v44 = vrot.slane %v1676_v34, 3  ;;  %v441_v34 = vld [vmem:[%s4355_s23 + $0x14] sm:$0x3] }
  0x38   : > { %v1828_v45 = vrot.slane %v1677_v12, 2  ;;  %v561_v47 = vrot.slane %v560_v37, 4  ;;  %v1819_v48 = vsel %vm1784_vm2, %v1818_v39, %v1671_v28  ;;  %v1830_v49 = vrot.slane %v1678_v38, 1  ;;  %v442_v38 = vld [vmem:[%s4355_s23 + $0x16] sm:$0x3] }
  0x39   : > { %v567_v50 = vsel %vm559_vm0, %v432_v32, -inf  ;;  %v574_v51 = vsel %vm559_vm0, %v433_v35, -inf  ;;  %v1821_v52 = vsel %vm1787_vm3, %v1820_v40, %v1819_v48  ;;  %v581_v57 = vsel %vm559_vm0, %v434_v36, -inf }
  0x3a   : > { %v562_v53 = vmax.f32 %v560_v37, %v561_v47  ;;  %v568_v54 = vrot.slane %v567_v50, 4  ;;  %v575_v55 = vrot.slane %v574_v51, 4  ;;  %v1823_v56 = vsel %vm1790_vm4, %v1822_v41, %v1821_v52  ;;  %v444_v52 = vld [vmem:[%s4355_s23 + $0x1a] sm:$0x3] }
  0x3b   : > { %v588_v58 = vsel %vm559_vm0, %v435_v42, -inf  ;;  %v595_v63 = vsel %vm559_vm0, %v436_v46, -inf  ;;  %v1825_v0 = vsel %vm1793_vm5, %v1824_v43, %v1823_v56  ;;  %v582_v5 = vrot.slane %v581_v57, 4  ;;  %v443_v43 = vld [vmem:[%s4355_s23 + $0x18] sm:$0x3] }
  0x3c   : > { %v563_v1 = vrot.slane %v562_v53, 2  ;;  %v569_v2 = vmax.f32 %v567_v50, %v568_v54  ;;  %v576_v3 = vmax.f32 %v574_v51, %v575_v55  ;;  %v1827_v4 = vsel %vm1796_vm6, %v1826_v44, %v1825_v0 }
  0x3d   : > { %v589_v6 = vrot.slane %v588_v58, 4  ;;  %v596_v7 = vrot.slane %v595_v63, 4  ;;  %v1829_v8 = vsel %vm1799_vm7, %v1828_v45, %v1827_v4  ;;  %v583_v60 = vmax.f32 %v581_v57, %v582_v5  ;;  %v445_v5 = vld [vmem:[%s4355_s23 + $0x1c] sm:$0x3] }
  0x3e   : > { %v564_v14 = vmax.f32 %v562_v53, %v563_v1  ;;  %v570_v15 = vrot.slane %v569_v2, 2  ;;  %v577_v59 = vrot.slane %v576_v3, 2  ;;  %v1831_v16 = vsel %vm1802_vm8, %v1830_v49, %v1829_v8 }
  0x3f   : > { %v590_v17 = vmax.f32 %v588_v58, %v589_v6  ;;  %v597_v18 = vmax.f32 %v595_v63, %v596_v7  ;;  %v1916_v61 = vsel %vm1456_vm1, %v1831_v16, 0.0  ;;  %v584_v23 = vrot.slane %v583_v60, 2 }
  0x40   : > { %v565_v21 = vrot.slane %v564_v14, 1  ;;  %v571_v22 = vmax.f32 %v569_v2, %v570_v15  ;;  %v578_v62 = vmax.f32 %v576_v3, %v577_v59  ;;  %1917 = vadd.xlane.f32.xlu1 %v1916_v61  ;;  %v602_v25 = vsel %vm559_vm0, %v437_v13, -inf }
  0x41   : > { %v591_v9 = vrot.slane %v590_v17, 2  ;;  %v598_v24 = vrot.slane %v597_v18, 2  ;;  %v603_v29 = vrot.slane %v602_v25, 4  ;;  %v585_v11 = vmax.f32 %v583_v60, %v584_v23  ;;  %v446_v60 = vld [vmem:[%s4355_s23 + $0x1e] sm:$0x3] }
  0x42   : > { %v4466_v27 = vmax.f32 %v564_v14, %v565_v21  ;;  %v572_v10 = vrot.slane %v571_v22, 1  ;;  %v579_v28 = vrot.slane %v578_v62, 1  ;;  %v609_v33 = vsel %vm559_vm0, %v438_v20, -inf }
  0x43   : > { %v592_v31 = vmax.f32 %v590_v17, %v591_v9  ;;  %v599_v32 = vmax.f32 %v597_v18, %v598_v24  ;;  %v604_v36 = vmax.f32 %v602_v25, %v603_v29  ;;  %v610_v37 = vrot.slane %v609_v33, 4 }
  0x44   : > { %v4471_v12 = vmax.f32 %v571_v22, %v572_v10  ;;  %v4473_v35 = vmax.f32 %v578_v62, %v579_v28  ;;  %v586_v39 = vrot.slane %v585_v11, 1  ;;  %v616_v42 = vsel %vm559_vm0, %v439_v26, -inf }
  0x45   : > { %v593_v40 = vrot.slane %v592_v31, 1  ;;  %v600_v41 = vrot.slane %v599_v32, 1  ;;  %v605_v44 = vrot.slane %v604_v36, 2  ;;  %v611_v45 = vmax.f32 %v609_v33, %v610_v37 }
  0x46   : > { %v617_v46 = vrot.slane %v616_v42, 4  ;;  %v623_v47 = vsel %vm559_vm0, %v440_v30, -inf  ;;  %v4479_v48 = vmax.f32 %v585_v11, %v586_v39  ;;  %v630_v56 = vsel %vm559_vm0, %v441_v34, -inf }
  0x47   : > { %v4481_v49 = vmax.f32 %v592_v31, %v593_v40  ;;  %v4483_v50 = vmax.f32 %v599_v32, %v600_v41  ;;  %v624_v51 = vrot.slane %v623_v47, 4  ;;  %v606_v53 = vmax.f32 %v604_v36, %v605_v44 }
  0x48   : > { %v612_v54 = vrot.slane %v611_v45, 2  ;;  %v618_v55 = vmax.f32 %v616_v42, %v617_v46  ;;  %v631_v58 = vrot.slane %v630_v56, 4  ;;  %v637_v63 = vsel %vm559_vm0, %v442_v38, -inf }
  0x49   : > { %v625_v57 = vmax.f32 %v623_v47, %v624_v51  ;;  %v644_v0 = vsel %vm559_vm0, %v443_v43, -inf  ;;  %v607_v1 = vrot.slane %v606_v53, 1  ;;  %v638_v4 = vrot.slane %v637_v63, 4 }
  0x4a   : > { %v613_v2 = vmax.f32 %v611_v45, %v612_v54  ;;  %v619_v3 = vrot.slane %v618_v55, 2  ;;  %v632_v7 = vmax.f32 %v630_v56, %v631_v58  ;;  %v645_v8 = vrot.slane %v644_v0, 4 }
  0x4b   : > { %v626_v6 = vrot.slane %v625_v57, 2  ;;  %v651_v13 = vsel %vm559_vm0, %v444_v52, -inf  ;;  %v608_v14 = vmax.f32 %v606_v53, %v607_v1  ;;  %v639_v16 = vmax.f32 %v637_v63, %v638_v4 }
  0x4c   : > { %v614_v15 = vrot.slane %v613_v2, 1  ;;  %v620_v59 = vmax.f32 %v618_v55, %v619_v3  ;;  %v633_v18 = vrot.slane %v632_v7, 2  ;;  %v646_v61 = vmax.f32 %v644_v0, %v645_v8 }
  0x4d   : > { %v627_v17 = vmax.f32 %v625_v57, %v626_v6  ;;  %v652_v20 = vrot.slane %v651_v13, 4  ;;  %v640_v62 = vrot.slane %v639_v16, 2  ;;  %v658_v23 = vsel %vm559_vm0, %v445_v5, -inf }
  0x4e   : > { %v615_v21 = vmax.f32 %v613_v2, %v614_v15  ;;  %v621_v22 = vrot.slane %v620_v59, 1  ;;  %v634_v24 = vmax.f32 %v632_v7, %v633_v18  ;;  %v647_v25 = vrot.slane %v646_v61, 2 }
  0x4f   : > { %v628_v9 = vrot.slane %v627_v17, 1  ;;  %v653_v26 = vmax.f32 %v651_v13, %v652_v20  ;;  %v641_v28 = vmax.f32 %v639_v16, %v640_v62  ;;  %v659_v29 = vrot.slane %v658_v23, 4  ;;  %v480_v62 = vld [vmem:[%s4355_s23 + $0x62] sm:$0x3] }
  0x50   : > { %v622_v10 = vmax.f32 %v620_v59, %v621_v22  ;;  %v665_v30 = vsel %vm559_vm0, %v446_v60, -inf  ;;  %v635_v31 = vrot.slane %v634_v24, 1  ;;  %v648_v32 = vmax.f32 %v646_v61, %v647_v25  ;;  %v479_v60 = vld [vmem:[%s4355_s23 + $0x60] sm:$0x3] }
  0x51   : > { %v629_v11 = vmax.f32 %v627_v17, %v628_v9  ;;  %v654_v33 = vrot.slane %v653_v26, 2  ;;  %v642_v34 = vrot.slane %v641_v28, 1  ;;  %v660_v36 = vmax.f32 %v658_v23, %v659_v29 }
  0x52   : > { %v666_v37 = vrot.slane %v665_v30, 4  ;;  %v1457_v38 = vsel %vm1456_vm1, %v4466_v27, -inf  ;;  %v636_v39 = vmax.f32 %v634_v24, %v635_v31  ;;  %v649_v40 = vrot.slane %v648_v32, 1 }
  0x53   : > { %v655_v41 = vmax.f32 %v653_v26, %v654_v33  ;;  %v1458_v42 = vsel %vm1456_vm1, %v622_v10, -inf  ;;  %v643_v43 = vmax.f32 %v641_v28, %v642_v34  ;;  %v661_v44 = vrot.slane %v660_v36, 2 }
  0x54   : > { %v667_v45 = vmax.f32 %v665_v30, %v666_v37  ;;  %v1459_v46 = vmax.f32 %v1457_v38, %v1458_v42  ;;  %v650_v47 = vmax.f32 %v648_v32, %v649_v40  ;;  %v1460_v52 = vsel %vm1456_vm1, %v4471_v12, -inf  ;;  %v481_v30 = vld [vmem:[%s4355_s23 + $0x64] sm:$0x3] }
  0x55   : > { %v656_v51 = vrot.slane %v655_v41, 1  ;;  %v1461_v53 = vsel %vm1456_vm1, %v629_v11, -inf  ;;  %v662_v54 = vmax.f32 %v660_v36, %v661_v44  ;;  %v1463_v27 = vsel %vm1456_vm1, %v4473_v35, -inf  ;;  %v482_v11 = vld [vmem:[%s4355_s23 + $0x66] sm:$0x3] }
  0x56   : > { %v668_v55 = vrot.slane %v667_v45, 2  ;;  %v1462_v56 = vmax.f32 %v1460_v52, %v1461_v53  ;;  %v1464_v58 = vsel %vm1456_vm1, %v636_v39, -inf  ;;  %v1466_v63 = vsel %vm1456_vm1, %v4479_v48, -inf  ;;  %v483_v39 = vld [vmem:[%s4355_s23 + $0x68] sm:$0x3] }
  0x57   : > { %v657_v57 = vmax.f32 %v655_v41, %v656_v51  ;;  %v1467_v0 = vsel %vm1456_vm1, %v643_v43, -inf  ;;  %v663_v1 = vrot.slane %v662_v54, 1  ;;  %v1465_v12 = vmax.f32 %v1463_v27, %v1464_v58  ;;  %v486_v58 = vld [vmem:[%s4355_s23 + $0x6e] sm:$0x3] }
  0x58   : > { %v669_v2 = vmax.f32 %v667_v45, %v668_v55  ;;  %v1468_v3 = vmax.f32 %v1466_v63, %v1467_v0  ;;  %v1469_v4 = vsel %vm1456_vm1, %v4481_v49, -inf  ;;  %v1470_v5 = vsel %vm1456_vm1, %v650_v47, -inf  ;;  %v484_v47 = vld [vmem:[%s4355_s23 + $0x6a] sm:$0x3] }
  0x59   : > { %v1472_v35 = vsel %vm1456_vm1, %v4483_v50, -inf  ;;  %v1473_v6 = vsel %vm1456_vm1, %v657_v57, -inf  ;;  %v664_v7 = vmax.f32 %v662_v54, %v663_v1  ;;  %v1471_v48 = vmax.f32 %v1469_v4, %v1470_v5  ;;  %v485_v57 = vld [vmem:[%s4355_s23 + $0x6c] sm:$0x3] }
  0x5a   : > { %v670_v8 = vrot.slane %v669_v2, 1  ;;  %v1474_v13 = vmax.f32 %v1472_v35, %v1473_v6  ;;  %v1475_v15 = vsel %vm1456_vm1, %v608_v14, -inf  ;;  %v1478_v59 = vsel %vm1456_vm1, %v615_v21, -inf }
  0x5b   : > { %v1655_v16 = vmul.f32 %v4422_v19, %v1459_v46  ;;  %v1656_v49 = vmul.f32 %v4422_v19, %v1462_v56  ;;  %v1476_v18 = vsel %vm1456_vm1, %v664_v7, -inf  ;;  %v1657_v50 = vmul.f32 %v4422_v19, %v1465_v12 }
  0x5c   : > { %v671_v17 = vmax.f32 %v669_v2, %v670_v8  ;;  %v1658_v61 = vmul.f32 %v4422_v19, %v1468_v3  ;;  %v1477_v20 = vmax.f32 %v1475_v15, %v1476_v18  ;;  %v1659_v22 = vmul.f32 %v4422_v19, %v1471_v48 }
  0x5d   : > { %v1660_v14 = vmul.f32 %v4422_v19, %v1474_v13  ;;  %v1783_v21 = vrot.slane %v1656_v49, 7  ;;  %v1786_v9 = vrot.slane %v1657_v50, 6  ;;  %v896_v25 = vsel %vm559_vm0, %v479_v60, -inf }
  0x5e   : > { %v1479_v23 = vsel %vm1456_vm1, %v671_v17, -inf  ;;  %v1789_v24 = vrot.slane %v1658_v61, 5  ;;  %v1661_v10 = vmul.f32 %v4422_v19, %v1477_v20  ;;  %v1792_v29 = vrot.slane %v1659_v22, 4  ;;  %v488_v22 = vld [vmem:[%s4355_s23 + $0x72] sm:$0x3] }
  0x5f   : > { %v1480_v26 = vmax.f32 %v1478_v59, %v1479_v23  ;;  %v1785_v28 = vsel %vm1784_vm2, %v1783_v21, %v1655_v16  ;;  %v1795_v32 = vrot.slane %v1660_v14, 3  ;;  %v897_v33 = vrot.slane %v896_v25, 4  ;;  %v487_v59 = vld [vmem:[%s4355_s23 + $0x70] sm:$0x3] }
  0x60   : > { %v1788_v31 = vsel %vm1787_vm3, %v1786_v9, %v1785_v28  ;;  %v903_v34 = vsel %vm559_vm0, %v480_v62, -inf  ;;  %v1798_v38 = vrot.slane %v1661_v10, 2  ;;  %v910_v43 = vsel %vm559_vm0, %v481_v30, -inf  ;;  %v489_v10 = vld [vmem:[%s4355_s23 + $0x74] sm:$0x3] }
  0x61   : > { %v1662_v36 = vmul.f32 %v4422_v19, %v1480_v26  ;;  %v1791_v37 = vsel %vm1790_vm4, %v1789_v24, %v1788_v31  ;;  %v904_v40 = vrot.slane %v903_v34, 4  ;;  %v898_v42 = vmax.f32 %v896_v25, %v897_v33  ;;  %v490_v28 = vld [vmem:[%s4355_s23 + $0x76] sm:$0x3] }
  0x62   : > { %v1794_v41 = vsel %vm1793_vm5, %v1792_v29, %v1791_v37  ;;  %v917_v44 = vsel %vm559_vm0, %v482_v11, -inf  ;;  %v911_v52 = vrot.slane %v910_v43, 4  ;;  %v924_v56 = vsel %vm559_vm0, %v483_v39, -inf  ;;  %v491_v37 = vld [vmem:[%s4355_s23 + $0x78] sm:$0x3] }
  0x63   : > { %v1797_v45 = vsel %vm1796_vm6, %v1795_v32, %v1794_v41  ;;  %v1801_v46 = vrot.slane %v1662_v36, 1  ;;  %v905_v51 = vmax.f32 %v903_v34, %v904_v40  ;;  %v899_v54 = vrot.slane %v898_v42, 2 }
  0x64   : > { %v1800_v53 = vsel %vm1799_vm7, %v1798_v38, %v1797_v45  ;;  %v918_v55 = vrot.slane %v917_v44, 4  ;;  %v912_v0 = vmax.f32 %v910_v43, %v911_v52  ;;  %v925_v1 = vrot.slane %v924_v56, 4 }
  0x65   : > { %v1803_v27 = vsel %vm1802_vm8, %v1801_v46, %v1800_v53  ;;  %v906_v63 = vrot.slane %v905_v51, 2  ;;  %v900_v12 = vmax.f32 %v898_v42, %v899_v54  ;;  %v931_v4 = vsel %vm559_vm0, %v484_v47, -inf  ;;  %v492_v46 = vld [vmem:[%s4355_s23 + $0x7a] sm:$0x3] }
  0x66   : > { %v1910_v2 = vsel %vm1456_vm1, %v1803_v27, 0.0  ;;  %v919_v3 = vmax.f32 %v917_v44, %v918_v55  ;;  %v913_v35 = vrot.slane %v912_v0, 2  ;;  %v926_v6 = vmax.f32 %v924_v56, %v925_v1 }
  0x67   : > { %1911 = vadd.xlane.f32.xlu0 %v1910_v2  ;;  %v907_v5 = vmax.f32 %v905_v51, %v906_v63  ;;  %v932_v7 = vrot.slane %v931_v4, 4  ;;  %v901_v8 = vrot.slane %v900_v12, 1  ;;  %v938_v13 = vsel %vm559_vm0, %v485_v57, -inf  ;;  %v493_v57 = vld [vmem:[%s4355_s23 + $0x7c] sm:$0x3] }
  0x68   : > { %v920_v48 = vrot.slane %v919_v3, 2  ;;  %v945_v15 = vsel %vm559_vm0, %v486_v58, -inf  ;;  %v914_v49 = vmax.f32 %v912_v0, %v913_v35  ;;  %v927_v60 = vrot.slane %v926_v6, 2  ;;  %v494_v58 = vld [vmem:[%s4355_s23 + $0x7e] sm:$0x3] }
  0x69   : > { %v908_v16 = vrot.slane %v907_v5, 1  ;;  %v933_v17 = vmax.f32 %v931_v4, %v932_v7  ;;  %v4549_v18 = vmax.f32 %v900_v12, %v901_v8  ;;  %v939_v61 = vrot.slane %v938_v13, 4 }
  0x6a   : > { %v921_v50 = vmax.f32 %v919_v3, %v920_v48  ;;  %v946_v20 = vrot.slane %v945_v15, 4  ;;  %v915_v21 = vrot.slane %v914_v49, 1  ;;  %v928_v62 = vmax.f32 %v926_v6, %v927_v60 }
  0x6b   : > { %v4552_v14 = vmax.f32 %v907_v5, %v908_v16  ;;  %v934_v23 = vrot.slane %v933_v17, 2  ;;  %v940_v24 = vmax.f32 %v938_v13, %v939_v61  ;;  %v952_v26 = vsel %vm559_vm0, %v487_v59, -inf }
  0x6c   : > { %v922_v9 = vrot.slane %v921_v50, 1  ;;  %v947_v25 = vmax.f32 %v945_v15, %v946_v20  ;;  %v4557_v29 = vmax.f32 %v914_v49, %v915_v21  ;;  %v929_v30 = vrot.slane %v928_v62, 1 }
  0x6d   : > { %v935_v11 = vmax.f32 %v933_v17, %v934_v23  ;;  %v953_v31 = vrot.slane %v952_v26, 4  ;;  %v941_v33 = vrot.slane %v940_v24, 2  ;;  %v959_v36 = vsel %vm559_vm0, %v488_v22, -inf }
  0x6e   : > { %v4559_v32 = vmax.f32 %v921_v50, %v922_v9  ;;  %v948_v34 = vrot.slane %v947_v25, 2  ;;  %v4563_v38 = vmax.f32 %v928_v62, %v929_v30  ;;  %v960_v41 = vrot.slane %v959_v36, 4 }
  0x6f   : > { %v936_v39 = vrot.slane %v935_v11, 1  ;;  %v954_v40 = vmax.f32 %v952_v26, %v953_v31  ;;  %v942_v42 = vmax.f32 %v940_v24, %v941_v33  ;;  %v966_v44 = vsel %vm559_vm0, %v489_v10, -inf }
  0x70   : > { %v949_v43 = vmax.f32 %v947_v25, %v948_v34  ;;  %v973_v45 = vsel %vm559_vm0, %v490_v28, -inf  ;;  %v961_v52 = vmax.f32 %v959_v36, %v960_v41  ;;  %v967_v53 = vrot.slane %v966_v44, 4 }
  0x71   : > { %v4568_v47 = vmax.f32 %v935_v11, %v936_v39  ;;  %v955_v51 = vrot.slane %v954_v40, 2  ;;  %v943_v54 = vrot.slane %v942_v42, 1  ;;  %v974_v56 = vrot.slane %v973_v45, 4 }
  0x72   : > { %v950_v55 = vrot.slane %v949_v43, 1  ;;  %v980_v27 = vsel %vm559_vm0, %v491_v37, -inf  ;;  %v962_v0 = vrot.slane %v961_v52, 2  ;;  %v968_v1 = vmax.f32 %v966_v44, %v967_v53 }
  0x73   : > { %v956_v63 = vmax.f32 %v954_v40, %v955_v51  ;;  %v981_v2 = vrot.slane %v980_v27, 4  ;;  %v944_v12 = vmax.f32 %v942_v42, %v943_v54  ;;  %v975_v4 = vmax.f32 %v973_v45, %v974_v56 }
  0x74   : > { %v951_v3 = vmax.f32 %v949_v43, %v950_v55  ;;  %v987_v5 = vsel %vm559_vm0, %v492_v46, -inf  ;;  %v963_v6 = vmax.f32 %v961_v52, %v962_v0  ;;  %v969_v7 = vrot.slane %v968_v1, 2 }
  0x75   : > { %v957_v35 = vrot.slane %v956_v63, 1  ;;  %v982_v8 = vmax.f32 %v980_v27, %v981_v2  ;;  %v976_v48 = vrot.slane %v975_v4, 2  ;;  %v988_v13 = vrot.slane %v987_v5, 4 }
  0x76   : > { %v994_v15 = vsel %vm559_vm0, %v493_v57, -inf  ;;  %v1001_v59 = vsel %vm559_vm0, %v494_v58, -inf  ;;  %v964_v49 = vrot.slane %v963_v6, 1  ;;  %v970_v60 = vmax.f32 %v968_v1, %v969_v7 }
  0x77   : > { %v958_v16 = vmax.f32 %v956_v63, %v957_v35  ;;  %v983_v17 = vrot.slane %v982_v8, 2  ;;  %v977_v50 = vmax.f32 %v975_v4, %v976_v48  ;;  %v989_v61 = vmax.f32 %v987_v5, %v988_v13  ;;  %v447_v35 = vld [vmem:[%s4355_s23 + $0x20] sm:$0x3] }
  0x78   : > { %v995_v20 = vrot.slane %v994_v15, 4  ;;  %v1002_v22 = vrot.slane %v1001_v59, 4  ;;  %v965_v21 = vmax.f32 %v963_v6, %v964_v49  ;;  %v971_v62 = vrot.slane %v970_v60, 1 }
  0x79   : > { %v984_v23 = vmax.f32 %v982_v8, %v983_v17  ;;  %v1529_v9 = vsel %vm1456_vm1, %v4549_v18, -inf  ;;  %v978_v24 = vrot.slane %v977_v50, 1  ;;  %v990_v25 = vrot.slane %v989_v61, 2 }
  0x7a   : > { %v996_v26 = vmax.f32 %v994_v15, %v995_v20  ;;  %v1003_v10 = vmax.f32 %v1001_v59, %v1002_v22  ;;  %v972_v28 = vmax.f32 %v970_v60, %v971_v62  ;;  %v1530_v11 = vsel %vm1456_vm1, %v958_v16, -inf  ;;  %v448_v15 = vld [vmem:[%s4355_s23 + $0x22] sm:$0x3]  ;;  %v449_v59 = vld [vmem:[%s4355_s23 + $0x24] sm:$0x3] }
  0x7b   : > { %v985_v30 = vrot.slane %v984_v23, 1  ;;  %v1532_v31 = vsel %vm1456_vm1, %v4552_v14, -inf  ;;  %v979_v33 = vmax.f32 %v977_v50, %v978_v24  ;;  %v991_v34 = vmax.f32 %v989_v61, %v990_v25 }
  0x7c   : > { %v997_v36 = vrot.slane %v996_v26, 2  ;;  %v1004_v37 = vrot.slane %v1003_v10, 2  ;;  %v1531_v40 = vmax.f32 %v1529_v9, %v1530_v11  ;;  %v1533_v41 = vsel %vm1456_vm1, %v965_v21, -inf  ;;  %v450_v21 = vld [vmem:[%s4355_s23 + $0x26] sm:$0x3] }
  0x7d   : > { %v986_v39 = vmax.f32 %v984_v23, %v985_v30  ;;  %v1535_v18 = vsel %vm1456_vm1, %v4557_v29, -inf  ;;  %v992_v42 = vrot.slane %v991_v34, 1  ;;  %v1534_v45 = vmax.f32 %v1532_v31, %v1533_v41  ;;  %v451_v23 = vld [vmem:[%s4355_s23 + $0x28] sm:$0x3] }
  0x7e   : > { %v998_v43 = vmax.f32 %v996_v26, %v997_v36  ;;  %v1005_v44 = vmax.f32 %v1003_v10, %v1004_v37  ;;  %v1536_v46 = vsel %vm1456_vm1, %v972_v28, -inf  ;;  %v1538_v14 = vsel %vm1456_vm1, %v4559_v32, -inf }
  0x7f   : > { %v1539_v51 = vsel %vm1456_vm1, %v979_v33, -inf  ;;  %v1541_v52 = vsel %vm1456_vm1, %v4563_v38, -inf  ;;  %v993_v53 = vmax.f32 %v991_v34, %v992_v42  ;;  %v1537_v56 = vmax.f32 %v1535_v18, %v1536_v46 }
  0x80   : > { %v999_v54 = vrot.slane %v998_v43, 1  ;;  %v1006_v55 = vrot.slane %v1005_v44, 1  ;;  %v1540_v29 = vmax.f32 %v1538_v14, %v1539_v51  ;;  %v1542_v27 = vsel %vm1456_vm1, %v986_v39, -inf }
  0x81   : > { %v1544_v57 = vsel %vm1456_vm1, %v4568_v47, -inf  ;;  %v1547_v58 = vsel %vm1456_vm1, %v944_v12, -inf  ;;  %v1543_v0 = vmax.f32 %v1541_v52, %v1542_v27  ;;  %v1545_v38 = vsel %vm1456_vm1, %v993_v53, -inf }
  0x82   : > { %v1000_v63 = vmax.f32 %v998_v43, %v999_v54  ;;  %v1007_v32 = vmax.f32 %v1005_v44, %v1006_v55  ;;  %v1546_v1 = vmax.f32 %v1544_v57, %v1545_v38  ;;  %v1550_v2 = vsel %vm1456_vm1, %v951_v3, -inf }
  0x83   : > { %v1679_v4 = vmul.f32 %v4422_v19, %v1531_v40  ;;  %v1680_v5 = vmul.f32 %v4422_v19, %v1534_v45  ;;  %v1681_v12 = vmul.f32 %v4422_v19, %v1537_v56  ;;  %v1682_v7 = vmul.f32 %v4422_v19, %v1540_v29  ;;  %v453_v45 = vld [vmem:[%s4355_s23 + $0x2c] sm:$0x3]  ;;  %v454_v29 = vld [vmem:[%s4355_s23 + $0x2e] sm:$0x3] }
  0x84   : > { %v1548_v6 = vsel %vm1456_vm1, %v1000_v63, -inf  ;;  %v1551_v47 = vsel %vm1456_vm1, %v1007_v32, -inf  ;;  %v1683_v13 = vmul.f32 %v4422_v19, %v1543_v0  ;;  %v1684_v3 = vmul.f32 %v4422_v19, %v1546_v1  ;;  %v455_v1 = vld [vmem:[%s4355_s23 + $0x30] sm:$0x3] }
  0x85   : > { %v1549_v8 = vmax.f32 %v1547_v58, %v1548_v6  ;;  %v1552_v48 = vmax.f32 %v1550_v2, %v1551_v47  ;;  %v1832_v16 = vrot.slane %v1680_v5, 7  ;;  %v1834_v49 = vrot.slane %v1681_v12, 6 }
  0x86   : > { %v1836_v60 = vrot.slane %v1682_v7, 5  ;;  %v672_v17 = vsel %vm559_vm0, %v447_v35, -inf  ;;  %v1838_v20 = vrot.slane %v1683_v13, 4  ;;  %v1840_v22 = vrot.slane %v1684_v3, 3 }
  0x87   : > { %v1685_v50 = vmul.f32 %v4422_v19, %v1549_v8  ;;  %v1686_v61 = vmul.f32 %v4422_v19, %v1552_v48  ;;  %v1833_v62 = vsel %vm1784_vm2, %v1832_v16, %v1679_v4  ;;  %v673_v9 = vrot.slane %v672_v17, 4  ;;  %v452_v19 = vld [vmem:[%s4355_s23 + $0x2a] sm:$0x3]  ;;  %v456_v8 = vld [vmem:[%s4355_s23 + $0x32] sm:$0x3] }
  0x88   : > { %v679_v24 = vsel %vm559_vm0, %v448_v15, -inf  ;;  %v686_v25 = vsel %vm559_vm0, %v449_v59, -inf  ;;  %v1835_v26 = vsel %vm1787_vm3, %v1834_v49, %v1833_v62  ;;  %v693_v34 = vsel %vm559_vm0, %v450_v21, -inf  ;;  %v457_v48 = vld [vmem:[%s4355_s23 + $0x34] sm:$0x3] }
  0x89   : > { %v1842_v10 = vrot.slane %v1685_v50, 2  ;;  %v1844_v28 = vrot.slane %v1686_v61, 1  ;;  %v680_v30 = vrot.slane %v679_v24, 4  ;;  %v1837_v11 = vsel %vm1790_vm4, %v1836_v60, %v1835_v26  ;;  %v458_v50 = vld [vmem:[%s4355_s23 + $0x36] sm:$0x3] }
  0x8a   : > { %v674_v31 = vmax.f32 %v672_v17, %v673_v9  ;;  %v687_v33 = vrot.slane %v686_v25, 4  ;;  %v1839_v36 = vsel %vm1793_vm5, %v1838_v20, %v1837_v11  ;;  %v694_v39 = vrot.slane %v693_v34, 4  ;;  %v459_v61 = vld [vmem:[%s4355_s23 + $0x38] sm:$0x3]  ;;  %v460_v11 = vld [vmem:[%s4355_s23 + $0x3a] sm:$0x3] }
  0x8b   : > { %v681_v37 = vmax.f32 %v679_v24, %v680_v30  ;;  %v700_v40 = vsel %vm559_vm0, %v451_v23, -inf  ;;  %v1841_v41 = vsel %vm1796_vm6, %v1840_v22, %v1839_v36  ;;  %v707_v51 = vsel %vm559_vm0, %v452_v19, -inf }
  0x8c   : > { %v675_v18 = vrot.slane %v674_v31, 2  ;;  %v688_v42 = vmax.f32 %v686_v25, %v687_v33  ;;  %v701_v43 = vrot.slane %v700_v40, 4  ;;  %v1843_v44 = vsel %vm1799_vm7, %v1842_v10, %v1841_v41  ;;  %v461_v41 = vld [vmem:[%s4355_s23 + $0x3c] sm:$0x3] }
  0x8d   : > { %v682_v46 = vrot.slane %v681_v37, 2  ;;  %v695_v14 = vmax.f32 %v693_v34, %v694_v39  ;;  %v1845_v52 = vsel %vm1802_vm8, %v1844_v28, %v1843_v44  ;;  %v708_v58 = vrot.slane %v707_v51, 4 }
  0x8e   : > { %v676_v53 = vmax.f32 %v674_v31, %v675_v18  ;;  %v689_v54 = vrot.slane %v688_v42, 2  ;;  %v702_v55 = vmax.f32 %v700_v40, %v701_v43  ;;  %v1919_v56 = vsel %vm1456_vm1, %v1845_v52, 0.0 }
  0x8f   : > { %v683_v27 = vmax.f32 %v681_v37, %v682_v46  ;;  %v696_v57 = vrot.slane %v695_v14, 2  ;;  %1920 = vadd.xlane.f32.xlu1 %v1919_v56  ;;  %v714_v38 = vsel %vm559_vm0, %v453_v45, -inf  ;;  %v709_v5 = vmax.f32 %v707_v51, %v708_v58  ;;  %v462_v56 = vld [vmem:[%s4355_s23 + $0x3e] sm:$0x3] }
  0x90   : > { %v677_v63 = vrot.slane %v676_v53, 1  ;;  %v690_v32 = vmax.f32 %v688_v42, %v689_v54  ;;  %v703_v0 = vrot.slane %v702_v55, 2  ;;  %v715_v35 = vrot.slane %v714_v38, 4 }
  0x91   : > { %v684_v2 = vrot.slane %v683_v27, 1  ;;  %v697_v4 = vmax.f32 %v695_v14, %v696_v57  ;;  %v721_v7 = vsel %vm559_vm0, %v454_v29, -inf  ;;  %v710_v15 = vrot.slane %v709_v5, 2 }
  0x92   : > { %v4630_v6 = vmax.f32 %v676_v53, %v677_v63  ;;  %v691_v47 = vrot.slane %v690_v32, 1  ;;  %v704_v12 = vmax.f32 %v702_v55, %v703_v0  ;;  %v716_v59 = vmax.f32 %v714_v38, %v715_v35 }
  0x93   : > { %v4635_v13 = vmax.f32 %v683_v27, %v684_v2  ;;  %v698_v3 = vrot.slane %v697_v4, 1  ;;  %v722_v60 = vrot.slane %v721_v7, 4  ;;  %v728_v17 = vsel %vm559_vm0, %v455_v1, -inf }
  0x94   : > { %v4637_v16 = vmax.f32 %v690_v32, %v691_v47  ;;  %v705_v49 = vrot.slane %v704_v12, 1  ;;  %v711_v22 = vmax.f32 %v709_v5, %v710_v15  ;;  %v717_v21 = vrot.slane %v716_v59, 2 }
  0x95   : > { %v4642_v20 = vmax.f32 %v697_v4, %v698_v3  ;;  %v729_v62 = vrot.slane %v728_v17, 4  ;;  %v723_v9 = vmax.f32 %v721_v7, %v722_v60  ;;  %v735_v24 = vsel %vm559_vm0, %v456_v8, -inf }
  0x96   : > { %v4644_v23 = vmax.f32 %v704_v12, %v705_v49  ;;  %v742_v25 = vsel %vm559_vm0, %v457_v48, -inf  ;;  %v712_v26 = vrot.slane %v711_v22, 1  ;;  %v718_v10 = vmax.f32 %v716_v59, %v717_v21 }
  0x97   : > { %v730_v28 = vmax.f32 %v728_v17, %v729_v62  ;;  %v736_v30 = vrot.slane %v735_v24, 4  ;;  %v724_v19 = vrot.slane %v723_v9, 2  ;;  %v743_v31 = vrot.slane %v742_v25, 4 }
  0x98   : > { %v749_v33 = vsel %vm559_vm0, %v458_v50, -inf  ;;  %v756_v34 = vsel %vm559_vm0, %v459_v61, -inf  ;;  %v4651_v36 = vmax.f32 %v711_v22, %v712_v26  ;;  %v719_v37 = vrot.slane %v718_v10, 1 }
  0x99   : > { %v731_v39 = vrot.slane %v730_v28, 2  ;;  %v737_v40 = vmax.f32 %v735_v24, %v736_v30  ;;  %v725_v18 = vmax.f32 %v723_v9, %v724_v19  ;;  %v744_v42 = vmax.f32 %v742_v25, %v743_v31 }
  0x9a   : > { %v750_v43 = vrot.slane %v749_v33, 4  ;;  %v757_v44 = vrot.slane %v756_v34, 4  ;;  %v720_v45 = vmax.f32 %v718_v10, %v719_v37  ;;  %v763_v51 = vsel %vm559_vm0, %v460_v11, -inf }
  0x9b   : > { %v732_v46 = vmax.f32 %v730_v28, %v731_v39  ;;  %v738_v14 = vrot.slane %v737_v40, 2  ;;  %v726_v52 = vrot.slane %v725_v18, 1  ;;  %v745_v53 = vrot.slane %v744_v42, 2 }
  0x9c   : > { %v751_v54 = vmax.f32 %v749_v33, %v750_v43  ;;  %v758_v55 = vmax.f32 %v756_v34, %v757_v44  ;;  %v764_v57 = vrot.slane %v763_v51, 4  ;;  %v770_v58 = vsel %vm559_vm0, %v461_v41, -inf }
  0x9d   : > { %v733_v29 = vrot.slane %v732_v46, 1  ;;  %v739_v27 = vmax.f32 %v737_v40, %v738_v14  ;;  %v727_v63 = vmax.f32 %v725_v18, %v726_v52  ;;  %v746_v32 = vmax.f32 %v744_v42, %v745_v53  ;;  %v511_v52 = vld [vmem:[%s4355_s23 + $0xa0] sm:$0x3] }
  0x9e   : > { %v752_v0 = vrot.slane %v751_v54, 2  ;;  %v759_v38 = vrot.slane %v758_v55, 2  ;;  %v765_v4 = vmax.f32 %v763_v51, %v764_v57  ;;  %v771_v5 = vrot.slane %v770_v58, 4 }
  0x9f   : > { %v734_v1 = vmax.f32 %v732_v46, %v733_v29  ;;  %v740_v2 = vrot.slane %v739_v27, 1  ;;  %v747_v35 = vrot.slane %v746_v32, 1  ;;  %v777_v7 = vsel %vm559_vm0, %v462_v56, -inf }
  0xa0   : > { %v753_v47 = vmax.f32 %v751_v54, %v752_v0  ;;  %v760_v12 = vmax.f32 %v758_v55, %v759_v38  ;;  %v766_v48 = vrot.slane %v765_v4, 2  ;;  %v772_v3 = vmax.f32 %v770_v58, %v771_v5  ;;  %v513_v5 = vld [vmem:[%s4355_s23 + $0xa4] sm:$0x3] }
  0xa1   : > { %v741_v8 = vmax.f32 %v739_v27, %v740_v2  ;;  %v778_v15 = vrot.slane %v777_v7, 4  ;;  %v748_v59 = vmax.f32 %v746_v32, %v747_v35  ;;  %v1481_v17 = vsel %vm1456_vm1, %v4630_v6, -inf  ;;  %v512_v32 = vld [vmem:[%s4355_s23 + $0xa2] sm:$0x3] }
  0xa2   : > { %v754_v49 = vrot.slane %v753_v47, 1  ;;  %v761_v60 = vrot.slane %v760_v12, 1  ;;  %v767_v50 = vmax.f32 %v765_v4, %v766_v48  ;;  %v773_v61 = vrot.slane %v772_v3, 2 }
  0xa3   : > { %v779_v22 = vmax.f32 %v777_v7, %v778_v15  ;;  %v1482_v21 = vsel %vm1456_vm1, %v734_v1, -inf  ;;  %v1484_v25 = vsel %vm1456_vm1, %v4635_v13, -inf  ;;  %v1485_v30 = vsel %vm1456_vm1, %v741_v8, -inf  ;;  %v514_v7 = vld [vmem:[%s4355_s23 + $0xa6] sm:$0x3] }
  0xa4   : > { %v755_v62 = vmax.f32 %v753_v47, %v754_v49  ;;  %v762_v9 = vmax.f32 %v760_v12, %v761_v60  ;;  %v1483_v24 = vmax.f32 %v1481_v17, %v1482_v21  ;;  %v768_v26 = vrot.slane %v767_v50, 1  ;;  %v515_v60 = vld [vmem:[%s4355_s23 + $0xa8] sm:$0x3]  ;;  %v516_v17 = vld [vmem:[%s4355_s23 + $0xaa] sm:$0x3] }
  0xa5   : > { %v774_v10 = vmax.f32 %v772_v3, %v773_v61  ;;  %v780_v28 = vrot.slane %v779_v22, 2  ;;  %v1486_v11 = vmax.f32 %v1484_v25, %v1485_v30  ;;  %v1487_v6 = vsel %vm1456_vm1, %v4637_v16, -inf }
  0xa6   : > { %v1488_v19 = vsel %vm1456_vm1, %v748_v59, -inf  ;;  %v1490_v31 = vsel %vm1456_vm1, %v4642_v20, -inf  ;;  %v769_v33 = vmax.f32 %v767_v50, %v768_v26  ;;  %v1491_v13 = vsel %vm1456_vm1, %v755_v62, -inf }
  0xa7   : > { %v775_v34 = vrot.slane %v774_v10, 1  ;;  %v781_v37 = vmax.f32 %v779_v22, %v780_v28  ;;  %v1489_v39 = vmax.f32 %v1487_v6, %v1488_v19  ;;  %v1493_v40 = vsel %vm1456_vm1, %v4644_v23, -inf  ;;  %v4681_v23 = vld [vmem:[%s5825_s3] ss:$0 sm:$0xff] }
  0xa8   : > { %v1494_v41 = vsel %vm1456_vm1, %v762_v9, -inf  ;;  %v1496_v16 = vsel %vm1456_vm1, %v4651_v36, -inf  ;;  %v1492_v43 = vmax.f32 %v1490_v31, %v1491_v13  ;;  %v1497_v20 = vsel %vm1456_vm1, %v769_v33, -inf }
  0xa9   : > { %v776_v18 = vmax.f32 %v774_v10, %v775_v34  ;;  %v782_v42 = vrot.slane %v781_v37, 1  ;;  %v1495_v44 = vmax.f32 %v1493_v40, %v1494_v41  ;;  %v1499_v46 = vsel %vm1456_vm1, %v720_v45, -inf  ;;  %v518_v40 = vld [vmem:[%s4355_s23 + $0xae] sm:$0x3] }
  0xaa   : > { %v1502_v14 = vsel %vm1456_vm1, %v727_v63, -inf  ;;  %v1663_v51 = vmul.f32 %v4681_v23, %v1483_v24  ;;  %v1498_v53 = vmax.f32 %v1496_v16, %v1497_v20  ;;  %v1664_v55 = vmul.f32 %v4681_v23, %v1486_v11  ;;  %v517_v11 = vld [vmem:[%s4355_s23 + $0xac] sm:$0x3] }
  0xab   : > { %v783_v36 = vmax.f32 %v781_v37, %v782_v42  ;;  %v1500_v54 = vsel %vm1456_vm1, %v776_v18, -inf  ;;  %v1665_v45 = vmul.f32 %v4681_v23, %v1489_v39  ;;  %v1666_v29 = vmul.f32 %v4681_v23, %v1492_v43 }
  0xac   : > { %v1501_v56 = vmax.f32 %v1499_v46, %v1500_v54  ;;  %v1667_v27 = vmul.f32 %v4681_v23, %v1495_v44  ;;  %v1668_v58 = vmul.f32 %v4681_v23, %v1498_v53  ;;  %v1804_v63 = vrot.slane %v1664_v55, 7  ;;  %v519_v46 = vld [vmem:[%s4355_s23 + $0xb0] sm:$0x3] }
  0xad   : > { %v1503_v57 = vsel %vm1456_vm1, %v783_v36, -inf  ;;  %v1120_v0 = vsel %vm559_vm0, %v511_v52, -inf  ;;  %v1806_v2 = vrot.slane %v1665_v45, 6  ;;  %v1808_v4 = vrot.slane %v1666_v29, 5  ;;  %v520_v45 = vld [vmem:[%s4355_s23 + $0xb2] sm:$0x3] }
  0xae   : > { %v1504_v38 = vmax.f32 %v1502_v14, %v1503_v57  ;;  %v1669_v1 = vmul.f32 %v4681_v23, %v1501_v56  ;;  %v1805_v35 = vsel %vm1784_vm2, %v1804_v63, %v1663_v51  ;;  %v1810_v47 = vrot.slane %v1667_v27, 4 }
  0xaf   : > { %v1812_v12 = vrot.slane %v1668_v58, 3  ;;  %v1121_v8 = vrot.slane %v1120_v0, 4  ;;  %v1807_v3 = vsel %vm1787_vm3, %v1806_v2, %v1805_v35  ;;  %v1127_v59 = vsel %vm559_vm0, %v512_v32, -inf  ;;  %v522_v2 = vld [vmem:[%s4355_s23 + $0xb6] sm:$0x3] }
  0xb0   : > { %v1670_v48 = vmul.f32 %v4681_v23, %v1504_v38  ;;  %v1814_v15 = vrot.slane %v1669_v1, 2  ;;  %v1809_v49 = vsel %vm1790_vm4, %v1808_v4, %v1807_v3  ;;  %v1128_v61 = vrot.slane %v1127_v59, 4  ;;  %v521_v1 = vld [vmem:[%s4355_s23 + $0xb4] sm:$0x3]  ;;  %v523_v3 = vld [vmem:[%s4355_s23 + $0xb8] sm:$0x3] }
  0xb1   : > { %v1122_v50 = vmax.f32 %v1120_v0, %v1121_v8  ;;  %v1134_v22 = vsel %vm559_vm0, %v513_v5, -inf  ;;  %v1811_v21 = vsel %vm1793_vm5, %v1810_v47, %v1809_v49  ;;  %v1141_v24 = vsel %vm559_vm0, %v514_v7, -inf }
  0xb2   : > { %v1816_v62 = vrot.slane %v1670_v48, 1  ;;  %v1135_v9 = vrot.slane %v1134_v22, 4  ;;  %v1813_v25 = vsel %vm1796_vm6, %v1812_v12, %v1811_v21  ;;  %v1129_v10 = vmax.f32 %v1127_v59, %v1128_v61 }
  0xb3   : > { %v1123_v26 = vrot.slane %v1122_v50, 2  ;;  %v1142_v28 = vrot.slane %v1141_v24, 4  ;;  %v1815_v30 = vsel %vm1799_vm7, %v1814_v15, %v1813_v25  ;;  %v1148_v19 = vsel %vm559_vm0, %v515_v60, -inf }
  0xb4   : > { %v1136_v6 = vmax.f32 %v1134_v22, %v1135_v9  ;;  %v1155_v31 = vsel %vm559_vm0, %v516_v17, -inf  ;;  %v1817_v33 = vsel %vm1802_vm8, %v1816_v62, %v1815_v30  ;;  %v1130_v37 = vrot.slane %v1129_v10, 2  ;;  %v524_v17 = vld [vmem:[%s4355_s23 + $0xba] sm:$0x3] }
  0xb5   : > { %v1124_v34 = vmax.f32 %v1122_v50, %v1123_v26  ;;  %v1143_v39 = vmax.f32 %v1141_v24, %v1142_v28  ;;  %v1913_v13 = vsel %vm1456_vm1, %v1817_v33, 0.0  ;;  %v1149_v16 = vrot.slane %v1148_v19, 4  ;;  %v525_v26 = vld [vmem:[%s4355_s23 + $0xbc] sm:$0x3] }
  0xb6   : > { %v1137_v41 = vrot.slane %v1136_v6, 2  ;;  %v1156_v18 = vrot.slane %v1155_v31, 4  ;;  %1914 = vadd.xlane.f32.xlu0 %v1913_v13  ;;  %v1131_v43 = vmax.f32 %v1129_v10, %v1130_v37  ;;  %v1162_v20 = vsel %vm559_vm0, %v517_v11, -inf }
  0xb7   : > { %v1125_v42 = vrot.slane %v1124_v34, 1  ;;  %v1144_v44 = vrot.slane %v1143_v39, 2  ;;  %v1150_v51 = vmax.f32 %v1148_v19, %v1149_v16  ;;  %v1163_v36 = vrot.slane %v1162_v20, 4 }
  0xb8   : > { %v1138_v14 = vmax.f32 %v1136_v6, %v1137_v41  ;;  %v1157_v52 = vmax.f32 %v1155_v31, %v1156_v18  ;;  %v1132_v54 = vrot.slane %v1131_v43, 1  ;;  %v1169_v56 = vsel %vm559_vm0, %v518_v40, -inf  ;;  %v526_v40 = vld [vmem:[%s4355_s23 + $0xbe] sm:$0x3] }
  0xb9   : > { %v4717_v53 = vmax.f32 %v1124_v34, %v1125_v42  ;;  %v1145_v55 = vmax.f32 %v1143_v39, %v1144_v44  ;;  %v1151_v27 = vrot.slane %v1150_v51, 2  ;;  %v1164_v58 = vmax.f32 %v1162_v20, %v1163_v36 }
  0xba   : > { %v1139_v29 = vrot.slane %v1138_v14, 1  ;;  %v1158_v57 = vrot.slane %v1157_v52, 2  ;;  %v4721_v63 = vmax.f32 %v1131_v43, %v1132_v54  ;;  %v1170_v0 = vrot.slane %v1169_v56, 4 }
  0xbb   : > { %v1146_v32 = vrot.slane %v1145_v55, 1  ;;  %v1176_v38 = vsel %vm559_vm0, %v519_v46, -inf  ;;  %v1152_v5 = vmax.f32 %v1150_v51, %v1151_v27  ;;  %v1165_v47 = vrot.slane %v1164_v58, 2 }
  0xbc   : > { %v4726_v4 = vmax.f32 %v1138_v14, %v1139_v29  ;;  %v1159_v35 = vmax.f32 %v1157_v52, %v1158_v57  ;;  %v1171_v7 = vmax.f32 %v1169_v56, %v1170_v0  ;;  %v1177_v8 = vrot.slane %v1176_v38, 4 }
  0xbd   : > { %v4728_v12 = vmax.f32 %v1145_v55, %v1146_v32  ;;  %v1183_v48 = vsel %vm559_vm0, %v520_v45, -inf  ;;  %v1153_v15 = vrot.slane %v1152_v5, 1  ;;  %v1166_v49 = vmax.f32 %v1164_v58, %v1165_v47 }
  0xbe   : > { %v1160_v59 = vrot.slane %v1159_v35, 1  ;;  %v1184_v60 = vrot.slane %v1183_v48, 4  ;;  %v1172_v50 = vrot.slane %v1171_v7, 2  ;;  %v1178_v61 = vmax.f32 %v1176_v38, %v1177_v8 }
  0xbf   : > { %v1190_v22 = vsel %vm559_vm0, %v521_v1, -inf  ;;  %v1197_v21 = vsel %vm559_vm0, %v522_v2, -inf  ;;  %v4735_v62 = vmax.f32 %v1152_v5, %v1153_v15  ;;  %v1167_v24 = vrot.slane %v1166_v49, 1 }
  0xc0   : > { %v4737_v9 = vmax.f32 %v1159_v35, %v1160_v59  ;;  %v1185_v25 = vmax.f32 %v1183_v48, %v1184_v60  ;;  %v1173_v10 = vmax.f32 %v1171_v7, %v1172_v50  ;;  %v1179_v28 = vrot.slane %v1178_v61, 2 }
  0xc1   : > { %v1191_v30 = vrot.slane %v1190_v22, 4  ;;  %v1198_v11 = vrot.slane %v1197_v21, 4  ;;  %v4740_v6 = vmax.f32 %v1166_v49, %v1167_v24  ;;  %v1204_v31 = vsel %vm559_vm0, %v523_v3, -inf }
  0xc2   : > { %v1186_v19 = vrot.slane %v1185_v25, 2  ;;  %v1211_v33 = vsel %vm559_vm0, %v524_v17, -inf  ;;  %v1174_v34 = vrot.slane %v1173_v10, 1  ;;  %v1180_v37 = vmax.f32 %v1178_v61, %v1179_v28 }
  0xc3   : > { %v1192_v39 = vmax.f32 %v1190_v22, %v1191_v30  ;;  %v1199_v13 = vmax.f32 %v1197_v21, %v1198_v11  ;;  %v1205_v16 = vrot.slane %v1204_v31, 4  ;;  %v1212_v18 = vrot.slane %v1211_v33, 4 }
  0xc4   : > { %v1187_v41 = vmax.f32 %v1185_v25, %v1186_v19  ;;  %v1218_v42 = vsel %vm559_vm0, %v525_v26, -inf  ;;  %v1175_v43 = vmax.f32 %v1173_v10, %v1174_v34  ;;  %v1181_v44 = vrot.slane %v1180_v37, 1 }
  0xc5   : > { %v1193_v20 = vrot.slane %v1192_v39, 2  ;;  %v1200_v46 = vrot.slane %v1199_v13, 2  ;;  %v1206_v51 = vmax.f32 %v1204_v31, %v1205_v16  ;;  %v1213_v52 = vmax.f32 %v1211_v33, %v1212_v18 }
  0xc6   : > { %v1188_v14 = vrot.slane %v1187_v41, 1  ;;  %v1219_v36 = vrot.slane %v1218_v42, 4  ;;  %v1182_v54 = vmax.f32 %v1180_v37, %v1181_v44  ;;  %v1225_v45 = vsel %vm559_vm0, %v526_v40, -inf }
  0xc7   : > { %v1194_v55 = vmax.f32 %v1192_v39, %v1193_v20  ;;  %v1201_v56 = vmax.f32 %v1199_v13, %v1200_v46  ;;  %v1207_v27 = vrot.slane %v1206_v51, 2  ;;  %v1214_v57 = vrot.slane %v1213_v52, 2  ;;  %v496_v46 = vld [vmem:[%s4355_s23 + $0x82] sm:$0x3] }
  0xc8   : > { %v1189_v29 = vmax.f32 %v1187_v41, %v1188_v14  ;;  %v1220_v58 = vmax.f32 %v1218_v42, %v1219_v36  ;;  %v1226_v38 = vrot.slane %v1225_v45, 4  ;;  %v1577_v1 = vsel %vm1456_vm1, %v4717_v53, -inf }
  0xc9   : > { %v1195_v32 = vrot.slane %v1194_v55, 1  ;;  %v1202_v0 = vrot.slane %v1201_v56, 1  ;;  %v1208_v2 = vmax.f32 %v1206_v51, %v1207_v27  ;;  %v1215_v5 = vmax.f32 %v1213_v52, %v1214_v57  ;;  %v497_v52 = vld [vmem:[%s4355_s23 + $0x84] sm:$0x3] }
  0xca   : > { %v1221_v35 = vrot.slane %v1220_v58, 2  ;;  %v1578_v47 = vsel %vm1456_vm1, %v1182_v54, -inf  ;;  %v1227_v48 = vmax.f32 %v1225_v45, %v1226_v38  ;;  %v1580_v60 = vsel %vm1456_vm1, %v4721_v63, -inf }
  0xcb   : > { %v1196_v7 = vmax.f32 %v1194_v55, %v1195_v32  ;;  %v1203_v8 = vmax.f32 %v1201_v56, %v1202_v0  ;;  %v1579_v3 = vmax.f32 %v1577_v1, %v1578_v47  ;;  %v1209_v15 = vrot.slane %v1208_v2, 1  ;;  %v499_v32 = vld [vmem:[%s4355_s23 + $0x88] sm:$0x3]  ;;  %v500_v47 = vld [vmem:[%s4355_s23 + $0x8a] sm:$0x3] }
  0xcc   : > { %v1216_v59 = vrot.slane %v1215_v5, 1  ;;  %v1222_v49 = vmax.f32 %v1220_v58, %v1221_v35  ;;  %v1228_v17 = vrot.slane %v1227_v48, 2  ;;  %v1581_v50 = vsel %vm1456_vm1, %v1189_v29, -inf  ;;  %v498_v29 = vld [vmem:[%s4355_s23 + $0x86] sm:$0x3] }
  0xcd   : > { %v1583_v53 = vsel %vm1456_vm1, %v4726_v4, -inf  ;;  %v1584_v61 = vsel %vm1456_vm1, %v1196_v7, -inf  ;;  %v1210_v22 = vmax.f32 %v1208_v2, %v1209_v15  ;;  %v1582_v25 = vmax.f32 %v1580_v60, %v1581_v50 }
  0xce   : > { %v1217_v21 = vmax.f32 %v1215_v5, %v1216_v59  ;;  %v1223_v24 = vrot.slane %v1222_v49, 1  ;;  %v1229_v26 = vmax.f32 %v1227_v48, %v1228_v17  ;;  %v1585_v10 = vmax.f32 %v1583_v53, %v1584_v61 }
  0xcf   : > { %v1586_v28 = vsel %vm1456_vm1, %v4728_v12, -inf  ;;  %v1587_v63 = vsel %vm1456_vm1, %v1203_v8, -inf  ;;  %v1589_v19 = vsel %vm1456_vm1, %v4735_v62, -inf  ;;  %v1590_v4 = vsel %vm1456_vm1, %v1210_v22, -inf  ;;  %v495_v62 = vld [vmem:[%s4355_s23 + $0x80] sm:$0x3] }
  0xd0   : > { %v1224_v30 = vmax.f32 %v1222_v49, %v1223_v24  ;;  %v1588_v11 = vmax.f32 %v1586_v28, %v1587_v63  ;;  %v1230_v31 = vrot.slane %v1229_v26, 1  ;;  %v1591_v33 = vmax.f32 %v1589_v19, %v1590_v4  ;;  %v501_v22 = vld [vmem:[%s4355_s23 + $0x8c] sm:$0x3] }
  0xd1   : > { %v1592_v34 = vsel %vm1456_vm1, %v4737_v9, -inf  ;;  %v1593_v37 = vsel %vm1456_vm1, %v1217_v21, -inf  ;;  %v1595_v12 = vsel %vm1456_vm1, %v4740_v6, -inf  ;;  %v1598_v40 = vsel %vm1456_vm1, %v1175_v43, -inf }
  0xd2   : > { %v1594_v39 = vmax.f32 %v1592_v34, %v1593_v37  ;;  %v1596_v13 = vsel %vm1456_vm1, %v1224_v30, -inf  ;;  %v1231_v41 = vmax.f32 %v1229_v26, %v1230_v31  ;;  %v1695_v18 = vmul.f32 %v4681_v23, %v1579_v3 }
  0xd3   : > { %v1597_v16 = vmax.f32 %v1595_v12, %v1596_v13  ;;  %v1696_v42 = vmul.f32 %v4681_v23, %v1582_v25  ;;  %v1697_v9 = vmul.f32 %v4681_v23, %v1585_v10  ;;  %v1698_v44 = vmul.f32 %v4681_v23, %v1588_v11  ;;  %v502_v11 = vld [vmem:[%s4355_s23 + $0x8e] sm:$0x3]  ;;  %v503_v12 = vld [vmem:[%s4355_s23 + $0x90] sm:$0x3] }
  0xd4   : > { %v1699_v20 = vmul.f32 %v4681_v23, %v1591_v33  ;;  %v1700_v6 = vmul.f32 %v4681_v23, %v1594_v39  ;;  %v1599_v43 = vsel %vm1456_vm1, %v1231_v41, -inf  ;;  %v1008_v36 = vsel %vm559_vm0, %v495_v62, -inf }
  0xd5   : > { %v1701_v14 = vmul.f32 %v4681_v23, %v1597_v16  ;;  %v1860_v51 = vrot.slane %v1696_v42, 7  ;;  %v1600_v54 = vmax.f32 %v1598_v40, %v1599_v43  ;;  %v1862_v55 = vrot.slane %v1697_v9, 6 }
  0xd6   : > { %v1864_v56 = vrot.slane %v1698_v44, 5  ;;  %v1866_v45 = vrot.slane %v1699_v20, 4  ;;  %v1868_v57 = vrot.slane %v1700_v6, 3  ;;  %v1009_v0 = vrot.slane %v1008_v36, 4  ;;  %v504_v44 = vld [vmem:[%s4355_s23 + $0x92] sm:$0x3] }
  0xd7   : > { %v1861_v27 = vsel %vm1784_vm2, %v1860_v51, %v1695_v18  ;;  %v1870_v58 = vrot.slane %v1701_v14, 2  ;;  %v1702_v38 = vmul.f32 %v4681_v23, %v1600_v54  ;;  %v1015_v2 = vsel %vm559_vm0, %v496_v46, -inf  ;;  %v505_v20 = vld [vmem:[%s4355_s23 + $0x94] sm:$0x3] }
  0xd8   : > { %v1863_v1 = vsel %vm1787_vm3, %v1862_v55, %v1861_v27  ;;  %v1022_v5 = vsel %vm559_vm0, %v497_v52, -inf  ;;  %v1010_v7 = vmax.f32 %v1008_v36, %v1009_v0  ;;  %v1016_v8 = vrot.slane %v1015_v2, 4  ;;  %v506_v55 = vld [vmem:[%s4355_s23 + $0x96] sm:$0x3] }
  0xd9   : > { %v1865_v35 = vsel %vm1790_vm4, %v1864_v56, %v1863_v1  ;;  %v1023_v48 = vrot.slane %v1022_v5, 4  ;;  %v1872_v15 = vrot.slane %v1702_v38, 1  ;;  %v1029_v59 = vsel %vm559_vm0, %v498_v29, -inf }
  0xda   : > { %v1867_v3 = vsel %vm1793_vm5, %v1866_v45, %v1865_v35  ;;  %v1036_v49 = vsel %vm559_vm0, %v499_v32, -inf  ;;  %v1011_v17 = vrot.slane %v1010_v7, 2  ;;  %v1017_v50 = vmax.f32 %v1015_v2, %v1016_v8 }
  0xdb   : > { %v1869_v60 = vsel %vm1796_vm6, %v1868_v57, %v1867_v3  ;;  %v1024_v53 = vmax.f32 %v1022_v5, %v1023_v48  ;;  %v1030_v21 = vrot.slane %v1029_v59, 4  ;;  %v1037_v24 = vrot.slane %v1036_v49, 4  ;;  %v507_v57 = vld [vmem:[%s4355_s23 + $0x98] sm:$0x3] }
  0xdc   : > { %v1871_v61 = vsel %vm1799_vm7, %v1870_v58, %v1869_v60  ;;  %v1043_v25 = vsel %vm559_vm0, %v500_v47, -inf  ;;  %v1012_v10 = vmax.f32 %v1010_v7, %v1011_v17  ;;  %v1018_v28 = vrot.slane %v1017_v50, 2  ;;  %v508_v47 = vld [vmem:[%s4355_s23 + $0x9a] sm:$0x3]  ;;  %v509_v17 = vld [vmem:[%s4355_s23 + $0x9c] sm:$0x3] }
  0xdd   : > { %v1873_v26 = vsel %vm1802_vm8, %v1872_v15, %v1871_v61  ;;  %v1025_v63 = vrot.slane %v1024_v53, 2  ;;  %v1031_v19 = vmax.f32 %v1029_v59, %v1030_v21  ;;  %v1038_v4 = vmax.f32 %v1036_v49, %v1037_v24 }
  0xde   : > { %v1925_v30 = vsel %vm1456_vm1, %v1873_v26, 0.0  ;;  %v1044_v31 = vrot.slane %v1043_v25, 4  ;;  %v1013_v33 = vrot.slane %v1012_v10, 1  ;;  %v1019_v34 = vmax.f32 %v1017_v50, %v1018_v28 }
  0xdf   : > { %1926 = vadd.xlane.f32.xlu1 %v1925_v30  ;;  %v1026_v37 = vmax.f32 %v1024_v53, %v1025_v63  ;;  %v1050_v39 = vsel %vm559_vm0, %v501_v22, -inf  ;;  %v1032_v13 = vrot.slane %v1031_v19, 2  ;;  %v1039_v40 = vrot.slane %v1038_v4, 2 }
  0xe0   : > { %v1045_v62 = vmax.f32 %v1043_v25, %v1044_v31  ;;  %v1051_v41 = vrot.slane %v1050_v39, 4  ;;  %v4802_v16 = vmax.f32 %v1012_v10, %v1013_v33  ;;  %v1020_v18 = vrot.slane %v1019_v34, 1 }
  0xe1   : > { %v1027_v42 = vrot.slane %v1026_v37, 1  ;;  %v1057_v9 = vsel %vm559_vm0, %v502_v11, -inf  ;;  %v1033_v6 = vmax.f32 %v1031_v19, %v1032_v13  ;;  %v1040_v46 = vmax.f32 %v1038_v4, %v1039_v40  ;;  %v510_v11 = vld [vmem:[%s4355_s23 + $0x9e] sm:$0x3] }
  0xe2   : > { %v1046_v43 = vrot.slane %v1045_v62, 2  ;;  %v1052_v14 = vmax.f32 %v1050_v39, %v1051_v41  ;;  %v4807_v51 = vmax.f32 %v1019_v34, %v1020_v18  ;;  %v1058_v36 = vrot.slane %v1057_v9, 4 }
  0xe3   : > { %v4809_v52 = vmax.f32 %v1026_v37, %v1027_v42  ;;  %v1064_v54 = vsel %vm559_vm0, %v503_v12, -inf  ;;  %v1034_v56 = vrot.slane %v1033_v6, 1  ;;  %v1041_v45 = vrot.slane %v1040_v46, 1 }
  0xe4   : > { %v1047_v29 = vmax.f32 %v1045_v62, %v1046_v43  ;;  %v1053_v27 = vrot.slane %v1052_v14, 2  ;;  %v1059_v58 = vmax.f32 %v1057_v9, %v1058_v36  ;;  %v1065_v32 = vrot.slane %v1064_v54, 4 }
  0xe5   : > { %v1071_v0 = vsel %vm559_vm0, %v504_v44, -inf  ;;  %v1078_v38 = vsel %vm559_vm0, %v505_v20, -inf  ;;  %v4816_v1 = vmax.f32 %v1033_v6, %v1034_v56  ;;  %v4818_v2 = vmax.f32 %v1040_v46, %v1041_v45 }
  0xe6   : > { %v1048_v5 = vrot.slane %v1047_v29, 1  ;;  %v1054_v35 = vmax.f32 %v1052_v14, %v1053_v27  ;;  %v1060_v7 = vrot.slane %v1059_v58, 2  ;;  %v1066_v8 = vmax.f32 %v1064_v54, %v1065_v32 }
  0xe7   : > { %v1072_v48 = vrot.slane %v1071_v0, 4  ;;  %v1079_v3 = vrot.slane %v1078_v38, 4  ;;  %v1085_v49 = vsel %vm559_vm0, %v506_v55, -inf  ;;  %v1092_v60 = vsel %vm559_vm0, %v507_v57, -inf }
  0xe8   : > { %v4821_v15 = vmax.f32 %v1047_v29, %v1048_v5  ;;  %v1055_v59 = vrot.slane %v1054_v35, 1  ;;  %v1061_v50 = vmax.f32 %v1059_v58, %v1060_v7  ;;  %v1067_v53 = vrot.slane %v1066_v8, 2 }
  0xe9   : > { %v1073_v61 = vmax.f32 %v1071_v0, %v1072_v48  ;;  %v1080_v22 = vmax.f32 %v1078_v38, %v1079_v3  ;;  %v1086_v24 = vrot.slane %v1085_v49, 4  ;;  %v1093_v25 = vrot.slane %v1092_v60, 4 }
  0xea   : > { %v4826_v21 = vmax.f32 %v1054_v35, %v1055_v59  ;;  %v1099_v26 = vsel %vm559_vm0, %v508_v47, -inf  ;;  %v1062_v10 = vrot.slane %v1061_v50, 1  ;;  %v1068_v28 = vmax.f32 %v1066_v8, %v1067_v53 }
  0xeb   : > { %v1074_v63 = vrot.slane %v1073_v61, 2  ;;  %v1081_v30 = vrot.slane %v1080_v22, 2  ;;  %v1087_v19 = vmax.f32 %v1085_v49, %v1086_v24  ;;  %v1094_v4 = vmax.f32 %v1092_v60, %v1093_v25 }
  0xec   : > { %v1100_v31 = vrot.slane %v1099_v26, 4  ;;  %v1106_v33 = vsel %vm559_vm0, %v509_v17, -inf  ;;  %v1063_v34 = vmax.f32 %v1061_v50, %v1062_v10  ;;  %v1069_v37 = vrot.slane %v1068_v28, 1 }
  0xed   : > { %v1075_v39 = vmax.f32 %v1073_v61, %v1074_v63  ;;  %v1082_v12 = vmax.f32 %v1080_v22, %v1081_v30  ;;  %v1088_v13 = vrot.slane %v1087_v19, 2  ;;  %v1095_v40 = vrot.slane %v1094_v4, 2 }
  0xee   : > { %v1101_v62 = vmax.f32 %v1099_v26, %v1100_v31  ;;  %v1107_v41 = vrot.slane %v1106_v33, 4  ;;  %v1070_v18 = vmax.f32 %v1068_v28, %v1069_v37  ;;  %v1113_v44 = vsel %vm559_vm0, %v510_v11, -inf  ;;  %v543_v28 = vld [vmem:[%s4355_s23 + $0xe0] sm:$0x3] }
  0xef   : > { %v1076_v42 = vrot.slane %v1075_v39, 1  ;;  %v1083_v9 = vrot.slane %v1082_v12, 1  ;;  %v1089_v20 = vmax.f32 %v1087_v19, %v1088_v13  ;;  %v1096_v6 = vmax.f32 %v1094_v4, %v1095_v40 }
  0xf0   : > { %v1102_v46 = vrot.slane %v1101_v62, 2  ;;  %v1108_v43 = vmax.f32 %v1106_v33, %v1107_v41  ;;  %v1114_v54 = vrot.slane %v1113_v44, 4  ;;  %v1553_v55 = vsel %vm1456_vm1, %v4802_v16, -inf  ;;  %v545_v41 = vld [vmem:[%s4355_s23 + $0xe4] sm:$0x3] }
  0xf1   : > { %v1077_v14 = vmax.f32 %v1075_v39, %v1076_v42  ;;  %v1084_v36 = vmax.f32 %v1082_v12, %v1083_v9  ;;  %v1090_v56 = vrot.slane %v1089_v20, 1  ;;  %v1097_v45 = vrot.slane %v1096_v6, 1  ;;  %v544_v39 = vld [vmem:[%s4355_s23 + $0xe2] sm:$0x3] }
  0xf2   : > { %v1103_v29 = vmax.f32 %v1101_v62, %v1102_v46  ;;  %v1109_v27 = vrot.slane %v1108_v43, 2  ;;  %v1115_v57 = vmax.f32 %v1113_v44, %v1114_v54  ;;  %v1554_v58 = vsel %vm1456_vm1, %v1070_v18, -inf }
  0xf3   : > { %v1556_v32 = vsel %vm1456_vm1, %v4807_v51, -inf  ;;  %v1557_v0 = vsel %vm1456_vm1, %v1077_v14, -inf  ;;  %v1091_v38 = vmax.f32 %v1089_v20, %v1090_v56  ;;  %v1098_v5 = vmax.f32 %v1096_v6, %v1097_v45  ;;  %v546_v20 = vld [vmem:[%s4355_s23 + $0xe6] sm:$0x3] }
  0xf4   : > { %v1104_v35 = vrot.slane %v1103_v29, 1  ;;  %v1110_v47 = vmax.f32 %v1108_v43, %v1109_v27  ;;  %v1116_v7 = vrot.slane %v1115_v57, 2  ;;  %v1555_v8 = vmax.f32 %v1553_v55, %v1554_v58  ;;  %v547_v55 = vld [vmem:[%s4355_s23 + $0xe8] sm:$0x3] }
  0xf5   : > { %v1558_v48 = vmax.f32 %v1556_v32, %v1557_v0  ;;  %v1559_v16 = vsel %vm1456_vm1, %v4809_v52, -inf  ;;  %v1560_v49 = vsel %vm1456_vm1, %v1084_v36, -inf  ;;  %v1562_v51 = vsel %vm1456_vm1, %v4816_v1, -inf }
  0xf6   : > { %v1105_v3 = vmax.f32 %v1103_v29, %v1104_v35  ;;  %v1111_v59 = vrot.slane %v1110_v47, 1  ;;  %v1117_v60 = vmax.f32 %v1115_v57, %v1116_v7  ;;  %v1561_v17 = vmax.f32 %v1559_v16, %v1560_v49  ;;  %v549_v16 = vld [vmem:[%s4355_s23 + $0xec] sm:$0x3] }
  0xf7   : > { %v1563_v50 = vsel %vm1456_vm1, %v1091_v38, -inf  ;;  %v1565_v53 = vsel %vm1456_vm1, %v4818_v2, -inf  ;;  %v1566_v24 = vsel %vm1456_vm1, %v1098_v5, -inf  ;;  %v1568_v52 = vsel %vm1456_vm1, %v4821_v15, -inf  ;;  %v548_v38 = vld [vmem:[%s4355_s23 + $0xea] sm:$0x3] }
  0xf8   : > { %v1112_v61 = vmax.f32 %v1110_v47, %v1111_v59  ;;  %v1564_v22 = vmax.f32 %v1562_v51, %v1563_v50  ;;  %v1118_v25 = vrot.slane %v1117_v60, 1  ;;  %v1567_v26 = vmax.f32 %v1565_v53, %v1566_v24 }
  0xf9   : > { %v1569_v10 = vsel %vm1456_vm1, %v1105_v3, -inf  ;;  %v1571_v1 = vsel %vm1456_vm1, %v4826_v21, -inf  ;;  %v1574_v2 = vsel %vm1456_vm1, %v1063_v34, -inf  ;;  %v1687_v11 = vmul.f32 %v4681_v23, %v1555_v8 }
  0xfa   : > { %v1570_v63 = vmax.f32 %v1568_v52, %v1569_v10  ;;  %v1572_v30 = vsel %vm1456_vm1, %v1112_v61, -inf  ;;  %v1119_v19 = vmax.f32 %v1117_v60, %v1118_v25  ;;  %v1688_v15 = vmul.f32 %v4681_v23, %v1558_v48  ;;  %v550_v61 = vld [vmem:[%s4355_s23 + $0xee] sm:$0x3] }
  0xfb   : > { %v1573_v4 = vmax.f32 %v1571_v1, %v1572_v30  ;;  %v1689_v31 = vmul.f32 %v4681_v23, %v1561_v17  ;;  %v1690_v33 = vmul.f32 %v4681_v23, %v1564_v22  ;;  %v1691_v21 = vmul.f32 %v4681_v23, %v1567_v26 }
  0xfc   : > { %v1692_v37 = vmul.f32 %v4681_v23, %v1570_v63  ;;  %v1344_v12 = vsel %vm559_vm0, %v543_v28, -inf  ;;  %v1575_v34 = vsel %vm1456_vm1, %v1119_v19, -inf  ;;  %v1846_v40 = vrot.slane %v1688_v15, 7  ;;  %v551_v28 = vld [vmem:[%s4355_s23 + $0xf0] sm:$0x3] }
  0xfd   : > { %v1693_v13 = vmul.f32 %v4681_v23, %v1573_v4  ;;  %v1848_v62 = vrot.slane %v1689_v31, 6  ;;  %v1576_v18 = vmax.f32 %v1574_v2, %v1575_v34  ;;  %v1850_v42 = vrot.slane %v1690_v33, 5  ;;  %v552_v33 = vld [vmem:[%s4355_s23 + $0xf2] sm:$0x3] }
  0xfe   : > { %v1852_v9 = vrot.slane %v1691_v21, 4  ;;  %v1854_v44 = vrot.slane %v1692_v37, 3  ;;  %v1847_v6 = vsel %vm1784_vm2, %v1846_v40, %v1687_v11  ;;  %v1345_v43 = vrot.slane %v1344_v12, 4  ;;  %v553_v21 = vld [vmem:[%s4355_s23 + $0xf4] sm:$0x3] }
  0xff   : > { %v1856_v46 = vrot.slane %v1693_v13, 2  ;;  %v1351_v14 = vsel %vm559_vm0, %v544_v39, -inf  ;;  %v1694_v36 = vmul.f32 %v4681_v23, %v1576_v18  ;;  %v1849_v54 = vsel %vm1787_vm3, %v1848_v62, %v1847_v6  ;;  %v554_v18 = vld [vmem:[%s4355_s23 + $0xf6] sm:$0x3] }
 0x100   : > { %v1352_v56 = vrot.slane %v1351_v14, 4  ;;  %v1358_v45 = vsel %vm559_vm0, %v545_v41, -inf  ;;  %v1851_v29 = vsel %vm1790_vm4, %v1850_v42, %v1849_v54  ;;  %v1346_v27 = vmax.f32 %v1344_v12, %v1345_v43 }
 0x101   : > { %v1359_v57 = vrot.slane %v1358_v45, 4  ;;  %v1365_v58 = vsel %vm559_vm0, %v546_v20, -inf  ;;  %v1853_v32 = vsel %vm1793_vm5, %v1852_v9, %v1851_v29  ;;  %v1858_v0 = vrot.slane %v1694_v36, 1  ;;  %v555_v36 = vld [vmem:[%s4355_s23 + $0xf8] sm:$0x3] }
 0x102   : > { %v1353_v5 = vmax.f32 %v1351_v14, %v1352_v56  ;;  %v1366_v23 = vrot.slane %v1365_v58, 4  ;;  %v1855_v35 = vsel %vm1796_vm6, %v1854_v44, %v1853_v32  ;;  %v1347_v47 = vrot.slane %v1346_v27, 2  ;;  %v556_v32 = vld [vmem:[%s4355_s23 + $0xfa] sm:$0x3] }
 0x103   : > { %v1360_v7 = vmax.f32 %v1358_v45, %v1359_v57  ;;  %v1372_v8 = vsel %vm559_vm0, %v547_v55, -inf  ;;  %v1857_v48 = vsel %vm1799_vm7, %v1856_v46, %v1855_v35  ;;  %v1379_v50 = vsel %vm559_vm0, %v548_v38, -inf }
 0x104   : > { %v1354_v3 = vrot.slane %v1353_v5, 2  ;;  %v1367_v59 = vmax.f32 %v1365_v58, %v1366_v23  ;;  %v1373_v49 = vrot.slane %v1372_v8, 4  ;;  %v1859_v51 = vsel %vm1802_vm8, %v1858_v0, %v1857_v48  ;;  %v557_v48 = vld [vmem:[%s4355_s23 + $0xfc] sm:$0x3] }
 0x105   : > { %v1348_v60 = vmax.f32 %v1346_v27, %v1347_v47  ;;  %v1361_v17 = vrot.slane %v1360_v7, 2  ;;  %v1922_v53 = vsel %vm1456_vm1, %v1859_v51, 0.0  ;;  %v1380_v10 = vrot.slane %v1379_v50, 4 }
 0x106   : > { %v1355_v22 = vmax.f32 %v1353_v5, %v1354_v3  ;;  %v1368_v24 = vrot.slane %v1367_v59, 2  ;;  %v1374_v52 = vmax.f32 %v1372_v8, %v1373_v49  ;;  %1923 = vadd.xlane.f32.xlu0 %v1922_v53  ;;  %v1386_v1 = vsel %vm559_vm0, %v549_v16, -inf  ;;  %v558_v53 = vld [vmem:[%s4355_s23 + $0xfe] sm:$0x3] }
 0x107   : > { %v1349_v25 = vrot.slane %v1348_v60, 1  ;;  %v1362_v26 = vmax.f32 %v1360_v7, %v1361_v17  ;;  %v1387_v11 = vrot.slane %v1386_v1, 4  ;;  %v1381_v15 = vmax.f32 %v1379_v50, %v1380_v10 }
 0x108   : > { %v1356_v63 = vrot.slane %v1355_v22, 1  ;;  %v1369_v30 = vmax.f32 %v1367_v59, %v1368_v24  ;;  %v1375_v2 = vrot.slane %v1374_v52, 2  ;;  %v1393_v31 = vsel %vm559_vm0, %v550_v61, -inf }
 0x109   : > { %v4887_v19 = vmax.f32 %v1348_v60, %v1349_v25  ;;  %v1363_v4 = vrot.slane %v1362_v26, 1  ;;  %v1388_v34 = vmax.f32 %v1386_v1, %v1387_v11  ;;  %v1382_v40 = vrot.slane %v1381_v15, 2 }
 0x10a   : > { %v4892_v37 = vmax.f32 %v1355_v22, %v1356_v63  ;;  %v1370_v39 = vrot.slane %v1369_v30, 1  ;;  %v1376_v12 = vmax.f32 %v1374_v52, %v1375_v2  ;;  %v1394_v62 = vrot.slane %v1393_v31, 4 }
 0x10b   : > { %v4894_v13 = vmax.f32 %v1362_v26, %v1363_v4  ;;  %v1400_v41 = vsel %vm559_vm0, %v551_v28, -inf  ;;  %v1389_v44 = vrot.slane %v1388_v34, 2  ;;  %v1383_v6 = vmax.f32 %v1381_v15, %v1382_v40 }
 0x10c   : > { %v4898_v42 = vmax.f32 %v1369_v30, %v1370_v39  ;;  %v1377_v9 = vrot.slane %v1376_v12, 1  ;;  %v1401_v20 = vrot.slane %v1400_v41, 4  ;;  %v1395_v46 = vmax.f32 %v1393_v31, %v1394_v62 }
 0x10d   : > { %v1407_v43 = vsel %vm559_vm0, %v552_v33, -inf  ;;  %v1414_v14 = vsel %vm559_vm0, %v553_v21, -inf  ;;  %v1390_v55 = vmax.f32 %v1388_v34, %v1389_v44  ;;  %v1384_v29 = vrot.slane %v1383_v6, 1 }
 0x10e   : > { %v4903_v54 = vmax.f32 %v1376_v12, %v1377_v9  ;;  %v1402_v56 = vmax.f32 %v1400_v41, %v1401_v20  ;;  %v1408_v45 = vrot.slane %v1407_v43, 4  ;;  %v1396_v27 = vrot.slane %v1395_v46, 2 }
 0x10f   : > { %v1415_v57 = vrot.slane %v1414_v14, 4  ;;  %v1421_v58 = vsel %vm559_vm0, %v554_v18, -inf  ;;  %v1391_v0 = vrot.slane %v1390_v55, 1  ;;  %v4907_v35 = vmax.f32 %v1383_v6, %v1384_v29 }
 0x110   : > { %v1403_v38 = vrot.slane %v1402_v56, 2  ;;  %v1409_v5 = vmax.f32 %v1407_v43, %v1408_v45  ;;  %v1422_v23 = vrot.slane %v1421_v58, 4  ;;  %v1397_v47 = vmax.f32 %v1395_v46, %v1396_v27 }
 0x111   : > { %v1416_v7 = vmax.f32 %v1414_v14, %v1415_v57  ;;  %v1428_v8 = vsel %vm559_vm0, %v555_v36, -inf  ;;  %v4911_v16 = vmax.f32 %v1390_v55, %v1391_v0  ;;  %v1435_v50 = vsel %vm559_vm0, %v556_v32, -inf }
 0x112   : > { %v1404_v3 = vmax.f32 %v1402_v56, %v1403_v38  ;;  %v1410_v59 = vrot.slane %v1409_v5, 2  ;;  %v1423_v49 = vmax.f32 %v1421_v58, %v1422_v23  ;;  %v1398_v51 = vrot.slane %v1397_v47, 1 }
 0x113   : > { %v1417_v60 = vrot.slane %v1416_v7, 2  ;;  %v1429_v17 = vrot.slane %v1428_v8, 4  ;;  %v1436_v52 = vrot.slane %v1435_v50, 4  ;;  %v1442_v1 = vsel %vm559_vm0, %v557_v48, -inf }
 0x114   : > { %v1405_v61 = vrot.slane %v1404_v3, 1  ;;  %v1411_v22 = vmax.f32 %v1409_v5, %v1410_v59  ;;  %v1424_v24 = vrot.slane %v1423_v49, 2  ;;  %v1399_v25 = vmax.f32 %v1397_v47, %v1398_v51 }
 0x115   : > { %v1418_v26 = vmax.f32 %v1416_v7, %v1417_v60  ;;  %v1430_v10 = vmax.f32 %v1428_v8, %v1429_v17  ;;  %v1437_v2 = vmax.f32 %v1435_v50, %v1436_v52  ;;  %v1443_v15 = vrot.slane %v1442_v1, 4  ;;  %v4941_v60 = vld [vmem:[%s5825_s3] ss:$0 sm:$0xff] }
 0x116   : > { %v1406_v28 = vmax.f32 %v1404_v3, %v1405_v61  ;;  %v1412_v63 = vrot.slane %v1411_v22, 1  ;;  %v1425_v30 = vmax.f32 %v1423_v49, %v1424_v24  ;;  %v1449_v31 = vsel %vm559_vm0, %v558_v53, -inf }
 0x117   : > { %v1419_v11 = vrot.slane %v1418_v26, 1  ;;  %v1431_v4 = vrot.slane %v1430_v10, 2  ;;  %v1438_v39 = vrot.slane %v1437_v2, 2  ;;  %v1450_v12 = vrot.slane %v1449_v31, 4 }
 0x118   : > { %v1413_v33 = vmax.f32 %v1411_v22, %v1412_v63  ;;  %v1426_v21 = vrot.slane %v1425_v30, 1  ;;  %v1444_v62 = vmax.f32 %v1442_v1, %v1443_v15  ;;  %v1625_v41 = vsel %vm1456_vm1, %v4887_v19, -inf  ;;  %v527_v22 = vld [vmem:[%s4355_s23 + $0xc0] sm:$0x3] }
 0x119   : > { %v1420_v34 = vmax.f32 %v1418_v26, %v1419_v11  ;;  %v1432_v40 = vmax.f32 %v1430_v10, %v1431_v4  ;;  %v1439_v9 = vmax.f32 %v1437_v2, %v1438_v39  ;;  %v1451_v44 = vmax.f32 %v1449_v31, %v1450_v12  ;;  %v528_v10 = vld [vmem:[%s4355_s23 + $0xc2] sm:$0x3]  ;;  %v529_v2 = vld [vmem:[%s4355_s23 + $0xc4] sm:$0x3]  ;;  %v530_v39 = vld [vmem:[%s4355_s23 + $0xc6] sm:$0x3] }
 0x11a   : > { %v1427_v18 = vmax.f32 %v1425_v30, %v1426_v21  ;;  %v1626_v20 = vsel %vm1456_vm1, %v1406_v28, -inf  ;;  %v1445_v46 = vrot.slane %v1444_v62, 2  ;;  %v1628_v14 = vsel %vm1456_vm1, %v4892_v37, -inf  ;;  %v531_v12 = vld [vmem:[%s4355_s23 + $0xc8] sm:$0x3] }
 0x11b   : > { %v1433_v6 = vrot.slane %v1432_v40, 1  ;;  %v1627_v43 = vmax.f32 %v1625_v41, %v1626_v20  ;;  %v1440_v36 = vrot.slane %v1439_v9, 1  ;;  %v1452_v55 = vrot.slane %v1451_v44, 2 }
 0x11c   : > { %v1629_v56 = vsel %vm1456_vm1, %v1413_v33, -inf  ;;  %v1631_v45 = vsel %vm1456_vm1, %v4894_v13, -inf  ;;  %v1446_v19 = vmax.f32 %v1444_v62, %v1445_v46  ;;  %v1632_v57 = vsel %vm1456_vm1, %v1420_v34, -inf }
 0x11d   : > { %v1434_v29 = vmax.f32 %v1432_v40, %v1433_v6  ;;  %v1630_v27 = vmax.f32 %v1628_v14, %v1629_v56  ;;  %v1441_v58 = vmax.f32 %v1439_v9, %v1440_v36  ;;  %v1453_v32 = vmax.f32 %v1451_v44, %v1452_v55  ;;  %v532_v6 = vld [vmem:[%s4355_s23 + $0xca] sm:$0x3] }
 0x11e   : > { %v1633_v0 = vmax.f32 %v1631_v45, %v1632_v57  ;;  %v1634_v38 = vsel %vm1456_vm1, %v4898_v42, -inf  ;;  %v1447_v5 = vrot.slane %v1446_v19, 1  ;;  %v1635_v37 = vsel %vm1456_vm1, %v1427_v18, -inf }
 0x11f   : > { %v1637_v23 = vsel %vm1456_vm1, %v4903_v54, -inf  ;;  %v1638_v47 = vsel %vm1456_vm1, %v1434_v29, -inf  ;;  %v1454_v13 = vrot.slane %v1453_v32, 1  ;;  %v1636_v7 = vmax.f32 %v1634_v38, %v1635_v37  ;;  %v533_v29 = vld [vmem:[%s4355_s23 + $0xcc] sm:$0x3] }
 0x120   : > { %v1639_v8 = vmax.f32 %v1637_v23, %v1638_v47  ;;  %v1640_v48 = vsel %vm1456_vm1, %v4907_v35, -inf  ;;  %v1448_v3 = vmax.f32 %v1446_v19, %v1447_v5  ;;  %v1641_v59 = vsel %vm1456_vm1, %v1441_v58, -inf  ;;  %v534_v37 = vld [vmem:[%s4355_s23 + $0xce] sm:$0x3] }
 0x121   : > { %v1643_v42 = vsel %vm1456_vm1, %v4911_v16, -inf  ;;  %v1646_v49 = vsel %vm1456_vm1, %v1399_v25, -inf  ;;  %v1455_v51 = vmax.f32 %v1453_v32, %v1454_v13  ;;  %v1642_v54 = vmax.f32 %v1640_v48, %v1641_v59 }
 0x122   : > { %v1711_v17 = vmul.f32 %v4941_v60, %v1627_v43  ;;  %v1712_v35 = vmul.f32 %v4941_v60, %v1630_v27  ;;  %v1644_v50 = vsel %vm1456_vm1, %v1448_v3, -inf  ;;  %v1713_v53 = vmul.f32 %v4941_v60, %v1633_v0 }
 0x123   : > { %v1714_v16 = vmul.f32 %v4941_v60, %v1636_v7  ;;  %v1715_v61 = vmul.f32 %v4941_v60, %v1639_v8  ;;  %v1645_v24 = vmax.f32 %v1643_v42, %v1644_v50  ;;  %v1647_v52 = vsel %vm1456_vm1, %v1455_v51, -inf }
 0x124   : > { %v1716_v25 = vmul.f32 %v4941_v60, %v1642_v54  ;;  %v1888_v26 = vrot.slane %v1712_v35, 7  ;;  %v1648_v1 = vmax.f32 %v1646_v49, %v1647_v52  ;;  %v1890_v28 = vrot.slane %v1713_v53, 6  ;;  %v535_v54 = vld [vmem:[%s4355_s23 + $0xd0] sm:$0x3]  ;;  %v536_v52 = vld [vmem:[%s4355_s23 + $0xd2] sm:$0x3] }
 0x125   : > { %v1892_v63 = vrot.slane %v1714_v16, 5  ;;  %v1894_v30 = vrot.slane %v1715_v61, 4  ;;  %v1717_v11 = vmul.f32 %v4941_v60, %v1645_v24  ;;  %v1232_v31 = vsel %vm559_vm0, %v527_v22, -inf }
 0x126   : > { %v1889_v4 = vsel %vm1784_vm2, %v1888_v26, %v1711_v17  ;;  %v1896_v15 = vrot.slane %v1716_v25, 3  ;;  %v1718_v33 = vmul.f32 %v4941_v60, %v1648_v1  ;;  %v1233_v34 = vrot.slane %v1232_v31, 4  ;;  %v537_v25 = vld [vmem:[%s4355_s23 + $0xd4] sm:$0x3] }
 0x127   : > { %v1891_v21 = vsel %vm1787_vm3, %v1890_v28, %v1889_v4  ;;  %v1239_v40 = vsel %vm559_vm0, %v528_v10, -inf  ;;  %v1898_v41 = vrot.slane %v1717_v11, 2  ;;  %v1246_v9 = vsel %vm559_vm0, %v529_v2, -inf  ;;  %v538_v4 = vld [vmem:[%s4355_s23 + $0xd6] sm:$0x3] }
 0x128   : > { %v1893_v62 = vsel %vm1790_vm4, %v1892_v63, %v1891_v21  ;;  %v1240_v18 = vrot.slane %v1239_v40, 4  ;;  %v1900_v20 = vrot.slane %v1718_v33, 1  ;;  %v1234_v46 = vmax.f32 %v1232_v31, %v1233_v34 }
 0x129   : > { %v1895_v44 = vsel %vm1793_vm5, %v1894_v30, %v1893_v62  ;;  %v1247_v43 = vrot.slane %v1246_v9, 4  ;;  %v1253_v55 = vsel %vm559_vm0, %v530_v39, -inf  ;;  %v1260_v56 = vsel %vm559_vm0, %v531_v12, -inf  ;;  %v539_v62 = vld [vmem:[%s4355_s23 + $0xd8] sm:$0x3] }
 0x12a   : > { %v1897_v14 = vsel %vm1796_vm6, %v1896_v15, %v1895_v44  ;;  %v1241_v36 = vmax.f32 %v1239_v40, %v1240_v18  ;;  %v1235_v19 = vrot.slane %v1234_v46, 2  ;;  %v1254_v57 = vrot.slane %v1253_v55, 4 }
 0x12b   : > { %v1899_v45 = vsel %vm1799_vm7, %v1898_v41, %v1897_v14  ;;  %v1248_v27 = vmax.f32 %v1246_v9, %v1247_v43  ;;  %v1261_v0 = vrot.slane %v1260_v56, 4  ;;  %v1267_v38 = vsel %vm559_vm0, %v532_v6, -inf  ;;  %v540_v14 = vld [vmem:[%s4355_s23 + $0xda] sm:$0x3] }
 0x12c   : > { %v1901_v58 = vsel %vm1802_vm8, %v1900_v20, %v1899_v45  ;;  %v1242_v32 = vrot.slane %v1241_v36, 2  ;;  %v1236_v23 = vmax.f32 %v1234_v46, %v1235_v19  ;;  %v1255_v13 = vmax.f32 %v1253_v55, %v1254_v57 }
 0x12d   : > { %v1931_v5 = vsel %vm1456_vm1, %v1901_v58, 0.0  ;;  %v1249_v47 = vrot.slane %v1248_v27, 2  ;;  %v1262_v8 = vmax.f32 %v1260_v56, %v1261_v0  ;;  %v1268_v48 = vrot.slane %v1267_v38, 4 }
 0x12e   : > { %1932 = vadd.xlane.f32.xlu1 %v1931_v5  ;;  %v1243_v7 = vmax.f32 %v1241_v36, %v1242_v32  ;;  %v1274_v3 = vsel %vm559_vm0, %v533_v29, -inf  ;;  %v1237_v59 = vrot.slane %v1236_v23, 1  ;;  %v1256_v49 = vrot.slane %v1255_v13, 2  ;;  %v541_v36 = vld [vmem:[%s4355_s23 + $0xdc] sm:$0x3] }
 0x12f   : > { %v1250_v42 = vmax.f32 %v1248_v27, %v1249_v47  ;;  %v1275_v51 = vrot.slane %v1274_v3, 4  ;;  %v1263_v35 = vrot.slane %v1262_v8, 2  ;;  %v1269_v50 = vmax.f32 %v1267_v38, %v1268_v48 }
 0x130   : > { %v1244_v17 = vrot.slane %v1243_v7, 1  ;;  %v1281_v53 = vsel %vm559_vm0, %v534_v37, -inf  ;;  %v4978_v16 = vmax.f32 %v1236_v23, %v1237_v59  ;;  %v1257_v22 = vmax.f32 %v1255_v13, %v1256_v49  ;;  %v542_v37 = vld [vmem:[%s4355_s23 + $0xde] sm:$0x3] }
 0x131   : > { %v1251_v61 = vrot.slane %v1250_v42, 1  ;;  %v1276_v24 = vmax.f32 %v1274_v3, %v1275_v51  ;;  %v1264_v10 = vmax.f32 %v1262_v8, %v1263_v35  ;;  %v1270_v1 = vrot.slane %v1269_v50, 2 }
 0x132   : > { %v4982_v26 = vmax.f32 %v1243_v7, %v1244_v17  ;;  %v1282_v28 = vrot.slane %v1281_v53, 4  ;;  %v1258_v30 = vrot.slane %v1257_v22, 1  ;;  %v1288_v11 = vsel %vm559_vm0, %v535_v54, -inf }
 0x133   : > { %v4984_v63 = vmax.f32 %v1250_v42, %v1251_v61  ;;  %v1277_v2 = vrot.slane %v1276_v24, 2  ;;  %v1265_v15 = vrot.slane %v1264_v10, 1  ;;  %v1271_v31 = vmax.f32 %v1269_v50, %v1270_v1 }
 0x134   : > { %v1283_v33 = vmax.f32 %v1281_v53, %v1282_v28  ;;  %v1289_v21 = vrot.slane %v1288_v11, 4  ;;  %v4988_v39 = vmax.f32 %v1257_v22, %v1258_v30  ;;  %v1295_v34 = vsel %vm559_vm0, %v536_v52, -inf }
 0x135   : > { %v1278_v12 = vmax.f32 %v1276_v24, %v1277_v2  ;;  %v1302_v40 = vsel %vm559_vm0, %v537_v25, -inf  ;;  %v4993_v41 = vmax.f32 %v1264_v10, %v1265_v15  ;;  %v1272_v18 = vrot.slane %v1271_v31, 1 }
 0x136   : > { %v1284_v9 = vrot.slane %v1283_v33, 2  ;;  %v1290_v44 = vmax.f32 %v1288_v11, %v1289_v21  ;;  %v1296_v6 = vrot.slane %v1295_v34, 4  ;;  %v1303_v46 = vrot.slane %v1302_v40, 4 }
 0x137   : > { %v1279_v20 = vrot.slane %v1278_v12, 1  ;;  %v1309_v43 = vsel %vm559_vm0, %v538_v4, -inf  ;;  %v4998_v55 = vmax.f32 %v1271_v31, %v1272_v18  ;;  %v1316_v58 = vsel %vm559_vm0, %v539_v62, -inf }
 0x138   : > { %v1285_v56 = vmax.f32 %v1283_v33, %v1284_v9  ;;  %v1291_v45 = vrot.slane %v1290_v44, 2  ;;  %v1310_v29 = vrot.slane %v1309_v43, 4  ;;  %v1297_v27 = vmax.f32 %v1295_v34, %v1296_v6 }
 0x139   : > { %v5000_v19 = vmax.f32 %v1278_v12, %v1279_v20  ;;  %v1304_v57 = vmax.f32 %v1302_v40, %v1303_v46  ;;  %v1317_v5 = vrot.slane %v1316_v58, 4  ;;  %v1323_v13 = vsel %vm559_vm0, %v540_v14, -inf }
 0x13a   : > { %v1286_v32 = vrot.slane %v1285_v56, 1  ;;  %v1292_v0 = vmax.f32 %v1290_v44, %v1291_v45  ;;  %v1311_v38 = vmax.f32 %v1309_v43, %v1310_v29  ;;  %v1298_v23 = vrot.slane %v1297_v27, 2 }
 0x13b   : > { %v1305_v47 = vrot.slane %v1304_v57, 2  ;;  %v1330_v7 = vsel %vm559_vm0, %v541_v36, -inf  ;;  %v1318_v59 = vmax.f32 %v1316_v58, %v1317_v5  ;;  %v1324_v51 = vrot.slane %v1323_v13, 4 }
 0x13c   : > { %v1287_v8 = vmax.f32 %v1285_v56, %v1286_v32  ;;  %v1293_v48 = vrot.slane %v1292_v0, 1  ;;  %v1312_v3 = vrot.slane %v1311_v38, 2  ;;  %v1299_v42 = vmax.f32 %v1297_v27, %v1298_v23 }
 0x13d   : > { %v1306_v49 = vmax.f32 %v1304_v57, %v1305_v47  ;;  %v1331_v54 = vrot.slane %v1330_v7, 4  ;;  %v1319_v50 = vrot.slane %v1318_v59, 2  ;;  %v1337_v53 = vsel %vm559_vm0, %v542_v37, -inf }
 0x13e   : > { %v1294_v17 = vmax.f32 %v1292_v0, %v1293_v48  ;;  %v1313_v35 = vmax.f32 %v1311_v38, %v1312_v3  ;;  %v1300_v61 = vrot.slane %v1299_v42, 1  ;;  %v1325_v24 = vmax.f32 %v1323_v13, %v1324_v51  ;;  %v2160_v48 = vld [vmem:[%s5033_s14] sm:$0x7]  ;;  %v2162_v51 = vld [vmem:[%s5033_s14 + $0x8] sm:$0x7] }
 0x13f   : > { %v1307_v22 = vrot.slane %v1306_v49, 1  ;;  %v1332_v52 = vmax.f32 %v1330_v7, %v1331_v54  ;;  %v1320_v10 = vmax.f32 %v1318_v59, %v1319_v50  ;;  %v1338_v1 = vrot.slane %v1337_v53, 4 }
 0x140   : > { %v1314_v25 = vrot.slane %v1313_v35, 1  ;;  %v1601_v28 = vsel %vm1456_vm1, %v4978_v16, -inf  ;;  %v1301_v30 = vmax.f32 %v1299_v42, %v1300_v61  ;;  %v1326_v11 = vrot.slane %v1325_v24, 2 }
 0x141   : > { %v1308_v2 = vmax.f32 %v1306_v49, %v1307_v22  ;;  %v1333_v4 = vrot.slane %v1332_v52, 2  ;;  %v1321_v31 = vrot.slane %v1320_v10, 1  ;;  %v1339_v33 = vmax.f32 %v1337_v53, %v1338_v1  ;;  %v2161_v49 = vld [vmem:[%s5033_s14 + $0x4] sm:$0x7]  ;;  %v2163_v53 = vld [vmem:[%s5033_s14 + $0xc] sm:$0x7] }
 0x142   : > { %v1315_v15 = vmax.f32 %v1313_v35, %v1314_v25  ;;  %v1602_v21 = vsel %vm1456_vm1, %v1294_v17, -inf  ;;  %v1327_v12 = vmax.f32 %v1325_v24, %v1326_v11  ;;  %v1604_v62 = vsel %vm1456_vm1, %v4982_v26, -inf  ;;  %v2164_v1 = vld [vmem:[%s5033_s14 + $0x10] sm:$0x7] }
 0x143   : > { %v1334_v34 = vmax.f32 %v1332_v52, %v1333_v4  ;;  %v1603_v40 = vmax.f32 %v1601_v28, %v1602_v21  ;;  %v1322_v18 = vmax.f32 %v1320_v10, %v1321_v31  ;;  %v1340_v9 = vrot.slane %v1339_v33, 2  ;;  %v2165_v21 = vld [vmem:[%s5033_s14 + $0x14] sm:$0x7] }
 0x144   : > { %v1605_v16 = vsel %vm1456_vm1, %v1301_v30, -inf  ;;  %v1607_v44 = vsel %vm1456_vm1, %v4984_v63, -inf  ;;  %v1328_v20 = vrot.slane %v1327_v12, 1  ;;  %v1608_v43 = vsel %vm1456_vm1, %v1308_v2, -inf }
 0x145   : > { %v1335_v6 = vrot.slane %v1334_v34, 1  ;;  %v1606_v46 = vmax.f32 %v1604_v62, %v1605_v16  ;;  %v1341_v14 = vmax.f32 %v1339_v33, %v1340_v9  ;;  %v1609_v36 = vmax.f32 %v1607_v44, %v1608_v43  ;;  %v2166_v43 = vld [vmem:[%s5033_s14 + $0x18] sm:$0x7] }
 0x146   : > { %v1610_v56 = vsel %vm1456_vm1, %v4988_v39, -inf  ;;  %v1611_v26 = vsel %vm1456_vm1, %v1315_v15, -inf  ;;  %v1329_v45 = vmax.f32 %v1327_v12, %v1328_v20  ;;  %v1613_v57 = vsel %vm1456_vm1, %v4993_v41, -inf }
 0x147   : > { %v1336_v29 = vmax.f32 %v1334_v34, %v1335_v6  ;;  %v1612_v27 = vmax.f32 %v1610_v56, %v1611_v26  ;;  %v1342_v63 = vrot.slane %v1341_v14, 1  ;;  %v1614_v58 = vsel %vm1456_vm1, %v1322_v18, -inf }
 0x148   : > { %v1616_v32 = vsel %vm1456_vm1, %v4998_v55, -inf  ;;  %v1619_v0 = vsel %vm1456_vm1, %v5000_v19, -inf  ;;  %v1615_v38 = vmax.f32 %v1613_v57, %v1614_v58  ;;  %v1617_v39 = vsel %vm1456_vm1, %v1329_v45, -inf }
 0x149   : > { %v1620_v5 = vsel %vm1456_vm1, %v1336_v29, -inf  ;;  %v1622_v37 = vsel %vm1456_vm1, %v1287_v8, -inf  ;;  %v1343_v41 = vmax.f32 %v1341_v14, %v1342_v63  ;;  %v1618_v55 = vmax.f32 %v1616_v32, %v1617_v39  ;;  %v2167_v63 = vld [vmem:[%s5033_s14 + $0x1c] sm:$0x7] }
 0x14a   : > { %v1621_v23 = vmax.f32 %v1619_v0, %v1620_v5  ;;  %v1703_v19 = vmul.f32 %v4941_v60, %v1603_v40  ;;  %v1704_v47 = vmul.f32 %v4941_v60, %v1606_v46  ;;  %v1705_v13 = vmul.f32 %v4941_v60, %v1609_v36 }
 0x14b   : > { %v1706_v7 = vmul.f32 %v4941_v60, %v1612_v27  ;;  %v1707_v8 = vmul.f32 %v4941_v60, %v1615_v38  ;;  %v1623_v3 = vsel %vm1456_vm1, %v1343_v41, -inf  ;;  %v1708_v59 = vmul.f32 %v4941_v60, %v1618_v55  ;;  %v2168_v41 = vld [vmem:[%s5033_s14 + $0x20] sm:$0x7] }
 0x14c   : > { %v1709_v42 = vmul.f32 %v4941_v60, %v1621_v23  ;;  %v1624_v54 = vmax.f32 %v1622_v37, %v1623_v3  ;;  %v1874_v17 = vrot.slane %v1704_v47, 7  ;;  %v1876_v35 = vrot.slane %v1705_v13, 6  ;;  %v2169_v3 = vld [vmem:[%s5033_s14 + $0x24] sm:$0x7] }
 0x14d   : > { %v1878_v50 = vrot.slane %v1706_v7, 5  ;;  %v1880_v61 = vrot.slane %v1707_v8, 4  ;;  %v1882_v22 = vrot.slane %v1708_v59, 3  ;;  %v2236_v52 = vsel %vm2235_vm9, %v2160_v48, -inf  ;;  %v2170_v59 = vld [vmem:[%s5033_s14 + $0x28] sm:$0x7] }
 0x14e   : > { %v1884_v24 = vrot.slane %v1709_v42, 2  ;;  %v1710_v25 = vmul.f32 %v4941_v60, %v1624_v54  ;;  %v1875_v10 = vsel %vm1784_vm2, %v1874_v17, %v1703_v19  ;;  %v2237_v28 = vrot.slane %v2236_v52, 4 }
 0x14f   : > { %v2243_v30 = vsel %vm2235_vm9, %v2161_v49, -inf  ;;  %v1877_v2 = vsel %vm1787_vm3, %v1876_v35, %v1875_v10  ;;  %v2250_v4 = vsel %vm2235_vm9, %v2162_v51, -inf  ;;  %v2257_v15 = vsel %vm2235_vm9, %v2163_v53, -inf }
 0x150   : > { %v2244_v11 = vrot.slane %v2243_v30, 4  ;;  %v1879_v31 = vsel %vm1790_vm4, %v1878_v50, %v1877_v2  ;;  %v1886_v33 = vrot.slane %v1710_v25, 1  ;;  %v2238_v12 = vmax.f32 %v2236_v52, %v2237_v28 }
 0x151   : > { %v2251_v34 = vrot.slane %v2250_v4, 4  ;;  %v1881_v40 = vsel %vm1793_vm5, %v1880_v61, %v1879_v31  ;;  %v2258_v18 = vrot.slane %v2257_v15, 4  ;;  %v2264_v9 = vsel %vm2235_vm9, %v2164_v1, -inf  ;;  %v2171_v61 = vld [vmem:[%s5033_s14 + $0x2c] sm:$0x7] }
 0x152   : > { %v2245_v62 = vmax.f32 %v2243_v30, %v2244_v11  ;;  %v1883_v16 = vsel %vm1796_vm6, %v1882_v22, %v1881_v40  ;;  %v2239_v44 = vrot.slane %v2238_v12, 2  ;;  %v2265_v6 = vrot.slane %v2264_v9, 4  ;;  %v2172_v22 = vld [vmem:[%s5033_s14 + $0x30] sm:$0x7] }
 0x153   : > { %v2252_v20 = vmax.f32 %v2250_v4, %v2251_v34  ;;  %v1885_v46 = vsel %vm1799_vm7, %v1884_v24, %v1883_v16  ;;  %v2259_v36 = vmax.f32 %v2257_v15, %v2258_v18  ;;  %v2271_v56 = vsel %vm2235_vm9, %v2165_v21, -inf }
 0x154   : > { %v2246_v14 = vrot.slane %v2245_v62, 2  ;;  %v1887_v26 = vsel %vm1802_vm8, %v1886_v33, %v1885_v46  ;;  %v2240_v45 = vmax.f32 %v2238_v12, %v2239_v44  ;;  %v2266_v27 = vmax.f32 %v2264_v9, %v2265_v6  ;;  %v2173_v33 = vld [vmem:[%s5033_s14 + $0x34] sm:$0x7]  ;;  %v2174_v44 = vld [vmem:[%s5033_s14 + $0x38] sm:$0x7] }
 0x155   : > { %v2253_v29 = vrot.slane %v2252_v20, 2  ;;  %v1928_v57 = vsel %vm1456_vm1, %v1887_v26, 0.0  ;;  %v2260_v32 = vrot.slane %v2259_v36, 2  ;;  %v2272_v0 = vrot.slane %v2271_v56, 4 }
 0x156   : > { %v2247_v58 = vmax.f32 %v2245_v62, %v2246_v14  ;;  %1929 = vadd.xlane.f32.xlu0 %v1928_v57  ;;  %v2241_v38 = vrot.slane %v2240_v45, 1  ;;  %v2267_v5 = vrot.slane %v2266_v27, 2  ;;  %v2278_v37 = vsel %vm2235_vm9, %v2166_v43, -inf }
 0x157   : > { %v2254_v39 = vmax.f32 %v2252_v20, %v2253_v29  ;;  %v2261_v23 = vmax.f32 %v2259_v36, %v2260_v32  ;;  %v2273_v19 = vmax.f32 %v2271_v56, %v2272_v0  ;;  %v2279_v47 = vrot.slane %v2278_v37, 4 }
 0x158   : > { %v2248_v55 = vrot.slane %v2247_v58, 1  ;;  %v5068_v13 = vmax.f32 %v2240_v45, %v2241_v38  ;;  %v2268_v8 = vmax.f32 %v2266_v27, %v2267_v5  ;;  %v2285_v48 = vsel %vm2235_vm9, %v2167_v63, -inf }
 0x159   : > { %v2255_v7 = vrot.slane %v2254_v39, 1  ;;  %v2262_v49 = vrot.slane %v2261_v23, 1  ;;  %v2274_v51 = vrot.slane %v2273_v19, 2  ;;  %v2280_v54 = vmax.f32 %v2278_v37, %v2279_v47 }
 0x15a   : > { %v5073_v42 = vmax.f32 %v2247_v58, %v2248_v55  ;;  %v2269_v35 = vrot.slane %v2268_v8, 1  ;;  %v2286_v50 = vrot.slane %v2285_v48, 4  ;;  %v2292_v53 = vsel %vm2235_vm9, %v2168_v41, -inf }
 0x15b   : > { %v5075_v17 = vmax.f32 %v2254_v39, %v2255_v7  ;;  %v5080_v24 = vmax.f32 %v2261_v23, %v2262_v49  ;;  %v2275_v52 = vmax.f32 %v2273_v19, %v2274_v51  ;;  %v2281_v25 = vrot.slane %v2280_v54, 2 }
 0x15c   : > { %v2293_v10 = vrot.slane %v2292_v53, 4  ;;  %v5082_v1 = vmax.f32 %v2268_v8, %v2269_v35  ;;  %v2287_v28 = vmax.f32 %v2285_v48, %v2286_v50  ;;  %v2299_v30 = vsel %vm2235_vm9, %v2169_v3, -inf }
 0x15d   : > { %v2306_v2 = vsel %vm2235_vm9, %v2170_v59, -inf  ;;  %v2276_v11 = vrot.slane %v2275_v52, 1  ;;  %v2282_v4 = vmax.f32 %v2280_v54, %v2281_v25  ;;  %v2300_v31 = vrot.slane %v2299_v30, 4 }
 0x15e   : > { %v2294_v15 = vmax.f32 %v2292_v53, %v2293_v10  ;;  %v2288_v21 = vrot.slane %v2287_v28, 2  ;;  %v2307_v12 = vrot.slane %v2306_v2, 4  ;;  %v2313_v34 = vsel %vm2235_vm9, %v2171_v61, -inf }
 0x15f   : > { %v2320_v40 = vsel %vm2235_vm9, %v2172_v22, -inf  ;;  %v2277_v62 = vmax.f32 %v2275_v52, %v2276_v11  ;;  %v2283_v18 = vrot.slane %v2282_v4, 1  ;;  %v2301_v16 = vmax.f32 %v2299_v30, %v2300_v31 }
 0x160   : > { %v2295_v9 = vrot.slane %v2294_v15, 2  ;;  %v2289_v20 = vmax.f32 %v2287_v28, %v2288_v21  ;;  %v2308_v6 = vmax.f32 %v2306_v2, %v2307_v12  ;;  %v2314_v46 = vrot.slane %v2313_v34, 4 }
 0x161   : > { %v2321_v43 = vrot.slane %v2320_v40, 4  ;;  %v2284_v14 = vmax.f32 %v2282_v4, %v2283_v18  ;;  %v2302_v56 = vrot.slane %v2301_v16, 2  ;;  %v2327_v26 = vsel %vm2235_vm9, %v2173_v33, -inf  ;;  %v2175_v18 = vld [vmem:[%s5033_s14 + $0x3c] sm:$0x7] }
 0x162   : > { %v2296_v36 = vmax.f32 %v2294_v15, %v2295_v9  ;;  %v2290_v45 = vrot.slane %v2289_v20, 1  ;;  %v2309_v29 = vrot.slane %v2308_v6, 2  ;;  %v2315_v27 = vmax.f32 %v2313_v34, %v2314_v46 }
 0x163   : > { %v2322_v57 = vmax.f32 %v2320_v40, %v2321_v43  ;;  %v2303_v58 = vmax.f32 %v2301_v16, %v2302_v56  ;;  %v2328_v32 = vrot.slane %v2327_v26, 4  ;;  %v2334_v0 = vsel %vm2235_vm9, %v2174_v44, -inf  ;;  %v2176_v43 = vld [vmem:[%s5033_s14 + $0x40] sm:$0x7] }
 0x164   : > { %v2297_v63 = vrot.slane %v2296_v36, 1  ;;  %v2291_v38 = vmax.f32 %v2289_v20, %v2290_v45  ;;  %v2310_v39 = vmax.f32 %v2308_v6, %v2309_v29  ;;  %v2316_v5 = vrot.slane %v2315_v27, 2 }
 0x165   : > { %v2323_v37 = vrot.slane %v2322_v57, 2  ;;  %v2304_v55 = vrot.slane %v2303_v58, 1  ;;  %v2329_v23 = vmax.f32 %v2327_v26, %v2328_v32  ;;  %v2335_v19 = vrot.slane %v2334_v0, 4 }
 0x166   : > { %v2298_v41 = vmax.f32 %v2296_v36, %v2297_v63  ;;  %v2311_v47 = vrot.slane %v2310_v39, 1  ;;  %v2317_v7 = vmax.f32 %v2315_v27, %v2316_v5  ;;  %v2761_v48 = vsel %vm1456_vm1, %v5068_v13, -inf  ;;  %v2178_v27 = vld [vmem:[%s5033_s14 + $0x48] sm:$0x7]  ;;  %v2179_v5 = vld [vmem:[%s5033_s14 + $0x4c] sm:$0x7] }
 0x167   : > { %v2324_v8 = vmax.f32 %v2322_v57, %v2323_v37  ;;  %v2305_v3 = vmax.f32 %v2303_v58, %v2304_v55  ;;  %v2330_v59 = vrot.slane %v2329_v23, 2  ;;  %v2336_v49 = vmax.f32 %v2334_v0, %v2335_v19 }
 0x168   : > { %v2762_v51 = vsel %vm1456_vm1, %v2277_v62, -inf  ;;  %v2312_v54 = vmax.f32 %v2310_v39, %v2311_v47  ;;  %v2318_v35 = vrot.slane %v2317_v7, 1  ;;  %v2766_v52 = vsel %vm1456_vm1, %v5073_v42, -inf }
 0x169   : > { %v2325_v50 = vrot.slane %v2324_v8, 1  ;;  %v2763_v53 = vmax.f32 %v2761_v48, %v2762_v51  ;;  %v2331_v61 = vmax.f32 %v2329_v23, %v2330_v59  ;;  %v2337_v22 = vrot.slane %v2336_v49, 2  ;;  %v2180_v48 = vld [vmem:[%s5033_s14 + $0x50] sm:$0x7] }
 0x16a   : > { %v2767_v25 = vsel %vm1456_vm1, %v2284_v14, -inf  ;;  %v2319_v10 = vmax.f32 %v2317_v7, %v2318_v35  ;;  %v2764_v13 = vsel %vm1456_vm1, %v2312_v54, -inf  ;;  %v2771_v15 = vsel %vm1456_vm1, %v5075_v17, -inf  ;;  %v2177_v14 = vld [vmem:[%s5033_s14 + $0x44] sm:$0x7] }
 0x16b   : > { %v2326_v28 = vmax.f32 %v2324_v8, %v2325_v50  ;;  %v2768_v30 = vmax.f32 %v2766_v52, %v2767_v25  ;;  %v2332_v2 = vrot.slane %v2331_v61, 1  ;;  %v2338_v11 = vmax.f32 %v2336_v49, %v2337_v22 }
 0x16c   : > { %v2765_v4 = vmax.f32 %v2763_v53, %v2764_v13  ;;  %v2769_v31 = vsel %vm1456_vm1, %v2319_v10, -inf  ;;  %v2772_v33 = vsel %vm1456_vm1, %v2291_v38, -inf  ;;  %v2776_v21 = vsel %vm1456_vm1, %v5080_v24, -inf }
 0x16d   : > { %v2774_v42 = vsel %vm1456_vm1, %v2326_v28, -inf  ;;  %v2333_v12 = vmax.f32 %v2331_v61, %v2332_v2  ;;  %v2339_v34 = vrot.slane %v2338_v11, 1  ;;  %v2770_v40 = vmax.f32 %v2768_v30, %v2769_v31  ;;  %v2182_v30 = vld [vmem:[%s5033_s14 + $0x58] sm:$0x7] }
 0x16e   : > { %v2773_v62 = vmax.f32 %v2771_v15, %v2772_v33  ;;  %v2777_v9 = vsel %vm1456_vm1, %v2298_v41, -inf  ;;  %v2781_v17 = vsel %vm1456_vm1, %v5082_v1, -inf  ;;  %v2782_v16 = vsel %vm1456_vm1, %v2305_v3, -inf }
 0x16f   : > { %v2886_v44 = vmul.f32 %v4941_v60, %v2765_v4  ;;  %v2340_v20 = vmax.f32 %v2338_v11, %v2339_v34  ;;  %v2778_v46 = vmax.f32 %v2776_v21, %v2777_v9  ;;  %v2779_v24 = vsel %vm1456_vm1, %v2333_v12, -inf  ;;  %v2183_v21 = vld [vmem:[%s5033_s14 + $0x5c] sm:$0x7] }
 0x170   : > { %v2775_v6 = vmax.f32 %v2773_v62, %v2774_v42  ;;  %v2783_v36 = vmax.f32 %v2781_v17, %v2782_v16  ;;  %v2887_v56 = vmul.f32 %v4941_v60, %v2770_v40  ;;  %v2341_v26 = vsel %vm2235_vm9, %v2175_v18, -inf }
 0x171   : > { %v2780_v1 = vmax.f32 %v2778_v46, %v2779_v24  ;;  %v2784_v45 = vsel %vm1456_vm1, %v2340_v20, -inf  ;;  %v2342_v57 = vrot.slane %v2341_v26, 4  ;;  %v2348_v32 = vsel %vm2235_vm9, %v2176_v43, -inf  ;;  %v2185_v20 = vld [vmem:[%s5033_s14 + $0x64] sm:$0x7] }
 0x172   : > { %v2888_v29 = vmul.f32 %v4941_v60, %v2775_v6  ;;  %v2785_v63 = vmax.f32 %v2783_v36, %v2784_v45  ;;  %v2936_v58 = vrot.slane %v2887_v56, 7  ;;  %v2355_v0 = vsel %vm2235_vm9, %v2177_v14, -inf }
 0x173   : > { %v2889_v38 = vmul.f32 %v4941_v60, %v2780_v1  ;;  %v2343_v37 = vmax.f32 %v2341_v26, %v2342_v57  ;;  %v2349_v41 = vrot.slane %v2348_v32, 4  ;;  %v2356_v19 = vrot.slane %v2355_v0, 4  ;;  %v2186_v1 = vld [vmem:[%s5033_s14 + $0x68] sm:$0x7] }
 0x174   : > { %v2938_v39 = vrot.slane %v2888_v29, 6  ;;  %v2890_v55 = vmul.f32 %v4941_v60, %v2785_v63  ;;  %v2937_v23 = vsel %vm1784_vm2, %v2936_v58, %v2886_v44  ;;  %v2362_v47 = vsel %vm2235_vm9, %v2178_v27, -inf  ;;  %v2181_v60 = vld [vmem:[%s5033_s14 + $0x54] sm:$0x7]  ;;  %v2184_v44 = vld [vmem:[%s5033_s14 + $0x60] sm:$0x7] }
 0x175   : > { %v2940_v8 = vrot.slane %v2889_v38, 5  ;;  %v2344_v3 = vrot.slane %v2343_v37, 2  ;;  %v2350_v59 = vmax.f32 %v2348_v32, %v2349_v41  ;;  %v2357_v51 = vmax.f32 %v2355_v0, %v2356_v19  ;;  %v2187_v38 = vld [vmem:[%s5033_s14 + $0x6c] sm:$0x7] }
 0x176   : > { %v2939_v7 = vsel %vm1787_vm3, %v2938_v39, %v2937_v23  ;;  %v2942_v49 = vrot.slane %v2890_v55, 4  ;;  %v2363_v54 = vrot.slane %v2362_v47, 4  ;;  %v2369_v35 = vsel %vm2235_vm9, %v2179_v5, -inf }
 0x177   : > { %v2941_v50 = vsel %vm1790_vm4, %v2940_v8, %v2939_v7  ;;  %v2345_v53 = vmax.f32 %v2343_v37, %v2344_v3  ;;  %v2351_v61 = vrot.slane %v2350_v59, 2  ;;  %v2370_v22 = vrot.slane %v2369_v35, 4  ;;  %v2188_v7 = vld [vmem:[%s5033_s14 + $0x70] sm:$0x7] }
 0x178   : > { %v2943_v52 = vsel %vm1793_vm5, %v2942_v49, %v2941_v50  ;;  %v2358_v25 = vrot.slane %v2357_v51, 2  ;;  %v2364_v10 = vmax.f32 %v2362_v47, %v2363_v54  ;;  %v2376_v28 = vsel %vm2235_vm9, %v2180_v48, -inf  ;;  %v2189_v50 = vld [vmem:[%s5033_s14 + $0x74] sm:$0x7] }
 0x179   : > { %v2982_v13 = vsel %vm2981_vm10, %v2943_v52, 0.0  ;;  %v2346_v2 = vrot.slane %v2345_v53, 1  ;;  %v2352_v11 = vmax.f32 %v2350_v59, %v2351_v61  ;;  %v2371_v4 = vmax.f32 %v2369_v35, %v2370_v22 }
 0x17a   : > { %2983 = vadd.xlane.f32.xlu1 %v2982_v13  ;;  %v2359_v15 = vmax.f32 %v2357_v51, %v2358_v25  ;;  %v2365_v31 = vrot.slane %v2364_v10, 2  ;;  %v2377_v33 = vrot.slane %v2376_v28, 4  ;;  %v2383_v42 = vsel %vm2235_vm9, %v2181_v60, -inf }
 0x17b   : > { %v5138_v12 = vmax.f32 %v2345_v53, %v2346_v2  ;;  %v2353_v34 = vrot.slane %v2352_v11, 1  ;;  %v2372_v40 = vrot.slane %v2371_v4, 2  ;;  %v2384_v62 = vrot.slane %v2383_v42, 4 }
 0x17c   : > { %v2360_v18 = vrot.slane %v2359_v15, 1  ;;  %v2366_v9 = vmax.f32 %v2364_v10, %v2365_v31  ;;  %v2378_v17 = vmax.f32 %v2376_v28, %v2377_v33  ;;  %v2390_v16 = vsel %vm2235_vm9, %v2182_v30, -inf }
 0x17d   : > { %v5143_v6 = vmax.f32 %v2352_v11, %v2353_v34  ;;  %v2373_v46 = vmax.f32 %v2371_v4, %v2372_v40  ;;  %v2385_v24 = vmax.f32 %v2383_v42, %v2384_v62  ;;  %v2391_v43 = vrot.slane %v2390_v16, 4 }
 0x17e   : > { %v5145_v14 = vmax.f32 %v2359_v15, %v2360_v18  ;;  %v2367_v36 = vrot.slane %v2366_v9, 1  ;;  %v2379_v56 = vrot.slane %v2378_v17, 2  ;;  %v2397_v26 = vsel %vm2235_vm9, %v2183_v21, -inf }
 0x17f   : > { %v2374_v45 = vrot.slane %v2373_v46, 1  ;;  %v2386_v29 = vrot.slane %v2385_v24, 2  ;;  %v2392_v27 = vmax.f32 %v2390_v16, %v2391_v43  ;;  %v2398_v57 = vrot.slane %v2397_v26, 4 }
 0x180   : > { %v5149_v63 = vmax.f32 %v2366_v9, %v2367_v36  ;;  %v2380_v58 = vmax.f32 %v2378_v17, %v2379_v56  ;;  %v2404_v32 = vsel %vm2235_vm9, %v2184_v44, -inf  ;;  %v2411_v0 = vsel %vm2235_vm9, %v2185_v20, -inf }
 0x181   : > { %v5154_v39 = vmax.f32 %v2373_v46, %v2374_v45  ;;  %v2387_v5 = vmax.f32 %v2385_v24, %v2386_v29  ;;  %v2393_v37 = vrot.slane %v2392_v27, 2  ;;  %v2399_v41 = vmax.f32 %v2397_v26, %v2398_v57 }
 0x182   : > { %v2381_v55 = vrot.slane %v2380_v58, 1  ;;  %v2405_v23 = vrot.slane %v2404_v32, 4  ;;  %v2412_v19 = vrot.slane %v2411_v0, 4  ;;  %v2418_v47 = vsel %vm2235_vm9, %v2186_v1, -inf }
 0x183   : > { %v2388_v8 = vrot.slane %v2387_v5, 1  ;;  %v2394_v48 = vmax.f32 %v2392_v27, %v2393_v37  ;;  %v2400_v3 = vrot.slane %v2399_v41, 2  ;;  %v2419_v59 = vrot.slane %v2418_v47, 4 }
 0x184   : > { %v2382_v49 = vmax.f32 %v2380_v58, %v2381_v55  ;;  %v2406_v51 = vmax.f32 %v2404_v32, %v2405_v23  ;;  %v2413_v54 = vmax.f32 %v2411_v0, %v2412_v19  ;;  %v2425_v35 = vsel %vm2235_vm9, %v2187_v38, -inf }
 0x185   : > { %v2389_v60 = vmax.f32 %v2387_v5, %v2388_v8  ;;  %v2395_v53 = vrot.slane %v2394_v48, 1  ;;  %v2401_v61 = vmax.f32 %v2399_v41, %v2400_v3  ;;  %v2420_v22 = vmax.f32 %v2418_v47, %v2419_v59  ;;  %v2190_v8 = vld [vmem:[%s5033_s14 + $0x78] sm:$0x7] }
 0x186   : > { %v2407_v52 = vrot.slane %v2406_v51, 2  ;;  %v2414_v25 = vrot.slane %v2413_v54, 2  ;;  %v2426_v10 = vrot.slane %v2425_v35, 4  ;;  %v2432_v28 = vsel %vm2235_vm9, %v2188_v7, -inf }
 0x187   : > { %v2396_v13 = vmax.f32 %v2394_v48, %v2395_v53  ;;  %v2402_v30 = vrot.slane %v2401_v61, 1  ;;  %v2421_v2 = vrot.slane %v2420_v22, 2  ;;  %v2433_v11 = vrot.slane %v2432_v28, 4  ;;  %v5187_v53 = vld [vmem:[%s5825_s3] ss:$0 sm:$0xff] }
 0x188   : > { %v2408_v4 = vmax.f32 %v2406_v51, %v2407_v52  ;;  %v2415_v15 = vmax.f32 %v2413_v54, %v2414_v25  ;;  %v2427_v31 = vmax.f32 %v2425_v35, %v2426_v10  ;;  %v2439_v33 = vsel %vm2235_vm9, %v2189_v50, -inf  ;;  %v2191_v35 = vld [vmem:[%s5033_s14 + $0x7c] sm:$0x7]  ;;  %v2192_v50 = vld [vmem:[%s5033_s14 + $0x80] sm:$0x7] }
 0x189   : > { %v2403_v42 = vmax.f32 %v2401_v61, %v2402_v30  ;;  %v2422_v21 = vmax.f32 %v2420_v22, %v2421_v2  ;;  %v2434_v34 = vmax.f32 %v2432_v28, %v2433_v11  ;;  %v2440_v40 = vrot.slane %v2439_v33, 4  ;;  %v2193_v28 = vld [vmem:[%s5033_s14 + $0x84] sm:$0x7] }
 0x18a   : > { %v2409_v62 = vrot.slane %v2408_v4, 1  ;;  %v2416_v18 = vrot.slane %v2415_v15, 1  ;;  %v2428_v9 = vrot.slane %v2427_v31, 2  ;;  %v2786_v17 = vsel %vm1456_vm1, %v5138_v12, -inf }
 0x18b   : > { %v2423_v16 = vrot.slane %v2422_v21, 1  ;;  %v2435_v44 = vrot.slane %v2434_v34, 2  ;;  %v2441_v20 = vmax.f32 %v2439_v33, %v2440_v40  ;;  %v2787_v46 = vsel %vm1456_vm1, %v2382_v49, -inf  ;;  %v2194_v33 = vld [vmem:[%s5033_s14 + $0x88] sm:$0x7] }
 0x18c   : > { %v2410_v24 = vmax.f32 %v2408_v4, %v2409_v62  ;;  %v2417_v43 = vmax.f32 %v2415_v15, %v2416_v18  ;;  %v2429_v36 = vmax.f32 %v2427_v31, %v2428_v9  ;;  %v2788_v56 = vmax.f32 %v2786_v17, %v2787_v46 }
 0x18d   : > { %v2424_v26 = vmax.f32 %v2422_v21, %v2423_v16  ;;  %v2436_v1 = vmax.f32 %v2434_v34, %v2435_v44  ;;  %v2442_v45 = vrot.slane %v2441_v20, 2  ;;  %v2791_v29 = vsel %vm1456_vm1, %v5143_v6, -inf  ;;  %v2195_v16 = vld [vmem:[%s5033_s14 + $0x8c] sm:$0x7] }
 0x18e   : > { %v2430_v27 = vrot.slane %v2429_v36, 1  ;;  %v2789_v57 = vsel %vm1456_vm1, %v2417_v43, -inf  ;;  %v2792_v12 = vsel %vm1456_vm1, %v2389_v60, -inf  ;;  %v2796_v58 = vsel %vm1456_vm1, %v5145_v14, -inf }
 0x18f   : > { %v2437_v32 = vrot.slane %v2436_v1, 1  ;;  %v2443_v0 = vmax.f32 %v2441_v20, %v2442_v45  ;;  %v2790_v38 = vmax.f32 %v2788_v56, %v2789_v57  ;;  %v2793_v5 = vmax.f32 %v2791_v29, %v2792_v12 }
 0x190   : > { %v2431_v37 = vmax.f32 %v2429_v36, %v2430_v27  ;;  %v2794_v41 = vsel %vm1456_vm1, %v2424_v26, -inf  ;;  %v2797_v55 = vsel %vm1456_vm1, %v2396_v13, -inf  ;;  %v2801_v6 = vsel %vm1456_vm1, %v5149_v63, -inf  ;;  %v2196_v26 = vld [vmem:[%s5033_s14 + $0x90] sm:$0x7] }
 0x191   : > { %v2438_v23 = vmax.f32 %v2436_v1, %v2437_v32  ;;  %v2444_v19 = vrot.slane %v2443_v0, 1  ;;  %v2795_v47 = vmax.f32 %v2793_v5, %v2794_v41  ;;  %v2798_v7 = vmax.f32 %v2796_v58, %v2797_v55 }
 0x192   : > { %v2799_v14 = vsel %vm1456_vm1, %v2431_v37, -inf  ;;  %v2802_v48 = vsel %vm1456_vm1, %v2403_v42, -inf  ;;  %v2806_v3 = vsel %vm1456_vm1, %v5154_v39, -inf  ;;  %v2807_v59 = vsel %vm1456_vm1, %v2410_v24, -inf }
 0x193   : > { %v2445_v49 = vmax.f32 %v2443_v0, %v2444_v19  ;;  %v2800_v51 = vmax.f32 %v2798_v7, %v2799_v14  ;;  %v2803_v54 = vmax.f32 %v2801_v6, %v2802_v48  ;;  %v2804_v63 = vsel %vm1456_vm1, %v2438_v23, -inf  ;;  %v2197_v0 = vld [vmem:[%s5033_s14 + $0x94] sm:$0x7]  ;;  %v2198_v19 = vld [vmem:[%s5033_s14 + $0x98] sm:$0x7] }
 0x194   : > { %v2808_v60 = vmax.f32 %v2806_v3, %v2807_v59  ;;  %v2891_v61 = vmul.f32 %v5187_v53, %v2790_v38  ;;  %v2892_v39 = vmul.f32 %v5187_v53, %v2795_v47  ;;  %v2446_v22 = vsel %vm2235_vm9, %v2190_v8, -inf }
 0x195   : > { %v2805_v52 = vmax.f32 %v2803_v54, %v2804_v63  ;;  %v2809_v25 = vsel %vm1456_vm1, %v2445_v49, -inf  ;;  %v2893_v10 = vmul.f32 %v5187_v53, %v2800_v51  ;;  %v2447_v13 = vrot.slane %v2446_v22, 4  ;;  %v2199_v51 = vld [vmem:[%s5033_s14 + $0x9c] sm:$0x7]  ;;  %v2200_v54 = vld [vmem:[%s5033_s14 + $0xa0] sm:$0x7] }
 0x196   : > { %v2810_v30 = vmax.f32 %v2808_v60, %v2809_v25  ;;  %v2944_v2 = vrot.slane %v2892_v39, 7  ;;  %v2453_v11 = vsel %vm2235_vm9, %v2191_v35, -inf  ;;  %v2460_v4 = vsel %vm2235_vm9, %v2192_v50, -inf  ;;  %v2201_v25 = vld [vmem:[%s5033_s14 + $0xa4] sm:$0x7] }
 0x197   : > { %v2894_v15 = vmul.f32 %v5187_v53, %v2805_v52  ;;  %v2946_v31 = vrot.slane %v2893_v10, 6  ;;  %v2448_v42 = vmax.f32 %v2446_v22, %v2447_v13  ;;  %v2454_v21 = vrot.slane %v2453_v11, 4 }
 0x198   : > { %v2895_v34 = vmul.f32 %v5187_v53, %v2810_v30  ;;  %v2945_v40 = vsel %vm1784_vm2, %v2944_v2, %v2891_v61  ;;  %v2461_v62 = vrot.slane %v2460_v4, 4  ;;  %v2467_v18 = vsel %vm2235_vm9, %v2193_v28, -inf }
 0x199   : > { %v2947_v9 = vsel %vm1787_vm3, %v2946_v31, %v2945_v40  ;;  %v2948_v17 = vrot.slane %v2894_v15, 5  ;;  %v2449_v44 = vrot.slane %v2448_v42, 2  ;;  %v2455_v20 = vmax.f32 %v2453_v11, %v2454_v21  ;;  %v2202_v31 = vld [vmem:[%s5033_s14 + $0xa8] sm:$0x7] }
 0x19a   : > { %v2950_v46 = vrot.slane %v2895_v34, 4  ;;  %v2462_v24 = vmax.f32 %v2460_v4, %v2461_v62  ;;  %v2468_v43 = vrot.slane %v2467_v18, 4  ;;  %v2474_v36 = vsel %vm2235_vm9, %v2194_v33, -inf }
 0x19b   : > { %v2949_v56 = vsel %vm1790_vm4, %v2948_v17, %v2947_v9  ;;  %v2450_v1 = vmax.f32 %v2448_v42, %v2449_v44  ;;  %v2456_v45 = vrot.slane %v2455_v20, 2  ;;  %v2475_v29 = vrot.slane %v2474_v36, 4  ;;  %v2203_v17 = vld [vmem:[%s5033_s14 + $0xac] sm:$0x7] }
 0x19c   : > { %v2951_v27 = vsel %vm1793_vm5, %v2950_v46, %v2949_v56  ;;  %v2463_v57 = vrot.slane %v2462_v24, 2  ;;  %v2469_v12 = vmax.f32 %v2467_v18, %v2468_v43  ;;  %v2481_v58 = vsel %vm2235_vm9, %v2195_v16, -inf }
 0x19d   : > { %v2985_v32 = vsel %vm2981_vm10, %v2951_v27, 0.0  ;;  %v2451_v38 = vrot.slane %v2450_v1, 1  ;;  %v2457_v5 = vmax.f32 %v2455_v20, %v2456_v45  ;;  %v2476_v37 = vmax.f32 %v2474_v36, %v2475_v29 }
 0x19e   : > { %2986 = vadd.xlane.f32.xlu1 %v2985_v32  ;;  %v2464_v41 = vmax.f32 %v2462_v24, %v2463_v57  ;;  %v2470_v55 = vrot.slane %v2469_v12, 2  ;;  %v2482_v6 = vrot.slane %v2481_v58, 4  ;;  %v2488_v23 = vsel %vm2235_vm9, %v2196_v26, -inf  ;;  %v2204_v26 = vld [vmem:[%s5033_s14 + $0xb0] sm:$0x7] }
 0x19f   : > { %v5213_v47 = vmax.f32 %v2450_v1, %v2451_v38  ;;  %v2458_v7 = vrot.slane %v2457_v5, 1  ;;  %v2477_v8 = vrot.slane %v2476_v37, 2  ;;  %v2489_v14 = vrot.slane %v2488_v23, 4 }
 0x1a0   : > { %v2465_v48 = vrot.slane %v2464_v41, 1  ;;  %v2471_v3 = vmax.f32 %v2469_v12, %v2470_v55  ;;  %v2483_v59 = vmax.f32 %v2481_v58, %v2482_v6  ;;  %v2495_v49 = vsel %vm2235_vm9, %v2197_v0, -inf }
 0x1a1   : > { %v5218_v63 = vmax.f32 %v2457_v5, %v2458_v7  ;;  %v2478_v35 = vmax.f32 %v2476_v37, %v2477_v8  ;;  %v2490_v50 = vmax.f32 %v2488_v23, %v2489_v14  ;;  %v2496_v60 = vrot.slane %v2495_v49, 4 }
 0x1a2   : > { %v5220_v61 = vmax.f32 %v2464_v41, %v2465_v48  ;;  %v2472_v39 = vrot.slane %v2471_v3, 1  ;;  %v2484_v22 = vrot.slane %v2483_v59, 2  ;;  %v2502_v52 = vsel %vm2235_vm9, %v2198_v19, -inf }
 0x1a3   : > { %v2479_v10 = vrot.slane %v2478_v35, 1  ;;  %v2491_v28 = vrot.slane %v2490_v50, 2  ;;  %v2497_v13 = vmax.f32 %v2495_v49, %v2496_v60  ;;  %v2503_v30 = vrot.slane %v2502_v52, 4 }
 0x1a4   : > { %v5224_v2 = vmax.f32 %v2471_v3, %v2472_v39  ;;  %v2485_v11 = vmax.f32 %v2483_v59, %v2484_v22  ;;  %v2509_v4 = vsel %vm2235_vm9, %v2199_v51, -inf  ;;  %v2516_v15 = vsel %vm2235_vm9, %v2200_v54, -inf }
 0x1a5   : > { %v5229_v33 = vmax.f32 %v2478_v35, %v2479_v10  ;;  %v2492_v42 = vmax.f32 %v2490_v50, %v2491_v28  ;;  %v2498_v21 = vrot.slane %v2497_v13, 2  ;;  %v2504_v34 = vmax.f32 %v2502_v52, %v2503_v30 }
 0x1a6   : > { %v2486_v40 = vrot.slane %v2485_v11, 1  ;;  %v2510_v62 = vrot.slane %v2509_v4, 4  ;;  %v2517_v18 = vrot.slane %v2516_v15, 4  ;;  %v2523_v9 = vsel %vm2235_vm9, %v2201_v25, -inf }
 0x1a7   : > { %v2493_v16 = vrot.slane %v2492_v42, 1  ;;  %v2499_v44 = vmax.f32 %v2497_v13, %v2498_v21  ;;  %v2505_v20 = vrot.slane %v2504_v34, 2  ;;  %v2524_v46 = vrot.slane %v2523_v9, 4 }
 0x1a8   : > { %v2487_v24 = vmax.f32 %v2485_v11, %v2486_v40  ;;  %v2511_v43 = vmax.f32 %v2509_v4, %v2510_v62  ;;  %v2518_v36 = vmax.f32 %v2516_v15, %v2517_v18  ;;  %v2530_v56 = vsel %vm2235_vm9, %v2202_v31, -inf }
 0x1a9   : > { %v2494_v1 = vmax.f32 %v2492_v42, %v2493_v16  ;;  %v2500_v45 = vrot.slane %v2499_v44, 1  ;;  %v2506_v29 = vmax.f32 %v2504_v34, %v2505_v20  ;;  %v2525_v27 = vmax.f32 %v2523_v9, %v2524_v46 }
 0x1aa   : > { %v2512_v57 = vrot.slane %v2511_v43, 2  ;;  %v2519_v12 = vrot.slane %v2518_v36, 2  ;;  %v2531_v58 = vrot.slane %v2530_v56, 4  ;;  %v2537_v32 = vsel %vm2235_vm9, %v2203_v17, -inf }
 0x1ab   : > { %v2501_v0 = vmax.f32 %v2499_v44, %v2500_v45  ;;  %v2507_v38 = vrot.slane %v2506_v29, 1  ;;  %v2526_v5 = vrot.slane %v2525_v27, 2  ;;  %v2538_v37 = vrot.slane %v2537_v32, 4  ;;  %v2205_v44 = vld [vmem:[%s5033_s14 + $0xb4] sm:$0x7] }
 0x1ac   : > { %v2513_v41 = vmax.f32 %v2511_v43, %v2512_v57  ;;  %v2520_v55 = vmax.f32 %v2518_v36, %v2519_v12  ;;  %v2532_v6 = vmax.f32 %v2530_v56, %v2531_v58  ;;  %v2544_v23 = vsel %vm2235_vm9, %v2204_v26, -inf  ;;  %v2206_v26 = vld [vmem:[%s5033_s14 + $0xb8] sm:$0x7] }
 0x1ad   : > { %v2508_v19 = vmax.f32 %v2506_v29, %v2507_v38  ;;  %v2527_v7 = vmax.f32 %v2525_v27, %v2526_v5  ;;  %v2539_v8 = vmax.f32 %v2537_v32, %v2538_v37  ;;  %v2545_v14 = vrot.slane %v2544_v23, 4  ;;  %v2208_v32 = vld [vmem:[%s5033_s14 + $0xc0] sm:$0x7] }
 0x1ae   : > { %v2514_v48 = vrot.slane %v2513_v41, 1  ;;  %v2521_v3 = vrot.slane %v2520_v55, 1  ;;  %v2533_v59 = vrot.slane %v2532_v6, 2  ;;  %v2811_v49 = vsel %vm1456_vm1, %v5213_v47, -inf }
 0x1af   : > { %v2528_v51 = vrot.slane %v2527_v7, 1  ;;  %v2540_v54 = vrot.slane %v2539_v8, 2  ;;  %v2546_v35 = vmax.f32 %v2544_v23, %v2545_v14  ;;  %v2812_v50 = vsel %vm1456_vm1, %v2487_v24, -inf  ;;  %v2209_v23 = vld [vmem:[%s5033_s14 + $0xc4] sm:$0x7] }
 0x1b0   : > { %v2515_v60 = vmax.f32 %v2513_v41, %v2514_v48  ;;  %v2522_v39 = vmax.f32 %v2520_v55, %v2521_v3  ;;  %v2534_v22 = vmax.f32 %v2532_v6, %v2533_v59  ;;  %v2813_v52 = vmax.f32 %v2811_v49, %v2812_v50 }
 0x1b1   : > { %v2529_v25 = vmax.f32 %v2527_v7, %v2528_v51  ;;  %v2541_v10 = vmax.f32 %v2539_v8, %v2540_v54  ;;  %v2547_v28 = vrot.slane %v2546_v35, 2  ;;  %v2816_v13 = vsel %vm1456_vm1, %v5218_v63, -inf  ;;  %v2210_v51 = vld [vmem:[%s5033_s14 + $0xc8] sm:$0x7] }
 0x1b2   : > { %v2535_v30 = vrot.slane %v2534_v22, 1  ;;  %v2814_v11 = vsel %vm1456_vm1, %v2522_v39, -inf  ;;  %v2817_v47 = vsel %vm1456_vm1, %v2494_v1, -inf  ;;  %v2821_v4 = vsel %vm1456_vm1, %v5220_v61, -inf  ;;  %v2207_v1 = vld [vmem:[%s5033_s14 + $0xbc] sm:$0x7] }
 0x1b3   : > { %v2542_v15 = vrot.slane %v2541_v10, 1  ;;  %v2548_v31 = vmax.f32 %v2546_v35, %v2547_v28  ;;  %v2815_v42 = vmax.f32 %v2813_v52, %v2814_v11  ;;  %v2818_v21 = vmax.f32 %v2816_v13, %v2817_v47 }
 0x1b4   : > { %v2536_v34 = vmax.f32 %v2534_v22, %v2535_v30  ;;  %v2819_v40 = vsel %vm1456_vm1, %v2529_v25, -inf  ;;  %v2822_v62 = vsel %vm1456_vm1, %v2501_v0, -inf  ;;  %v2826_v63 = vsel %vm1456_vm1, %v5224_v2, -inf  ;;  %v2211_v25 = vld [vmem:[%s5033_s14 + $0xcc] sm:$0x7] }
 0x1b5   : > { %v2543_v18 = vmax.f32 %v2541_v10, %v2542_v15  ;;  %v2549_v9 = vrot.slane %v2548_v31, 1  ;;  %v2820_v17 = vmax.f32 %v2818_v21, %v2819_v40  ;;  %v2823_v16 = vmax.f32 %v2821_v4, %v2822_v62 }
 0x1b6   : > { %v2824_v61 = vsel %vm1456_vm1, %v2536_v34, -inf  ;;  %v2827_v20 = vsel %vm1456_vm1, %v2508_v19, -inf  ;;  %v2831_v46 = vsel %vm1456_vm1, %v5229_v33, -inf  ;;  %v2832_v24 = vsel %vm1456_vm1, %v2515_v60, -inf }
 0x1b7   : > { %v2550_v43 = vmax.f32 %v2548_v31, %v2549_v9  ;;  %v2825_v36 = vmax.f32 %v2823_v16, %v2824_v61  ;;  %v2828_v56 = vmax.f32 %v2826_v63, %v2827_v20  ;;  %v2829_v2 = vsel %vm1456_vm1, %v2543_v18, -inf  ;;  %v2212_v31 = vld [vmem:[%s5033_s14 + $0xd0] sm:$0x7]  ;;  %v2213_v9 = vld [vmem:[%s5033_s14 + $0xd4] sm:$0x7] }
 0x1b8   : > { %v2833_v45 = vmax.f32 %v2831_v46, %v2832_v24  ;;  %v2896_v29 = vmul.f32 %v5187_v53, %v2815_v42  ;;  %v2897_v27 = vmul.f32 %v5187_v53, %v2820_v17  ;;  %v2551_v57 = vsel %vm2235_vm9, %v2205_v44, -inf }
 0x1b9   : > { %v2830_v12 = vmax.f32 %v2828_v56, %v2829_v2  ;;  %v2834_v33 = vsel %vm1456_vm1, %v2550_v43, -inf  ;;  %v2898_v58 = vmul.f32 %v5187_v53, %v2825_v36  ;;  %v2552_v0 = vrot.slane %v2551_v57, 4  ;;  %v2214_v36 = vld [vmem:[%s5033_s14 + $0xd8] sm:$0x7]  ;;  %v2215_v56 = vld [vmem:[%s5033_s14 + $0xdc] sm:$0x7] }
 0x1ba   : > { %v2835_v38 = vmax.f32 %v2833_v45, %v2834_v33  ;;  %v2952_v5 = vrot.slane %v2897_v27, 7  ;;  %v2558_v37 = vsel %vm2235_vm9, %v2206_v26, -inf  ;;  %v2565_v41 = vsel %vm2235_vm9, %v2207_v1, -inf  ;;  %v2216_v33 = vld [vmem:[%s5033_s14 + $0xe0] sm:$0x7] }
 0x1bb   : > { %v2899_v55 = vmul.f32 %v5187_v53, %v2830_v12  ;;  %v2954_v6 = vrot.slane %v2898_v58, 6  ;;  %v2553_v19 = vmax.f32 %v2551_v57, %v2552_v0  ;;  %v2559_v7 = vrot.slane %v2558_v37, 4 }
 0x1bc   : > { %v2900_v8 = vmul.f32 %v5187_v53, %v2835_v38  ;;  %v2953_v14 = vsel %vm1784_vm2, %v2952_v5, %v2896_v29  ;;  %v2566_v48 = vrot.slane %v2565_v41, 4  ;;  %v2572_v3 = vsel %vm2235_vm9, %v2208_v32, -inf }
 0x1bd   : > { %v2955_v59 = vsel %vm1787_vm3, %v2954_v6, %v2953_v14  ;;  %v2956_v49 = vrot.slane %v2899_v55, 5  ;;  %v2554_v54 = vrot.slane %v2553_v19, 2  ;;  %v2560_v35 = vmax.f32 %v2558_v37, %v2559_v7  ;;  %v2217_v6 = vld [vmem:[%s5033_s14 + $0xe4] sm:$0x7] }
 0x1be   : > { %v2958_v50 = vrot.slane %v2900_v8, 4  ;;  %v2567_v60 = vmax.f32 %v2565_v41, %v2566_v48  ;;  %v2573_v39 = vrot.slane %v2572_v3, 4  ;;  %v2579_v22 = vsel %vm2235_vm9, %v2209_v23, -inf }
 0x1bf   : > { %v2957_v52 = vsel %vm1790_vm4, %v2956_v49, %v2955_v59  ;;  %v2555_v10 = vmax.f32 %v2553_v19, %v2554_v54  ;;  %v2561_v28 = vrot.slane %v2560_v35, 2  ;;  %v2580_v13 = vrot.slane %v2579_v22, 4  ;;  %v2218_v49 = vld [vmem:[%s5033_s14 + $0xe8] sm:$0x7] }
 0x1c0   : > { %v2959_v30 = vsel %vm1793_vm5, %v2958_v50, %v2957_v52  ;;  %v2568_v11 = vrot.slane %v2567_v60, 2  ;;  %v2574_v47 = vmax.f32 %v2572_v3, %v2573_v39  ;;  %v2586_v4 = vsel %vm2235_vm9, %v2210_v51, -inf }
 0x1c1   : > { %v2988_v15 = vsel %vm2981_vm10, %v2959_v30, 0.0  ;;  %v2556_v42 = vrot.slane %v2555_v10, 1  ;;  %v2562_v21 = vmax.f32 %v2560_v35, %v2561_v28  ;;  %v2581_v34 = vmax.f32 %v2579_v22, %v2580_v13 }
 0x1c2   : > { %2989 = vadd.xlane.f32.xlu1 %v2988_v15  ;;  %v2569_v40 = vmax.f32 %v2567_v60, %v2568_v11  ;;  %v2575_v62 = vrot.slane %v2574_v47, 2  ;;  %v2587_v63 = vrot.slane %v2586_v4, 4  ;;  %v2593_v18 = vsel %vm2235_vm9, %v2211_v25, -inf  ;;  %v2219_v25 = vld [vmem:[%s5033_s14 + $0xec] sm:$0x7] }
 0x1c3   : > { %v5283_v17 = vmax.f32 %v2555_v10, %v2556_v42  ;;  %v2563_v16 = vrot.slane %v2562_v21, 1  ;;  %v2582_v44 = vrot.slane %v2581_v34, 2  ;;  %v2594_v61 = vrot.slane %v2593_v18, 4 }
 0x1c4   : > { %v2570_v20 = vrot.slane %v2569_v40, 1  ;;  %v2576_v46 = vmax.f32 %v2574_v47, %v2575_v62  ;;  %v2588_v24 = vmax.f32 %v2586_v4, %v2587_v63  ;;  %v2600_v43 = vsel %vm2235_vm9, %v2212_v31, -inf }
 0x1c5   : > { %v5288_v2 = vmax.f32 %v2562_v21, %v2563_v16  ;;  %v2583_v26 = vmax.f32 %v2581_v34, %v2582_v44  ;;  %v2595_v1 = vmax.f32 %v2593_v18, %v2594_v61  ;;  %v2601_v45 = vrot.slane %v2600_v43, 4 }
 0x1c6   : > { %v5290_v29 = vmax.f32 %v2569_v40, %v2570_v20  ;;  %v2577_v27 = vrot.slane %v2576_v46, 1  ;;  %v2589_v57 = vrot.slane %v2588_v24, 2  ;;  %v2607_v12 = vsel %vm2235_vm9, %v2213_v9, -inf }
 0x1c7   : > { %v2584_v58 = vrot.slane %v2583_v26, 1  ;;  %v2596_v32 = vrot.slane %v2595_v1, 2  ;;  %v2602_v0 = vmax.f32 %v2600_v43, %v2601_v45  ;;  %v2608_v38 = vrot.slane %v2607_v12, 4 }
 0x1c8   : > { %v5294_v5 = vmax.f32 %v2576_v46, %v2577_v27  ;;  %v2590_v37 = vmax.f32 %v2588_v24, %v2589_v57  ;;  %v2614_v41 = vsel %vm2235_vm9, %v2214_v36, -inf  ;;  %v2621_v55 = vsel %vm2235_vm9, %v2215_v56, -inf }
 0x1c9   : > { %v5299_v23 = vmax.f32 %v2583_v26, %v2584_v58  ;;  %v2597_v19 = vmax.f32 %v2595_v1, %v2596_v32  ;;  %v2603_v7 = vrot.slane %v2602_v0, 2  ;;  %v2609_v8 = vmax.f32 %v2607_v12, %v2608_v38 }
 0x1ca   : > { %v2591_v14 = vrot.slane %v2590_v37, 1  ;;  %v2615_v48 = vrot.slane %v2614_v41, 4  ;;  %v2622_v3 = vrot.slane %v2621_v55, 4  ;;  %v2628_v59 = vsel %vm2235_vm9, %v2216_v33, -inf }
 0x1cb   : > { %v2598_v51 = vrot.slane %v2597_v19, 1  ;;  %v2604_v54 = vmax.f32 %v2602_v0, %v2603_v7  ;;  %v2610_v35 = vrot.slane %v2609_v8, 2  ;;  %v2629_v50 = vrot.slane %v2628_v59, 4 }
 0x1cc   : > { %v2592_v60 = vmax.f32 %v2590_v37, %v2591_v14  ;;  %v2616_v39 = vmax.f32 %v2614_v41, %v2615_v48  ;;  %v2623_v22 = vmax.f32 %v2621_v55, %v2622_v3  ;;  %v2635_v52 = vsel %vm2235_vm9, %v2217_v6, -inf }
 0x1cd   : > { %v2599_v10 = vmax.f32 %v2597_v19, %v2598_v51  ;;  %v2605_v28 = vrot.slane %v2604_v54, 1  ;;  %v2611_v13 = vmax.f32 %v2609_v8, %v2610_v35  ;;  %v2630_v30 = vmax.f32 %v2628_v59, %v2629_v50 }
 0x1ce   : > { %v2617_v11 = vrot.slane %v2616_v39, 2  ;;  %v2624_v47 = vrot.slane %v2623_v22, 2  ;;  %v2636_v4 = vrot.slane %v2635_v52, 4  ;;  %v2642_v15 = vsel %vm2235_vm9, %v2218_v49, -inf }
 0x1cf   : > { %v2606_v31 = vmax.f32 %v2604_v54, %v2605_v28  ;;  %v2612_v42 = vrot.slane %v2611_v13, 1  ;;  %v2631_v21 = vrot.slane %v2630_v30, 2  ;;  %v2643_v34 = vrot.slane %v2642_v15, 4  ;;  %v2220_v54 = vld [vmem:[%s5033_s14 + $0xf0] sm:$0x7] }
 0x1d0   : > { %v2618_v40 = vmax.f32 %v2616_v39, %v2617_v11  ;;  %v2625_v62 = vmax.f32 %v2623_v22, %v2624_v47  ;;  %v2637_v63 = vmax.f32 %v2635_v52, %v2636_v4  ;;  %v2649_v18 = vsel %vm2235_vm9, %v2219_v25, -inf  ;;  %v2221_v25 = vld [vmem:[%s5033_s14 + $0xf4] sm:$0x7] }
 0x1d1   : > { %v2613_v9 = vmax.f32 %v2611_v13, %v2612_v42  ;;  %v2632_v16 = vmax.f32 %v2630_v30, %v2631_v21  ;;  %v2644_v44 = vmax.f32 %v2642_v15, %v2643_v34  ;;  %v2650_v61 = vrot.slane %v2649_v18, 4  ;;  %v2223_v15 = vld [vmem:[%s5033_s14 + $0xfc] sm:$0x7] }
 0x1d2   : > { %v2619_v20 = vrot.slane %v2618_v40, 1  ;;  %v2626_v46 = vrot.slane %v2625_v62, 1  ;;  %v2638_v24 = vrot.slane %v2637_v63, 2  ;;  %v2836_v43 = vsel %vm1456_vm1, %v5283_v17, -inf }
 0x1d3   : > { %v2633_v36 = vrot.slane %v2632_v16, 1  ;;  %v2645_v56 = vrot.slane %v2644_v44, 2  ;;  %v2651_v26 = vmax.f32 %v2649_v18, %v2650_v61  ;;  %v2837_v1 = vsel %vm1456_vm1, %v2592_v60, -inf  ;;  %v2224_v18 = vld [vmem:[%s5033_s14 + $0x100] sm:$0x7] }
 0x1d4   : > { %v2620_v45 = vmax.f32 %v2618_v40, %v2619_v20  ;;  %v2627_v27 = vmax.f32 %v2625_v62, %v2626_v46  ;;  %v2639_v57 = vmax.f32 %v2637_v63, %v2638_v24  ;;  %v2838_v12 = vmax.f32 %v2836_v43, %v2837_v1 }
 0x1d5   : > { %v2634_v33 = vmax.f32 %v2632_v16, %v2633_v36  ;;  %v2646_v58 = vmax.f32 %v2644_v44, %v2645_v56  ;;  %v2652_v32 = vrot.slane %v2651_v26, 2  ;;  %v2841_v0 = vsel %vm1456_vm1, %v5288_v2, -inf  ;;  %v2225_v36 = vld [vmem:[%s5033_s14 + $0x104] sm:$0x7] }
 0x1d6   : > { %v2640_v38 = vrot.slane %v2639_v57, 1  ;;  %v2839_v37 = vsel %vm1456_vm1, %v2627_v27, -inf  ;;  %v2842_v17 = vsel %vm1456_vm1, %v2599_v10, -inf  ;;  %v2846_v41 = vsel %vm1456_vm1, %v5290_v29, -inf  ;;  %v2222_v10 = vld [vmem:[%s5033_s14 + $0xf8] sm:$0x7] }
 0x1d7   : > { %v2647_v55 = vrot.slane %v2646_v58, 1  ;;  %v2653_v6 = vmax.f32 %v2651_v26, %v2652_v32  ;;  %v2840_v19 = vmax.f32 %v2838_v12, %v2839_v37  ;;  %v2843_v7 = vmax.f32 %v2841_v0, %v2842_v17 }
 0x1d8   : > { %v2641_v8 = vmax.f32 %v2639_v57, %v2640_v38  ;;  %v2844_v14 = vsel %vm1456_vm1, %v2634_v33, -inf  ;;  %v2847_v48 = vsel %vm1456_vm1, %v2606_v31, -inf  ;;  %v2851_v2 = vsel %vm1456_vm1, %v5294_v5, -inf  ;;  %v2226_v33 = vld [vmem:[%s5033_s14 + $0x108] sm:$0x7] }
 0x1d9   : > { %v2648_v3 = vmax.f32 %v2646_v58, %v2647_v55  ;;  %v2654_v59 = vrot.slane %v2653_v6, 1  ;;  %v2845_v49 = vmax.f32 %v2843_v7, %v2844_v14  ;;  %v2848_v51 = vmax.f32 %v2846_v41, %v2847_v48 }
 0x1da   : > { %v2849_v29 = vsel %vm1456_vm1, %v2641_v8, -inf  ;;  %v2852_v35 = vsel %vm1456_vm1, %v2613_v9, -inf  ;;  %v2856_v50 = vsel %vm1456_vm1, %v5299_v23, -inf  ;;  %v2857_v60 = vsel %vm1456_vm1, %v2620_v45, -inf }
 0x1db   : > { %v2655_v39 = vmax.f32 %v2653_v6, %v2654_v59  ;;  %v2850_v22 = vmax.f32 %v2848_v51, %v2849_v29  ;;  %v2853_v52 = vmax.f32 %v2851_v2, %v2852_v35  ;;  %v2854_v5 = vsel %vm1456_vm1, %v2648_v3, -inf  ;;  %v2227_v6 = vld [vmem:[%s5033_s14 + $0x10c] sm:$0x7]  ;;  %v2228_v59 = vld [vmem:[%s5033_s14 + $0x110] sm:$0x7] }
 0x1dc   : > { %v2858_v28 = vmax.f32 %v2856_v50, %v2857_v60  ;;  %v2901_v13 = vmul.f32 %v5187_v53, %v2840_v19  ;;  %v2902_v30 = vmul.f32 %v5187_v53, %v2845_v49  ;;  %v2656_v11 = vsel %vm2235_vm9, %v2220_v54, -inf }
 0x1dd   : > { %v2855_v47 = vmax.f32 %v2853_v52, %v2854_v5  ;;  %v2859_v23 = vsel %vm1456_vm1, %v2655_v39, -inf  ;;  %v2903_v4 = vmul.f32 %v5187_v53, %v2850_v22  ;;  %v2657_v31 = vrot.slane %v2656_v11, 4  ;;  %v2229_v22 = vld [vmem:[%s5033_s14 + $0x114] sm:$0x7]  ;;  %v2230_v52 = vld [vmem:[%s5033_s14 + $0x118] sm:$0x7] }
 0x1de   : > { %v2860_v42 = vmax.f32 %v2858_v28, %v2859_v23  ;;  %v2960_v21 = vrot.slane %v2902_v30, 7  ;;  %v2663_v34 = vsel %vm2235_vm9, %v2221_v25, -inf  ;;  %v2670_v40 = vsel %vm2235_vm9, %v2222_v10, -inf  ;;  %v2231_v23 = vld [vmem:[%s5033_s14 + $0x11c] sm:$0x7] }
 0x1df   : > { %v2904_v62 = vmul.f32 %v5187_v53, %v2855_v47  ;;  %v2962_v63 = vrot.slane %v2903_v4, 6  ;;  %v2658_v9 = vmax.f32 %v2656_v11, %v2657_v31  ;;  %v2664_v16 = vrot.slane %v2663_v34, 4 }
 0x1e0   : > { %v2905_v44 = vmul.f32 %v5187_v53, %v2860_v42  ;;  %v2961_v61 = vsel %vm1784_vm2, %v2960_v21, %v2901_v13  ;;  %v2671_v20 = vrot.slane %v2670_v40, 4  ;;  %v2677_v46 = vsel %vm2235_vm9, %v2223_v15, -inf }
 0x1e1   : > { %v2963_v24 = vsel %vm1787_vm3, %v2962_v63, %v2961_v61  ;;  %v2964_v43 = vrot.slane %v2904_v62, 5  ;;  %v2659_v56 = vrot.slane %v2658_v9, 2  ;;  %v2665_v26 = vmax.f32 %v2663_v34, %v2664_v16  ;;  %v2232_v63 = vld [vmem:[%s5033_s14 + $0x120] sm:$0x7] }
 0x1e2   : > { %v2966_v1 = vrot.slane %v2905_v44, 4  ;;  %v2672_v45 = vmax.f32 %v2670_v40, %v2671_v20  ;;  %v2678_v27 = vrot.slane %v2677_v46, 4  ;;  %v2684_v57 = vsel %vm2235_vm9, %v2224_v18, -inf }
 0x1e3   : > { %v2965_v12 = vsel %vm1790_vm4, %v2964_v43, %v2963_v24  ;;  %v2660_v58 = vmax.f32 %v2658_v9, %v2659_v56  ;;  %v2666_v32 = vrot.slane %v2665_v26, 2  ;;  %v2685_v0 = vrot.slane %v2684_v57, 4  ;;  %v2233_v43 = vld [vmem:[%s5033_s14 + $0x124] sm:$0x7] }
 0x1e4   : > { %v2967_v38 = vsel %vm1793_vm5, %v2966_v1, %v2965_v12  ;;  %v2673_v37 = vrot.slane %v2672_v45, 2  ;;  %v2679_v17 = vmax.f32 %v2677_v46, %v2678_v27  ;;  %v2691_v41 = vsel %vm2235_vm9, %v2225_v36, -inf }
 0x1e5   : > { %v2991_v55 = vsel %vm2981_vm10, %v2967_v38, 0.0  ;;  %v2661_v19 = vrot.slane %v2660_v58, 1  ;;  %v2667_v7 = vmax.f32 %v2665_v26, %v2666_v32  ;;  %v2686_v8 = vmax.f32 %v2684_v57, %v2685_v0 }
 0x1e6   : > { %2992 = vadd.xlane.f32.xlu1 %v2991_v55  ;;  %v2674_v14 = vmax.f32 %v2672_v45, %v2673_v37  ;;  %v2680_v48 = vrot.slane %v2679_v17, 2  ;;  %v2692_v2 = vrot.slane %v2691_v41, 4  ;;  %v2698_v3 = vsel %vm2235_vm9, %v2226_v33, -inf  ;;  %v2234_v33 = vld [vmem:[%s5033_s14 + $0x128] sm:$0x7] }
 0x1e7   : > { %v5353_v49 = vmax.f32 %v2660_v58, %v2661_v19  ;;  %v2668_v51 = vrot.slane %v2667_v7, 1  ;;  %v2687_v54 = vrot.slane %v2686_v8, 2  ;;  %v2699_v29 = vrot.slane %v2698_v3, 4 }
 0x1e8   : > { %v2675_v35 = vrot.slane %v2674_v14, 1  ;;  %v2681_v50 = vmax.f32 %v2679_v17, %v2680_v48  ;;  %v2693_v60 = vmax.f32 %v2691_v41, %v2692_v2  ;;  %v2705_v39 = vsel %vm2235_vm9, %v2227_v6, -inf }
 0x1e9   : > { %v5358_v5 = vmax.f32 %v2667_v7, %v2668_v51  ;;  %v2688_v25 = vmax.f32 %v2686_v8, %v2687_v54  ;;  %v2700_v10 = vmax.f32 %v2698_v3, %v2699_v29  ;;  %v2706_v28 = vrot.slane %v2705_v39, 4 }
 0x1ea   : > { %v5360_v13 = vmax.f32 %v2674_v14, %v2675_v35  ;;  %v2682_v30 = vrot.slane %v2681_v50, 1  ;;  %v2694_v11 = vrot.slane %v2693_v60, 2  ;;  %v2712_v47 = vsel %vm2235_vm9, %v2228_v59, -inf }
 0x1eb   : > { %v2689_v4 = vrot.slane %v2688_v25, 1  ;;  %v2701_v15 = vrot.slane %v2700_v10, 2  ;;  %v2707_v31 = vmax.f32 %v2705_v39, %v2706_v28  ;;  %v2713_v42 = vrot.slane %v2712_v47, 4 }
 0x1ec   : > { %v5364_v21 = vmax.f32 %v2681_v50, %v2682_v30  ;;  %v2695_v34 = vmax.f32 %v2693_v60, %v2694_v11  ;;  %v2719_v40 = vsel %vm2235_vm9, %v2229_v22, -inf  ;;  %v2726_v62 = vsel %vm2235_vm9, %v2230_v52, -inf }
 0x1ed   : > { %v5369_v18 = vmax.f32 %v2688_v25, %v2689_v4  ;;  %v2702_v9 = vmax.f32 %v2700_v10, %v2701_v15  ;;  %v2708_v16 = vrot.slane %v2707_v31, 2  ;;  %v2714_v44 = vmax.f32 %v2712_v47, %v2713_v42 }
 0x1ee   : > { %v2696_v61 = vrot.slane %v2695_v34, 1  ;;  %v2720_v20 = vrot.slane %v2719_v40, 4  ;;  %v2727_v46 = vrot.slane %v2726_v62, 4  ;;  %v2733_v24 = vsel %vm2235_vm9, %v2231_v23, -inf }
 0x1ef   : > { %v2703_v36 = vrot.slane %v2702_v9, 1  ;;  %v2709_v56 = vmax.f32 %v2707_v31, %v2708_v16  ;;  %v2715_v26 = vrot.slane %v2714_v44, 2  ;;  %v2734_v1 = vrot.slane %v2733_v24, 4 }
 0x1f0   : > { %v2697_v45 = vmax.f32 %v2695_v34, %v2696_v61  ;;  %v2721_v27 = vmax.f32 %v2719_v40, %v2720_v20  ;;  %v2728_v57 = vmax.f32 %v2726_v62, %v2727_v46  ;;  %v2740_v12 = vsel %vm2235_vm9, %v2232_v63, -inf }
 0x1f1   : > { %v2704_v58 = vmax.f32 %v2702_v9, %v2703_v36  ;;  %v2710_v32 = vrot.slane %v2709_v56, 1  ;;  %v2716_v0 = vmax.f32 %v2714_v44, %v2715_v26  ;;  %v2735_v38 = vmax.f32 %v2733_v24, %v2734_v1 }
 0x1f2   : > { %v2722_v37 = vrot.slane %v2721_v27, 2  ;;  %v2729_v17 = vrot.slane %v2728_v57, 2  ;;  %v2741_v41 = vrot.slane %v2740_v12, 4  ;;  %v2747_v55 = vsel %vm2235_vm9, %v2233_v43, -inf }
 0x1f3   : > { %v2711_v6 = vmax.f32 %v2709_v56, %v2710_v32  ;;  %v2717_v19 = vrot.slane %v2716_v0, 1  ;;  %v2736_v7 = vrot.slane %v2735_v38, 2  ;;  %v2748_v8 = vrot.slane %v2747_v55, 4 }
 0x1f4   : > { %v2723_v14 = vmax.f32 %v2721_v27, %v2722_v37  ;;  %v2730_v48 = vmax.f32 %v2728_v57, %v2729_v17  ;;  %v2742_v2 = vmax.f32 %v2740_v12, %v2741_v41  ;;  %v2754_v3 = vsel %vm2235_vm9, %v2234_v33, -inf  ;;  %v4179_v33 = vld [vmem:[#allocation2] ss:$0 sm:$0xff] }
 0x1f5   : > { %v2718_v59 = vmax.f32 %v2716_v0, %v2717_v19  ;;  %v2737_v51 = vmax.f32 %v2735_v38, %v2736_v7  ;;  %v2749_v54 = vmax.f32 %v2747_v55, %v2748_v8  ;;  %v2755_v29 = vrot.slane %v2754_v3, 4  ;;  %v3200_v55 = vld [vmem:[%s5391_s21 + $0x8] sm:$0xf] }
 0x1f6   : > { %v2724_v35 = vrot.slane %v2723_v14, 1  ;;  %v2731_v50 = vrot.slane %v2730_v48, 1  ;;  %v2743_v60 = vrot.slane %v2742_v2, 2  ;;  %v2861_v39 = vsel %vm1456_vm1, %v5353_v49, -inf }
 0x1f7   : > { %v2738_v22 = vrot.slane %v2737_v51, 1  ;;  %v2750_v52 = vrot.slane %v2749_v54, 2  ;;  %v2756_v25 = vmax.f32 %v2754_v3, %v2755_v29  ;;  %v2862_v10 = vsel %vm1456_vm1, %v2697_v45, -inf  ;;  %v3199_v45 = vld [vmem:[%s5391_s21 + $0x4] sm:$0xf] }
 0x1f8   : > { %v2725_v28 = vmax.f32 %v2723_v14, %v2724_v35  ;;  %v2732_v30 = vmax.f32 %v2730_v48, %v2731_v50  ;;  %v2744_v11 = vmax.f32 %v2742_v2, %v2743_v60  ;;  %v2863_v47 = vmax.f32 %v2861_v39, %v2862_v10  ;;  %v3202_v3 = vld [vmem:[%s5391_s21 + $0x10] sm:$0xf] }
 0x1f9   : > { %v2739_v23 = vmax.f32 %v2737_v51, %v2738_v22  ;;  %v2751_v4 = vmax.f32 %v2749_v54, %v2750_v52  ;;  %v2757_v15 = vrot.slane %v2756_v25, 2  ;;  %v2866_v31 = vsel %vm1456_vm1, %v5358_v5, -inf  ;;  %v3203_v22 = vld [vmem:[%s5391_s21 + $0x14] sm:$0xf] }
 0x1fa   : > { %v2745_v42 = vrot.slane %v2744_v11, 1  ;;  %v2864_v34 = vsel %vm1456_vm1, %v2732_v30, -inf  ;;  %v2867_v49 = vsel %vm1456_vm1, %v2704_v58, -inf  ;;  %v2871_v40 = vsel %vm1456_vm1, %v5360_v13, -inf  ;;  %v3198_v58 = vld [vmem:[%s5391_s21] sm:$0xf] }
 0x1fb   : > { %v2752_v62 = vrot.slane %v2751_v4, 1  ;;  %v2758_v63 = vmax.f32 %v2756_v25, %v2757_v15  ;;  %v2865_v9 = vmax.f32 %v2863_v47, %v2864_v34  ;;  %v2868_v16 = vmax.f32 %v2866_v31, %v2867_v49  ;;  %v3204_v47 = vld [vmem:[%s5391_s21 + $0x18] sm:$0xf] }
 0x1fc   : > { %v2746_v5 = vmax.f32 %v2744_v11, %v2745_v42  ;;  %v2869_v44 = vsel %vm1456_vm1, %v2739_v23, -inf  ;;  %v2872_v61 = vsel %vm1456_vm1, %v2711_v6, -inf  ;;  %v2876_v13 = vsel %vm1456_vm1, %v5364_v21, -inf  ;;  %v3201_v6 = vld [vmem:[%s5391_s21 + $0xc] sm:$0xf] }
 0x1fd   : > { %v2753_v20 = vmax.f32 %v2751_v4, %v2752_v62  ;;  %v2759_v46 = vrot.slane %v2758_v63, 1  ;;  %v2870_v24 = vmax.f32 %v2868_v16, %v2869_v44  ;;  %v2873_v43 = vmax.f32 %v2871_v40, %v2872_v61  ;;  %v3205_v62 = vld [vmem:[%s5391_s21 + $0x1c] sm:$0xf] }
 0x1fe   : > { %v2874_v36 = vsel %vm1456_vm1, %v2746_v5, -inf  ;;  %v2877_v56 = vsel %vm1456_vm1, %v2718_v59, -inf  ;;  %v2881_v26 = vsel %vm1456_vm1, %v5369_v18, -inf  ;;  %v2882_v1 = vsel %vm1456_vm1, %v2725_v28, -inf }
 0x1ff   : > { %v2760_v27 = vmax.f32 %v2758_v63, %v2759_v46  ;;  %v2875_v57 = vmax.f32 %v2873_v43, %v2874_v36  ;;  %v2878_v12 = vmax.f32 %v2876_v13, %v2877_v56  ;;  %v2879_v21 = vsel %vm1456_vm1, %v2753_v20, -inf  ;;  %v3206_v36 = vld [vmem:[%s5391_s21 + $0x20] sm:$0xf]  ;;  %v3207_v56 = vld [vmem:[%s5391_s21 + $0x24] sm:$0xf] }
 0x200   : > { %v2883_v32 = vmax.f32 %v2881_v26, %v2882_v1  ;;  %v2906_v0 = vmul.f32 %v5187_v53, %v2865_v9  ;;  %v2907_v38 = vmul.f32 %v5187_v53, %v2870_v24  ;;  %v4273_v41 = vmov 0  }
 0x201   : > { %v2880_v37 = vmax.f32 %v2878_v12, %v2879_v21  ;;  %v2884_v18 = vsel %vm1456_vm1, %v2760_v27, -inf  ;;  %v2908_v17 = vmul.f32 %v5187_v53, %v2875_v57  ;;  %4259 = vset.pattern.permute.xlu0 %v4273_v41  ;;  %v3263_v8 = vsel %vm3262_vm11, %v3198_v58, -inf  ;;  %v3208_v58 = vld [vmem:[%s5391_s21 + $0x28] sm:$0xf] }
 0x202   : > { %v2885_v19 = vmax.f32 %v2883_v32, %v2884_v18  ;;  %v2968_v7 = vrot.slane %v2907_v38, 7  ;;  %1940 = vperm.xlu0 %4259, %v4179_v33   ;;  %v3270_v14 = vsel %vm3262_vm11, %v3199_v45, -inf  ;;  %v3264_v59 = vrot.slane %v3263_v8, 4  ;;  %v3209_v18 = vld [vmem:[%s5391_s21 + $0x2c] sm:$0xf] }
 0x203   : > { %v2909_v48 = vmul.f32 %v5187_v53, %v2880_v37  ;;  %v2970_v2 = vrot.slane %v2908_v17, 6  ;;  %v3271_v51 = vrot.slane %v3270_v14, 4  ;;  %v3277_v35 = vsel %vm3262_vm11, %v3200_v55, -inf }
 0x204   : > { %v2910_v54 = vmul.f32 %v5187_v53, %v2885_v19  ;;  %v2969_v29 = vsel %vm1784_vm2, %v2968_v7, %v2906_v0  ;;  %v3284_v50 = vsel %vm3262_vm11, %v3201_v6, -inf  ;;  %v3265_v52 = vmax.f32 %v3263_v8, %v3264_v59 }
 0x205   : > { %v2971_v60 = vsel %vm1787_vm3, %v2970_v2, %v2969_v29  ;;  %v2972_v39 = vrot.slane %v2909_v48, 5  ;;  %v3272_v25 = vmax.f32 %v3270_v14, %v3271_v51  ;;  %v3278_v28 = vrot.slane %v3277_v35, 4  ;;  %v3210_v48 = vld [vmem:[%s5391_s21 + $0x30] sm:$0xf] }
 0x206   : > { %v2974_v10 = vrot.slane %v2910_v54, 4  ;;  %v3285_v30 = vrot.slane %v3284_v50, 4  ;;  %v3291_v11 = vsel %vm3262_vm11, %v3202_v3, -inf  ;;  %v3266_v23 = vrot.slane %v3265_v52, 2 }
 0x207   : > { %v2973_v53 = vsel %vm1790_vm4, %v2972_v39, %v2971_v60  ;;  %v3273_v4 = vrot.slane %v3272_v25, 2  ;;  %v3292_v15 = vrot.slane %v3291_v11, 4  ;;  %v3279_v42 = vmax.f32 %v3277_v35, %v3278_v28  ;;  %v3211_v60 = vld [vmem:[%s5391_s21 + $0x34] sm:$0xf] }
 0x208   : > { %v2975_v31 = vsel %vm1793_vm5, %v2974_v10, %v2973_v53  ;;  %v3286_v34 = vmax.f32 %v3284_v50, %v3285_v30  ;;  %v3298_v49 = vsel %vm3262_vm11, %v3203_v22, -inf  ;;  %v3267_v63 = vmax.f32 %v3265_v52, %v3266_v23  ;;  %v3212_v53 = vld [vmem:[%s5391_s21 + $0x38] sm:$0xf] }
 0x209   : > { %v2994_v40 = vsel %vm2981_vm10, %v2975_v31, 0.0  ;;  %v3274_v9 = vmax.f32 %v3272_v25, %v3273_v4  ;;  %v3293_v16 = vmax.f32 %v3291_v11, %v3292_v15  ;;  %v3280_v5 = vrot.slane %v3279_v42, 2 }
 0x20a   : > { %2995 = vadd.xlane.f32.xlu1 %v2994_v40  ;;  %v3287_v44 = vrot.slane %v3286_v34, 2  ;;  %v3299_v61 = vrot.slane %v3298_v49, 4  ;;  %v3305_v13 = vsel %vm3262_vm11, %v3204_v47, -inf  ;;  %v3268_v20 = vrot.slane %v3267_v63, 1  ;;  %v3213_v40 = vld [vmem:[%s5391_s21 + $0x3c] sm:$0xf] }
 0x20b   : > { %v3275_v46 = vrot.slane %v3274_v9, 1  ;;  %v3294_v24 = vrot.slane %v3293_v16, 2  ;;  %v3306_v43 = vrot.slane %v3305_v13, 4  ;;  %v3281_v26 = vmax.f32 %v3279_v42, %v3280_v5 }
 0x20c   : > { %v3288_v1 = vmax.f32 %v3286_v34, %v3287_v44  ;;  %v3300_v45 = vmax.f32 %v3298_v49, %v3299_v61  ;;  %v3312_v27 = vsel %vm3262_vm11, %v3205_v62, -inf  ;;  %v5432_v57 = vmax.f32 %v3267_v63, %v3268_v20 }
 0x20d   : > { %v5434_v12 = vmax.f32 %v3274_v9, %v3275_v46  ;;  %v3295_v21 = vmax.f32 %v3293_v16, %v3294_v24  ;;  %v3307_v33 = vmax.f32 %v3305_v13, %v3306_v43  ;;  %v3282_v32 = vrot.slane %v3281_v26, 1 }
 0x20e   : > { %v3289_v0 = vrot.slane %v3288_v1, 1  ;;  %v3301_v38 = vrot.slane %v3300_v45, 2  ;;  %v3313_v37 = vrot.slane %v3312_v27, 4  ;;  %v3319_v55 = vsel %vm3262_vm11, %v3206_v36, -inf }
 0x20f   : > { %v3296_v17 = vrot.slane %v3295_v21, 1  ;;  %v3308_v41 = vrot.slane %v3307_v33, 2  ;;  %v3326_v6 = vsel %vm3262_vm11, %v3207_v56, -inf  ;;  %v5440_v19 = vmax.f32 %v3281_v26, %v3282_v32 }
 0x210   : > { %v5442_v7 = vmax.f32 %v3288_v1, %v3289_v0  ;;  %v3302_v8 = vmax.f32 %v3300_v45, %v3301_v38  ;;  %v3314_v14 = vmax.f32 %v3312_v27, %v3313_v37  ;;  %v3320_v59 = vrot.slane %v3319_v55, 4 }
 0x211   : > { %v3297_v2 = vmax.f32 %v3295_v21, %v3296_v17  ;;  %v3309_v3 = vmax.f32 %v3307_v33, %v3308_v41  ;;  %v3327_v51 = vrot.slane %v3326_v6, 4  ;;  %v3333_v35 = vsel %vm3262_vm11, %v3208_v58, -inf }
 0x212   : > { %v3303_v54 = vrot.slane %v3302_v8, 1  ;;  %v3315_v29 = vrot.slane %v3314_v14, 2  ;;  %v3340_v50 = vsel %vm3262_vm11, %v3209_v18, -inf  ;;  %v3321_v22 = vmax.f32 %v3319_v55, %v3320_v59 }
 0x213   : > { %v3310_v39 = vrot.slane %v3309_v3, 1  ;;  %v3328_v52 = vmax.f32 %v3326_v6, %v3327_v51  ;;  %v3334_v25 = vrot.slane %v3333_v35, 4  ;;  %v3341_v30 = vrot.slane %v3340_v50, 4 }
 0x214   : > { %v3304_v10 = vmax.f32 %v3302_v8, %v3303_v54  ;;  %v3316_v28 = vmax.f32 %v3314_v14, %v3315_v29  ;;  %v3347_v11 = vsel %vm3262_vm11, %v3210_v48, -inf  ;;  %v3322_v23 = vrot.slane %v3321_v22, 2 }
 0x215   : > { %v3311_v47 = vmax.f32 %v3309_v3, %v3310_v39  ;;  %v3329_v4 = vrot.slane %v3328_v52, 2  ;;  %v3335_v15 = vmax.f32 %v3333_v35, %v3334_v25  ;;  %v3342_v42 = vmax.f32 %v3340_v50, %v3341_v30 }
 0x216   : > { %v3317_v31 = vrot.slane %v3316_v28, 1  ;;  %v3348_v34 = vrot.slane %v3347_v11, 4  ;;  %v3354_v49 = vsel %vm3262_vm11, %v3211_v60, -inf  ;;  %v3323_v62 = vmax.f32 %v3321_v22, %v3322_v23 }
 0x217   : > { %v3330_v63 = vmax.f32 %v3328_v52, %v3329_v4  ;;  %v3336_v9 = vrot.slane %v3335_v15, 2  ;;  %v3355_v16 = vrot.slane %v3354_v49, 4  ;;  %v3343_v44 = vrot.slane %v3342_v42, 2 }
 0x218   : > { %v3318_v5 = vmax.f32 %v3316_v28, %v3317_v31  ;;  %v3349_v61 = vmax.f32 %v3347_v11, %v3348_v34  ;;  %v3361_v13 = vsel %vm3262_vm11, %v3212_v53, -inf  ;;  %v3324_v20 = vrot.slane %v3323_v62, 1  ;;  %v3214_v31 = vld [vmem:[%s5391_s21 + $0x40] sm:$0xf] }
 0x219   : > { %v3331_v46 = vrot.slane %v3330_v63, 1  ;;  %v3337_v24 = vmax.f32 %v3335_v15, %v3336_v9  ;;  %v3356_v43 = vmax.f32 %v3354_v49, %v3355_v16  ;;  %v3344_v36 = vmax.f32 %v3342_v42, %v3343_v44  ;;  %v3215_v42 = vld [vmem:[%s5391_s21 + $0x44] sm:$0xf]  ;;  %v3216_v16 = vld [vmem:[%s5391_s21 + $0x48] sm:$0xf] }
 0x21a   : > { %v3350_v56 = vrot.slane %v3349_v61, 2  ;;  %v3362_v26 = vrot.slane %v3361_v13, 4  ;;  %v3368_v1 = vsel %vm3262_vm11, %v3213_v40, -inf  ;;  %v3325_v45 = vmax.f32 %v3323_v62, %v3324_v20  ;;  %v3217_v44 = vld [vmem:[%s5391_s21 + $0x4c] sm:$0xf] }
 0x21b   : > { %v3332_v27 = vmax.f32 %v3330_v63, %v3331_v46  ;;  %v3338_v21 = vrot.slane %v3337_v24, 1  ;;  %v3357_v33 = vrot.slane %v3356_v43, 2  ;;  %v3345_v58 = vrot.slane %v3344_v36, 1 }
 0x21c   : > { %v3351_v32 = vmax.f32 %v3349_v61, %v3350_v56  ;;  %v3363_v0 = vmax.f32 %v3361_v13, %v3362_v26  ;;  %v3369_v38 = vrot.slane %v3368_v1, 4  ;;  %v3711_v17 = vsel %vm1456_vm1, %v5432_v57, -inf  ;;  %v5480_v61 = vld [vmem:[%s5825_s3] ss:$0 sm:$0xff] }
 0x21d   : > { %v3339_v37 = vmax.f32 %v3337_v24, %v3338_v21  ;;  %v3358_v18 = vmax.f32 %v3356_v43, %v3357_v33  ;;  %v3712_v41 = vsel %vm1456_vm1, %v3297_v2, -inf  ;;  %v3346_v55 = vmax.f32 %v3344_v36, %v3345_v58  ;;  %v3218_v36 = vld [vmem:[%s5391_s21 + $0x50] sm:$0xf]  ;;  %v3219_v58 = vld [vmem:[%s5391_s21 + $0x54] sm:$0xf] }
 0x21e   : > { %v3352_v6 = vrot.slane %v3351_v32, 1  ;;  %v3364_v8 = vrot.slane %v3363_v0, 2  ;;  %v3370_v14 = vmax.f32 %v3368_v1, %v3369_v38  ;;  %v3713_v3 = vmax.f32 %v3711_v17, %v3712_v41 }
 0x21f   : > { %v3359_v48 = vrot.slane %v3358_v18, 1  ;;  %v3714_v59 = vsel %vm1456_vm1, %v3325_v45, -inf  ;;  %v3718_v51 = vsel %vm1456_vm1, %v5434_v12, -inf  ;;  %v3719_v50 = vsel %vm1456_vm1, %v3304_v10, -inf }
 0x220   : > { %v3353_v54 = vmax.f32 %v3351_v32, %v3352_v6  ;;  %v3365_v29 = vmax.f32 %v3363_v0, %v3364_v8  ;;  %v3371_v35 = vrot.slane %v3370_v14, 2  ;;  %v3715_v57 = vmax.f32 %v3713_v3, %v3714_v59 }
 0x221   : > { %v3360_v60 = vmax.f32 %v3358_v18, %v3359_v48  ;;  %v3720_v2 = vmax.f32 %v3718_v51, %v3719_v50  ;;  %v3721_v39 = vsel %vm1456_vm1, %v3332_v27, -inf  ;;  %v3725_v28 = vsel %vm1456_vm1, %v5440_v19, -inf }
 0x222   : > { %v3366_v22 = vrot.slane %v3365_v29, 1  ;;  %v3372_v52 = vmax.f32 %v3370_v14, %v3371_v35  ;;  %v3716_v25 = vsel %vm1456_vm1, %v3353_v54, -inf  ;;  %v3726_v10 = vsel %vm1456_vm1, %v3311_v47, -inf  ;;  %v3220_v14 = vld [vmem:[%s5391_s21 + $0x58] sm:$0xf] }
 0x223   : > { %v3717_v12 = vmax.f32 %v3715_v57, %v3716_v25  ;;  %v3722_v30 = vmax.f32 %v3720_v2, %v3721_v39  ;;  %v3723_v11 = vsel %vm1456_vm1, %v3360_v60, -inf  ;;  %v3727_v4 = vmax.f32 %v3725_v28, %v3726_v10 }
 0x224   : > { %v3367_v53 = vmax.f32 %v3365_v29, %v3366_v22  ;;  %v3373_v23 = vrot.slane %v3372_v52, 1  ;;  %v3728_v15 = vsel %vm1456_vm1, %v3339_v37, -inf  ;;  %v3732_v49 = vsel %vm1456_vm1, %v5442_v7, -inf }
 0x225   : > { %v3724_v34 = vmax.f32 %v3722_v30, %v3723_v11  ;;  %v3733_v19 = vsel %vm1456_vm1, %v3318_v5, -inf  ;;  %v3735_v40 = vsel %vm1456_vm1, %v3346_v55, -inf  ;;  %v3729_v63 = vmax.f32 %v3727_v4, %v3728_v15  ;;  %v3223_v4 = vld [vmem:[%s5391_s21 + $0x64] sm:$0xf] }
 0x226   : > { %v3374_v62 = vmax.f32 %v3372_v52, %v3373_v23  ;;  %v3730_v47 = vsel %vm1456_vm1, %v3367_v53, -inf  ;;  %v3734_v9 = vmax.f32 %v3732_v49, %v3733_v19  ;;  %v3823_v7 = vmul.f32 %v5480_v61, %v3717_v12  ;;  %v3221_v52 = vld [vmem:[%s5391_s21 + $0x5c] sm:$0xf]  ;;  %v3222_v23 = vld [vmem:[%s5391_s21 + $0x60] sm:$0xf] }
 0x227   : > { %v3824_v5 = vmul.f32 %v5480_v61, %v3724_v34  ;;  %v3375_v13 = vsel %vm3262_vm11, %v3214_v31, -inf  ;;  %v3382_v20 = vsel %vm3262_vm11, %v3215_v42, -inf  ;;  %v3731_v46 = vmax.f32 %v3729_v63, %v3730_v47  ;;  %v3224_v63 = vld [vmem:[%s5391_s21 + $0x68] sm:$0xf]  ;;  %v3225_v47 = vld [vmem:[%s5391_s21 + $0x6c] sm:$0xf] }
 0x228   : > { %v3736_v24 = vmax.f32 %v3734_v9, %v3735_v40  ;;  %v3737_v43 = vsel %vm1456_vm1, %v3374_v62, -inf  ;;  %v3376_v56 = vrot.slane %v3375_v13, 4  ;;  %v3383_v1 = vrot.slane %v3382_v20, 4 }
 0x229   : > { %v3855_v26 = vrot.slane %v3824_v5, 7  ;;  %v3389_v45 = vsel %vm3262_vm11, %v3216_v16, -inf  ;;  %v3396_v27 = vsel %vm3262_vm11, %v3217_v44, -inf  ;;  %v3825_v33 = vmul.f32 %v5480_v61, %v3731_v46 }
 0x22a   : > { %v3738_v21 = vmax.f32 %v3736_v24, %v3737_v43  ;;  %v3377_v32 = vmax.f32 %v3375_v13, %v3376_v56  ;;  %v3390_v0 = vrot.slane %v3389_v45, 4  ;;  %v3384_v37 = vmax.f32 %v3382_v20, %v3383_v1  ;;  %v3226_v24 = vld [vmem:[%s5391_s21 + $0x70] sm:$0xf] }
 0x22b   : > { %v3856_v38 = vsel %vm1784_vm2, %v3855_v26, %v3823_v7  ;;  %v3397_v18 = vrot.slane %v3396_v27, 4  ;;  %v3403_v17 = vsel %vm3262_vm11, %v3218_v36, -inf  ;;  %v3857_v55 = vrot.slane %v3825_v33, 6 }
 0x22c   : > { %v3826_v41 = vmul.f32 %v5480_v61, %v3738_v21  ;;  %v3378_v6 = vrot.slane %v3377_v32, 2  ;;  %v3391_v8 = vmax.f32 %v3389_v45, %v3390_v0  ;;  %v3385_v48 = vrot.slane %v3384_v37, 2 }
 0x22d   : > { %v3398_v3 = vmax.f32 %v3396_v27, %v3397_v18  ;;  %v3404_v59 = vrot.slane %v3403_v17, 4  ;;  %v3410_v51 = vsel %vm3262_vm11, %v3219_v58, -inf  ;;  %v3858_v54 = vsel %vm1787_vm3, %v3857_v55, %v3856_v38  ;;  %v3227_v38 = vld [vmem:[%s5391_s21 + $0x74] sm:$0xf] }
 0x22e   : > { %v3859_v29 = vrot.slane %v3826_v41, 5  ;;  %v3379_v35 = vmax.f32 %v3377_v32, %v3378_v6  ;;  %v3392_v50 = vrot.slane %v3391_v8, 2  ;;  %v3386_v60 = vmax.f32 %v3384_v37, %v3385_v48  ;;  %v3228_v48 = vld [vmem:[%s5391_s21 + $0x78] sm:$0xf] }
 0x22f   : > { %v3399_v57 = vrot.slane %v3398_v3, 2  ;;  %v3405_v2 = vmax.f32 %v3403_v17, %v3404_v59  ;;  %v3411_v39 = vrot.slane %v3410_v51, 4  ;;  %v3417_v12 = vsel %vm3262_vm11, %v3220_v14, -inf }
 0x230   : > { %v3860_v22 = vsel %vm1790_vm4, %v3859_v29, %v3858_v54  ;;  %v3380_v25 = vrot.slane %v3379_v35, 1  ;;  %v3393_v28 = vmax.f32 %v3391_v8, %v3392_v50  ;;  %v3387_v11 = vrot.slane %v3386_v60, 1 }
 0x231   : > { %v3883_v30 = vsel %vm3262_vm11, %v3860_v22, 0.0  ;;  %v3400_v10 = vmax.f32 %v3398_v3, %v3399_v57  ;;  %v3406_v53 = vrot.slane %v3405_v2, 2  ;;  %v3412_v42 = vmax.f32 %v3410_v51, %v3411_v39  ;;  %v3229_v57 = vld [vmem:[%s5391_s21 + $0x7c] sm:$0xf] }
 0x232   : > { %3884 = vadd.xlane.f32.xlu1 %v3883_v30  ;;  %v5504_v15 = vmax.f32 %v3379_v35, %v3380_v25  ;;  %v3394_v31 = vrot.slane %v3393_v28, 1  ;;  %v3418_v34 = vrot.slane %v3417_v12, 4  ;;  %v5506_v49 = vmax.f32 %v3386_v60, %v3387_v11 }
 0x233   : > { %v3401_v19 = vrot.slane %v3400_v10, 1  ;;  %v3407_v40 = vmax.f32 %v3405_v2, %v3406_v53  ;;  %v3424_v62 = vsel %vm3262_vm11, %v3221_v52, -inf  ;;  %v3413_v16 = vrot.slane %v3412_v42, 2 }
 0x234   : > { %v5511_v9 = vmax.f32 %v3393_v28, %v3394_v31  ;;  %v3419_v44 = vmax.f32 %v3417_v12, %v3418_v34  ;;  %v3425_v7 = vrot.slane %v3424_v62, 4  ;;  %v3431_v20 = vsel %vm3262_vm11, %v3222_v23, -inf }
 0x235   : > { %v5513_v5 = vmax.f32 %v3400_v10, %v3401_v19  ;;  %v3408_v13 = vrot.slane %v3407_v40, 1  ;;  %v3438_v46 = vsel %vm3262_vm11, %v3223_v4, -inf  ;;  %v3414_v43 = vmax.f32 %v3412_v42, %v3413_v16 }
 0x236   : > { %v3420_v36 = vrot.slane %v3419_v44, 2  ;;  %v3426_v56 = vmax.f32 %v3424_v62, %v3425_v7  ;;  %v3432_v26 = vrot.slane %v3431_v20, 4  ;;  %v3439_v45 = vrot.slane %v3438_v46, 4 }
 0x237   : > { %v3409_v1 = vmax.f32 %v3407_v40, %v3408_v13  ;;  %v3445_v27 = vsel %vm3262_vm11, %v3224_v63, -inf  ;;  %v3452_v21 = vsel %vm3262_vm11, %v3225_v47, -inf  ;;  %v3415_v33 = vrot.slane %v3414_v43, 1 }
 0x238   : > { %v3421_v58 = vmax.f32 %v3419_v44, %v3420_v36  ;;  %v3427_v32 = vrot.slane %v3426_v56, 2  ;;  %v3433_v0 = vmax.f32 %v3431_v20, %v3432_v26  ;;  %v3440_v37 = vmax.f32 %v3438_v46, %v3439_v45 }
 0x239   : > { %v3446_v18 = vrot.slane %v3445_v27, 4  ;;  %v3453_v17 = vrot.slane %v3452_v21, 4  ;;  %v3459_v41 = vsel %vm3262_vm11, %v3226_v24, -inf  ;;  %v3416_v55 = vmax.f32 %v3414_v43, %v3415_v33 }
 0x23a   : > { %v3422_v6 = vrot.slane %v3421_v58, 1  ;;  %v3428_v8 = vmax.f32 %v3426_v56, %v3427_v32  ;;  %v3434_v14 = vrot.slane %v3433_v0, 2  ;;  %v3441_v3 = vrot.slane %v3440_v37, 2 }
 0x23b   : > { %v3447_v59 = vmax.f32 %v3445_v27, %v3446_v18  ;;  %v3454_v51 = vmax.f32 %v3452_v21, %v3453_v17  ;;  %v3460_v54 = vrot.slane %v3459_v41, 4  ;;  %v3466_v60 = vsel %vm3262_vm11, %v3227_v38, -inf }
 0x23c   : > { %v3423_v29 = vmax.f32 %v3421_v58, %v3422_v6  ;;  %v3429_v35 = vrot.slane %v3428_v8, 1  ;;  %v3435_v50 = vmax.f32 %v3433_v0, %v3434_v14  ;;  %v3442_v2 = vmax.f32 %v3440_v37, %v3441_v3  ;;  %v3231_v3 = vld [vmem:[%s5391_s21 + $0x84] sm:$0xf] }
 0x23d   : > { %v3448_v39 = vrot.slane %v3447_v59, 2  ;;  %v3455_v22 = vrot.slane %v3454_v51, 2  ;;  %v3461_v52 = vmax.f32 %v3459_v41, %v3460_v54  ;;  %v3467_v12 = vrot.slane %v3466_v60, 4 }
 0x23e   : > { %v3430_v25 = vmax.f32 %v3428_v8, %v3429_v35  ;;  %v3436_v28 = vrot.slane %v3435_v50, 1  ;;  %v3473_v30 = vsel %vm3262_vm11, %v3228_v48, -inf  ;;  %v3443_v11 = vrot.slane %v3442_v2, 1 }
 0x23f   : > { %v3449_v10 = vmax.f32 %v3447_v59, %v3448_v39  ;;  %v3456_v53 = vmax.f32 %v3454_v51, %v3455_v22  ;;  %v3462_v23 = vrot.slane %v3461_v52, 2  ;;  %v3468_v31 = vmax.f32 %v3466_v60, %v3467_v12 }
 0x240   : > { %v3437_v4 = vmax.f32 %v3435_v50, %v3436_v28  ;;  %v3474_v42 = vrot.slane %v3473_v30, 4  ;;  %v3480_v34 = vsel %vm3262_vm11, %v3229_v57, -inf  ;;  %v3444_v19 = vmax.f32 %v3442_v2, %v3443_v11  ;;  %v3232_v50 = vld [vmem:[%s5391_s21 + $0x88] sm:$0xf]  ;;  %v3233_v28 = vld [vmem:[%s5391_s21 + $0x8c] sm:$0xf] }
 0x241   : > { %v3450_v40 = vrot.slane %v3449_v10, 1  ;;  %v3457_v62 = vrot.slane %v3456_v53, 1  ;;  %v3463_v63 = vmax.f32 %v3461_v52, %v3462_v23  ;;  %v3469_v47 = vrot.slane %v3468_v31, 2 }
 0x242   : > { %v3475_v16 = vmax.f32 %v3473_v30, %v3474_v42  ;;  %v3481_v44 = vrot.slane %v3480_v34, 4  ;;  %v3739_v7 = vsel %vm1456_vm1, %v5504_v15, -inf  ;;  %v3740_v24 = vsel %vm1456_vm1, %v3409_v1, -inf }
 0x243   : > { %v3451_v13 = vmax.f32 %v3449_v10, %v3450_v40  ;;  %v3458_v20 = vmax.f32 %v3456_v53, %v3457_v62  ;;  %v3464_v46 = vrot.slane %v3463_v63, 1  ;;  %v3470_v43 = vmax.f32 %v3468_v31, %v3469_v47  ;;  %v3235_v47 = vld [vmem:[%s5391_s21 + $0x94] sm:$0xf] }
 0x244   : > { %v3476_v36 = vrot.slane %v3475_v16, 2  ;;  %v3482_v56 = vmax.f32 %v3480_v34, %v3481_v44  ;;  %v3741_v26 = vmax.f32 %v3739_v7, %v3740_v24  ;;  %v3742_v27 = vsel %vm1456_vm1, %v3437_v4, -inf  ;;  %v3234_v4 = vld [vmem:[%s5391_s21 + $0x90] sm:$0xf] }
 0x245   : > { %v3465_v45 = vmax.f32 %v3463_v63, %v3464_v46  ;;  %v3746_v21 = vsel %vm1456_vm1, %v5506_v49, -inf  ;;  %v3747_v33 = vsel %vm1456_vm1, %v3416_v55, -inf  ;;  %v3471_v58 = vrot.slane %v3470_v43, 1 }
 0x246   : > { %v3477_v15 = vmax.f32 %v3475_v16, %v3476_v36  ;;  %v3483_v32 = vrot.slane %v3482_v56, 2  ;;  %v3743_v0 = vmax.f32 %v3741_v26, %v3742_v27  ;;  %v3748_v1 = vmax.f32 %v3746_v21, %v3747_v33  ;;  %v3236_v26 = vld [vmem:[%s5391_s21 + $0x98] sm:$0xf] }
 0x247   : > { %v3744_v38 = vsel %vm1456_vm1, %v3465_v45, -inf  ;;  %v3749_v37 = vsel %vm1456_vm1, %v3444_v19, -inf  ;;  %v3753_v18 = vsel %vm1456_vm1, %v5511_v9, -inf  ;;  %v3472_v17 = vmax.f32 %v3470_v43, %v3471_v58  ;;  %v3230_v9 = vld [vmem:[%s5391_s21 + $0x80] sm:$0xf] }
 0x248   : > { %v3478_v41 = vrot.slane %v3477_v15, 1  ;;  %v3484_v49 = vmax.f32 %v3482_v56, %v3483_v32  ;;  %v3745_v6 = vmax.f32 %v3743_v0, %v3744_v38  ;;  %v3750_v55 = vmax.f32 %v3748_v1, %v3749_v37 }
 0x249   : > { %v3754_v8 = vsel %vm1456_vm1, %v3423_v29, -inf  ;;  %v3756_v14 = vsel %vm1456_vm1, %v3451_v13, -inf  ;;  %v3760_v48 = vsel %vm1456_vm1, %v5513_v5, -inf  ;;  %v3751_v54 = vsel %vm1456_vm1, %v3472_v17, -inf }
 0x24a   : > { %v3479_v59 = vmax.f32 %v3477_v15, %v3478_v41  ;;  %v3485_v51 = vrot.slane %v3484_v49, 1  ;;  %v3755_v35 = vmax.f32 %v3753_v18, %v3754_v8  ;;  %v3752_v60 = vmax.f32 %v3750_v55, %v3751_v54  ;;  %v3237_v41 = vld [vmem:[%s5391_s21 + $0x9c] sm:$0xf]  ;;  %v3240_v54 = vld [vmem:[%s5391_s21 + $0xa8] sm:$0xf] }
 0x24b   : > { %v3761_v57 = vsel %vm1456_vm1, %v3430_v25, -inf  ;;  %v3763_v29 = vsel %vm1456_vm1, %v3458_v20, -inf  ;;  %v3827_v2 = vmul.f32 %v5480_v61, %v3745_v6  ;;  %v3487_v30 = vsel %vm3262_vm11, %v3230_v9, -inf }
 0x24c   : > { %v3486_v39 = vmax.f32 %v3484_v49, %v3485_v51  ;;  %v3757_v22 = vmax.f32 %v3755_v35, %v3756_v14  ;;  %v3758_v5 = vsel %vm1456_vm1, %v3479_v59, -inf  ;;  %v3762_v52 = vmax.f32 %v3760_v48, %v3761_v57  ;;  %v3238_v14 = vld [vmem:[%s5391_s21 + $0xa0] sm:$0xf]  ;;  %v3239_v51 = vld [vmem:[%s5391_s21 + $0xa4] sm:$0xf] }
 0x24d   : > { %v3828_v12 = vmul.f32 %v5480_v61, %v3752_v60  ;;  %v3494_v11 = vsel %vm3262_vm11, %v3231_v3, -inf  ;;  %v3501_v10 = vsel %vm3262_vm11, %v3232_v50, -inf  ;;  %v3488_v31 = vrot.slane %v3487_v30, 4 }
 0x24e   : > { %v3759_v25 = vmax.f32 %v3757_v22, %v3758_v5  ;;  %v3764_v53 = vmax.f32 %v3762_v52, %v3763_v29  ;;  %v3765_v23 = vsel %vm1456_vm1, %v3486_v39, -inf  ;;  %v3495_v34 = vrot.slane %v3494_v11, 4  ;;  %v3241_v22 = vld [vmem:[%s5391_s21 + $0xac] sm:$0xf] }
 0x24f   : > { %v3861_v42 = vrot.slane %v3828_v12, 7  ;;  %v3502_v19 = vrot.slane %v3501_v10, 4  ;;  %v3508_v40 = vsel %vm3262_vm11, %v3233_v28, -inf  ;;  %v3489_v16 = vmax.f32 %v3487_v30, %v3488_v31 }
 0x250   : > { %v3766_v62 = vmax.f32 %v3764_v53, %v3765_v23  ;;  %v3829_v63 = vmul.f32 %v5480_v61, %v3759_v25  ;;  %v3509_v44 = vrot.slane %v3508_v40, 4  ;;  %v3496_v13 = vmax.f32 %v3494_v11, %v3495_v34  ;;  %v3242_v53 = vld [vmem:[%s5391_s21 + $0xb0] sm:$0xf] }
 0x251   : > { %v3862_v7 = vsel %vm1784_vm2, %v3861_v42, %v3827_v2  ;;  %v3503_v20 = vmax.f32 %v3501_v10, %v3502_v19  ;;  %v3515_v46 = vsel %vm3262_vm11, %v3234_v4, -inf  ;;  %v3490_v36 = vrot.slane %v3489_v16, 2 }
 0x252   : > { %v3830_v24 = vmul.f32 %v5480_v61, %v3766_v62  ;;  %v3863_v43 = vrot.slane %v3829_v63, 6  ;;  %v3510_v56 = vmax.f32 %v3508_v40, %v3509_v44  ;;  %v3497_v45 = vrot.slane %v3496_v13, 2 }
 0x253   : > { %v3504_v27 = vrot.slane %v3503_v20, 2  ;;  %v3516_v21 = vrot.slane %v3515_v46, 4  ;;  %v3522_v33 = vsel %vm3262_vm11, %v3235_v47, -inf  ;;  %v3491_v32 = vmax.f32 %v3489_v16, %v3490_v36 }
 0x254   : > { %v3864_v58 = vsel %vm1787_vm3, %v3863_v43, %v3862_v7  ;;  %v3865_v15 = vrot.slane %v3830_v24, 5  ;;  %v3511_v0 = vrot.slane %v3510_v56, 2  ;;  %v3498_v38 = vmax.f32 %v3496_v13, %v3497_v45  ;;  %v3243_v7 = vld [vmem:[%s5391_s21 + $0xb4] sm:$0xf]  ;;  %v3244_v45 = vld [vmem:[%s5391_s21 + $0xb8] sm:$0xf] }
 0x255   : > { %v3505_v1 = vmax.f32 %v3503_v20, %v3504_v27  ;;  %v3517_v37 = vmax.f32 %v3515_v46, %v3516_v21  ;;  %v3523_v18 = vrot.slane %v3522_v33, 4  ;;  %v3492_v49 = vrot.slane %v3491_v32, 1 }
 0x256   : > { %v3866_v17 = vsel %vm1790_vm4, %v3865_v15, %v3864_v58  ;;  %v3512_v6 = vmax.f32 %v3510_v56, %v3511_v0  ;;  %v3529_v55 = vsel %vm3262_vm11, %v3236_v26, -inf  ;;  %v3499_v48 = vrot.slane %v3498_v38, 1 }
 0x257   : > { %v3886_v8 = vsel %vm3262_vm11, %v3866_v17, 0.0  ;;  %v3506_v3 = vrot.slane %v3505_v1, 1  ;;  %v3518_v59 = vrot.slane %v3517_v37, 2  ;;  %v5573_v35 = vmax.f32 %v3491_v32, %v3492_v49 }
 0x258   : > { %3887 = vadd.xlane.f32.xlu1 %v3886_v8  ;;  %v3513_v9 = vrot.slane %v3512_v6, 1  ;;  %v3524_v50 = vmax.f32 %v3522_v33, %v3523_v18  ;;  %v3530_v60 = vrot.slane %v3529_v55, 4  ;;  %v5575_v57 = vmax.f32 %v3498_v38, %v3499_v48 }
 0x259   : > { %v5577_v29 = vmax.f32 %v3505_v1, %v3506_v3  ;;  %v3519_v2 = vmax.f32 %v3517_v37, %v3518_v59  ;;  %v3536_v39 = vsel %vm3262_vm11, %v3237_v41, -inf  ;;  %v3543_v11 = vsel %vm3262_vm11, %v3238_v14, -inf  ;;  %v3245_v1 = vld [vmem:[%s5391_s21 + $0xbc] sm:$0xf] }
 0x25a   : > { %v5581_v5 = vmax.f32 %v3512_v6, %v3513_v9  ;;  %v3525_v52 = vrot.slane %v3524_v50, 2  ;;  %v3531_v28 = vmax.f32 %v3529_v55, %v3530_v60  ;;  %v3537_v12 = vrot.slane %v3536_v39, 4 }
 0x25b   : > { %v3520_v30 = vrot.slane %v3519_v2, 1  ;;  %v3550_v10 = vsel %vm3262_vm11, %v3239_v51, -inf  ;;  %v3557_v25 = vsel %vm3262_vm11, %v3240_v54, -inf  ;;  %v3544_v42 = vrot.slane %v3543_v11, 4 }
 0x25c   : > { %v3526_v23 = vmax.f32 %v3524_v50, %v3525_v52  ;;  %v3532_v4 = vrot.slane %v3531_v28, 2  ;;  %v3538_v31 = vmax.f32 %v3536_v39, %v3537_v12  ;;  %v3551_v19 = vrot.slane %v3550_v10, 4 }
 0x25d   : > { %v3521_v34 = vmax.f32 %v3519_v2, %v3520_v30  ;;  %v3558_v40 = vrot.slane %v3557_v25, 4  ;;  %v3564_v62 = vsel %vm3262_vm11, %v3241_v22, -inf  ;;  %v3545_v44 = vmax.f32 %v3543_v11, %v3544_v42 }
 0x25e   : > { %v3527_v63 = vrot.slane %v3526_v23, 1  ;;  %v3533_v47 = vmax.f32 %v3531_v28, %v3532_v4  ;;  %v3539_v16 = vrot.slane %v3538_v31, 2  ;;  %v3552_v13 = vmax.f32 %v3550_v10, %v3551_v19 }
 0x25f   : > { %v3559_v20 = vmax.f32 %v3557_v25, %v3558_v40  ;;  %v3565_v46 = vrot.slane %v3564_v62, 4  ;;  %v3571_v24 = vsel %vm3262_vm11, %v3242_v53, -inf  ;;  %v3546_v26 = vrot.slane %v3545_v44, 2 }
 0x260   : > { %v3528_v43 = vmax.f32 %v3526_v23, %v3527_v63  ;;  %v3534_v36 = vrot.slane %v3533_v47, 1  ;;  %v3540_v56 = vmax.f32 %v3538_v31, %v3539_v16  ;;  %v3553_v27 = vrot.slane %v3552_v13, 2 }
 0x261   : > { %v3560_v21 = vrot.slane %v3559_v20, 2  ;;  %v3566_v33 = vmax.f32 %v3564_v62, %v3565_v46  ;;  %v3572_v58 = vrot.slane %v3571_v24, 4  ;;  %v3547_v0 = vmax.f32 %v3545_v44, %v3546_v26 }
 0x262   : > { %v3535_v15 = vmax.f32 %v3533_v47, %v3534_v36  ;;  %v3541_v32 = vrot.slane %v3540_v56, 1  ;;  %v3578_v38 = vsel %vm3262_vm11, %v3243_v7, -inf  ;;  %v3554_v37 = vmax.f32 %v3552_v13, %v3553_v27  ;;  %v3246_v27 = vld [vmem:[%s5391_s21 + $0xc0] sm:$0xf] }
 0x263   : > { %v3561_v18 = vmax.f32 %v3559_v20, %v3560_v21  ;;  %v3567_v17 = vrot.slane %v3566_v33, 2  ;;  %v3573_v41 = vmax.f32 %v3571_v24, %v3572_v58  ;;  %v3548_v6 = vrot.slane %v3547_v0, 1 }
 0x264   : > { %v3542_v49 = vmax.f32 %v3540_v56, %v3541_v32  ;;  %v3579_v55 = vrot.slane %v3578_v38, 4  ;;  %v3585_v8 = vsel %vm3262_vm11, %v3244_v45, -inf  ;;  %v3555_v14 = vrot.slane %v3554_v37, 1 }
 0x265   : > { %v3562_v48 = vrot.slane %v3561_v18, 1  ;;  %v3568_v3 = vmax.f32 %v3566_v33, %v3567_v17  ;;  %v3574_v59 = vrot.slane %v3573_v41, 2  ;;  %v3549_v51 = vmax.f32 %v3547_v0, %v3548_v6 }
 0x266   : > { %v3580_v54 = vmax.f32 %v3578_v38, %v3579_v55  ;;  %v3586_v9 = vrot.slane %v3585_v8, 4  ;;  %v3592_v50 = vsel %vm3262_vm11, %v3245_v1, -inf  ;;  %v3556_v60 = vmax.f32 %v3554_v37, %v3555_v14  ;;  %v3248_v37 = vld [vmem:[%s5391_s21 + $0xc8] sm:$0xf]  ;;  %v5620_v55 = vpop.xlane.xlu1 %1917 }
 0x267   : > { %v3563_v2 = vmax.f32 %v3561_v18, %v3562_v48  ;;  %v3569_v39 = vrot.slane %v3568_v3, 1  ;;  %v3575_v22 = vmax.f32 %v3573_v41, %v3574_v59  ;;  %v3593_v12 = vrot.slane %v3592_v50, 4  ;;  %v3249_v18 = vld [vmem:[%s5391_s21 + $0xcc] sm:$0xf]  ;;  %v3250_v48 = vld [vmem:[%s5391_s21 + $0xd0] sm:$0xf] }
 0x268   : > { %v3581_v52 = vrot.slane %v3580_v54, 2  ;;  %v3587_v28 = vmax.f32 %v3585_v8, %v3586_v9  ;;  %v3767_v30 = vsel %vm1456_vm1, %v5573_v35, -inf  ;;  %v3768_v25 = vsel %vm1456_vm1, %v3521_v34, -inf }
 0x269   : > { %v3570_v11 = vmax.f32 %v3568_v3, %v3569_v39  ;;  %v3576_v10 = vrot.slane %v3575_v22, 1  ;;  %v3770_v53 = vsel %vm1456_vm1, %v3549_v51, -inf  ;;  %v3594_v31 = vmax.f32 %v3592_v50, %v3593_v12 }
 0x26a   : > { %v3582_v23 = vmax.f32 %v3580_v54, %v3581_v52  ;;  %v3588_v4 = vrot.slane %v3587_v28, 2  ;;  %v3769_v42 = vmax.f32 %v3767_v30, %v3768_v25  ;;  %v3774_v40 = vsel %vm1456_vm1, %v5575_v57, -inf }
 0x26b   : > { %v3577_v19 = vmax.f32 %v3575_v22, %v3576_v10  ;;  %v3775_v62 = vsel %vm1456_vm1, %v3528_v43, -inf  ;;  %v3777_v63 = vsel %vm1456_vm1, %v3556_v60, -inf  ;;  %v3595_v16 = vrot.slane %v3594_v31, 2  ;;  %v3251_v22 = vld [vmem:[%s5391_s21 + $0xd4] sm:$0xf] }
 0x26c   : > { %v3583_v47 = vrot.slane %v3582_v23, 1  ;;  %v3589_v35 = vmax.f32 %v3587_v28, %v3588_v4  ;;  %v3771_v44 = vmax.f32 %v3769_v42, %v3770_v53  ;;  %v3776_v7 = vmax.f32 %v3774_v40, %v3775_v62  ;;  %v5634_v40 = vpop.xlane.xlu1 %1920 }
 0x26d   : > { %v3772_v34 = vsel %vm1456_vm1, %v3577_v19, -inf  ;;  %v3781_v13 = vsel %vm1456_vm1, %v5577_v29, -inf  ;;  %v3782_v20 = vsel %vm1456_vm1, %v3535_v15, -inf  ;;  %v3596_v24 = vmax.f32 %v3594_v31, %v3595_v16  ;;  %v3247_v15 = vld [vmem:[%s5391_s21 + $0xc4] sm:$0xf] }
 0x26e   : > { %v3584_v46 = vmax.f32 %v3582_v23, %v3583_v47  ;;  %v3590_v57 = vrot.slane %v3589_v35, 1  ;;  %v3773_v43 = vmax.f32 %v3771_v44, %v3772_v34  ;;  %v3778_v36 = vmax.f32 %v3776_v7, %v3777_v63  ;;  %v3252_v23 = vld [vmem:[%s5391_s21 + $0xd8] sm:$0xf] }
 0x26f   : > { %v3783_v56 = vmax.f32 %v3781_v13, %v3782_v20  ;;  %v3784_v26 = vsel %vm1456_vm1, %v3563_v2, -inf  ;;  %v3788_v45 = vsel %vm1456_vm1, %v5581_v5, -inf  ;;  %v3597_v33 = vrot.slane %v3596_v24, 1  ;;  %v3253_v20 = vld [vmem:[%s5391_s21 + $0xdc] sm:$0xf] }
 0x270   : > { %v3591_v21 = vmax.f32 %v3589_v35, %v3590_v57  ;;  %v3779_v29 = vsel %vm1456_vm1, %v3584_v46, -inf  ;;  %v3789_v58 = vsel %vm1456_vm1, %v3542_v49, -inf  ;;  %v3791_v1 = vsel %vm1456_vm1, %v3570_v11, -inf }
 0x271   : > { %v3780_v32 = vmax.f32 %v3778_v36, %v3779_v29  ;;  %v3785_v0 = vmax.f32 %v3783_v56, %v3784_v26  ;;  %v3790_v38 = vmax.f32 %v3788_v45, %v3789_v58  ;;  %v3598_v17 = vmax.f32 %v3596_v24, %v3597_v33  ;;  %v3254_v45 = vld [vmem:[%s5391_s21 + $0xe0] sm:$0xf]  ;;  %v3255_v58 = vld [vmem:[%s5391_s21 + $0xe4] sm:$0xf] }
 0x272   : > { %v3786_v41 = vsel %vm1456_vm1, %v3591_v21, -inf  ;;  %v3831_v5 = vmul.f32 %v5480_v61, %v3773_v43  ;;  %v3599_v6 = vsel %vm3262_vm11, %v3246_v27, -inf  ;;  %v3606_v51 = vsel %vm3262_vm11, %v3247_v15, -inf }
 0x273   : > { %v3787_v49 = vmax.f32 %v3785_v0, %v3786_v41  ;;  %v3792_v8 = vmax.f32 %v3790_v38, %v3791_v1  ;;  %v3832_v14 = vmul.f32 %v5480_v61, %v3780_v32  ;;  %v3600_v3 = vrot.slane %v3599_v6, 4  ;;  %v5647_v1 = vpop.xlane.xlu1 %1926 }
 0x274   : > { %v3793_v59 = vsel %vm1456_vm1, %v3598_v17, -inf  ;;  %v3613_v54 = vsel %vm3262_vm11, %v3248_v37, -inf  ;;  %v3620_v9 = vsel %vm3262_vm11, %v3249_v18, -inf  ;;  %v3607_v52 = vrot.slane %v3606_v51, 4  ;;  %v3256_v37 = vld [vmem:[%s5391_s21 + $0xe8] sm:$0xf] }
 0x275   : > { %v3794_v50 = vmax.f32 %v3792_v8, %v3793_v59  ;;  %v3833_v60 = vmul.f32 %v5480_v61, %v3787_v49  ;;  %v3867_v2 = vrot.slane %v3832_v14, 7  ;;  %v3601_v39 = vmax.f32 %v3599_v6, %v3600_v3  ;;  %v3257_v18 = vld [vmem:[%s5391_s21 + $0xec] sm:$0xf] }
 0x276   : > { %v3614_v28 = vrot.slane %v3613_v54, 4  ;;  %v3621_v12 = vrot.slane %v3620_v9, 4  ;;  %v3627_v30 = vsel %vm3262_vm11, %v3250_v48, -inf  ;;  %v3608_v4 = vmax.f32 %v3606_v51, %v3607_v52 }
 0x277   : > { %v3834_v11 = vmul.f32 %v5480_v61, %v3794_v50  ;;  %v3868_v10 = vsel %vm1784_vm2, %v3867_v2, %v3831_v5  ;;  %v3869_v25 = vrot.slane %v3833_v60, 6  ;;  %v3602_v53 = vrot.slane %v3601_v39, 2 }
 0x278   : > { %v3615_v31 = vmax.f32 %v3613_v54, %v3614_v28  ;;  %v3622_v42 = vmax.f32 %v3620_v9, %v3621_v12  ;;  %v3628_v19 = vrot.slane %v3627_v30, 4  ;;  %v3634_v35 = vsel %vm3262_vm11, %v3251_v22, -inf  ;;  %v3258_v9 = vld [vmem:[%s5391_s21 + $0xf0] sm:$0xf] }
 0x279   : > { %v3870_v62 = vsel %vm1787_vm3, %v3869_v25, %v3868_v10  ;;  %v3871_v63 = vrot.slane %v3834_v11, 5  ;;  %v3603_v47 = vmax.f32 %v3601_v39, %v3602_v53  ;;  %v3609_v16 = vrot.slane %v3608_v4, 2  ;;  %v3259_v11 = vld [vmem:[%s5391_s21 + $0xf4] sm:$0xf] }
 0x27a   : > { %v3616_v44 = vrot.slane %v3615_v31, 2  ;;  %v3623_v34 = vrot.slane %v3622_v42, 2  ;;  %v3629_v7 = vmax.f32 %v3627_v30, %v3628_v19  ;;  %v3635_v57 = vrot.slane %v3634_v35, 4  ;;  %v5662_v30 = vpop.xlane.xlu0 %1911 }
 0x27b   : > { %v3872_v13 = vsel %vm1790_vm4, %v3871_v63, %v3870_v62  ;;  %v3604_v46 = vrot.slane %v3603_v47, 1  ;;  %v3641_v24 = vsel %vm3262_vm11, %v3252_v23, -inf  ;;  %v3610_v36 = vmax.f32 %v3608_v4, %v3609_v16  ;;  %v5665_v4 = vpop.xlane.xlu1 %1932  ;;  %v3260_v63 = vld [vmem:[%s5391_s21 + $0xf8] sm:$0xf] }
 0x27c   : > { %v3889_v43 = vsel %vm3262_vm11, %v3872_v13, 0.0  ;;  %v3617_v56 = vmax.f32 %v3615_v31, %v3616_v44  ;;  %v3624_v26 = vmax.f32 %v3622_v42, %v3623_v34  ;;  %v3630_v21 = vrot.slane %v3629_v7, 2 }
 0x27d   : > { %3890 = vadd.xlane.f32.xlu1 %v3889_v43  ;;  %v5643_v27 = vmax.f32 %v3603_v47, %v3604_v46  ;;  %v3636_v33 = vmax.f32 %v3634_v35, %v3635_v57  ;;  %v3642_v29 = vrot.slane %v3641_v24, 4  ;;  %v3611_v15 = vrot.slane %v3610_v36, 1  ;;  %v3261_v46 = vld [vmem:[%s5391_s21 + $0xfc] sm:$0xf] }
 0x27e   : > { %v3618_v32 = vrot.slane %v3617_v56, 1  ;;  %v3625_v0 = vrot.slane %v3624_v26, 1  ;;  %v3648_v38 = vsel %vm3262_vm11, %v3253_v20, -inf  ;;  %v3631_v17 = vmax.f32 %v3629_v7, %v3630_v21 }
 0x27f   : > { %v3637_v41 = vrot.slane %v3636_v33, 2  ;;  %v3643_v5 = vmax.f32 %v3641_v24, %v3642_v29  ;;  %v3649_v6 = vrot.slane %v3648_v38, 4  ;;  %v5651_v49 = vmax.f32 %v3610_v36, %v3611_v15 }
 0x280   : > { %v5653_v8 = vmax.f32 %v3617_v56, %v3618_v32  ;;  %v5655_v14 = vmax.f32 %v3624_v26, %v3625_v0  ;;  %v3655_v48 = vsel %vm3262_vm11, %v3254_v45, -inf  ;;  %v3632_v3 = vrot.slane %v3631_v17, 1  ;;  %v5674_v0 = vpop.xlane.xlu1 %2983 }
 0x281   : > { %v3638_v59 = vmax.f32 %v3636_v33, %v3637_v41  ;;  %v3644_v51 = vrot.slane %v3643_v5, 2  ;;  %v3650_v54 = vmax.f32 %v3648_v38, %v3649_v6  ;;  %v3656_v50 = vrot.slane %v3655_v48, 4  ;;  %v5672_v33 = vpop.xlane.xlu0 %1914 }
 0x282   : > { %v3662_v60 = vsel %vm3262_vm11, %v3255_v58, -inf  ;;  %v3669_v2 = vsel %vm3262_vm11, %v3256_v37, -inf  ;;  %v3676_v39 = vsel %vm3262_vm11, %v3257_v18, -inf  ;;  %v3633_v22 = vmax.f32 %v3631_v17, %v3632_v3 }
 0x283   : > { %v3639_v52 = vrot.slane %v3638_v59, 1  ;;  %v3645_v28 = vmax.f32 %v3643_v5, %v3644_v51  ;;  %v3651_v12 = vrot.slane %v3650_v54, 2  ;;  %v3657_v10 = vmax.f32 %v3655_v48, %v3656_v50 }
 0x284   : > { %v3663_v25 = vrot.slane %v3662_v60, 4  ;;  %v3670_v53 = vrot.slane %v3669_v2, 4  ;;  %v3677_v23 = vrot.slane %v3676_v39, 4  ;;  %v3683_v62 = vsel %vm3262_vm11, %v3258_v9, -inf }
 0x285   : > { %v3640_v31 = vmax.f32 %v3638_v59, %v3639_v52  ;;  %v3646_v42 = vrot.slane %v3645_v28, 1  ;;  %v3652_v19 = vmax.f32 %v3650_v54, %v3651_v12  ;;  %v3658_v47 = vrot.slane %v3657_v10, 2 }
 0x286   : > { %v3664_v35 = vmax.f32 %v3662_v60, %v3663_v25  ;;  %v3671_v16 = vmax.f32 %v3669_v2, %v3670_v53  ;;  %v3678_v44 = vmax.f32 %v3676_v39, %v3677_v23  ;;  %v3684_v13 = vrot.slane %v3683_v62, 4 }
 0x287   : > { %v3647_v34 = vmax.f32 %v3645_v28, %v3646_v42  ;;  %v3653_v7 = vrot.slane %v3652_v19, 1  ;;  %v3690_v20 = vsel %vm3262_vm11, %v3259_v11, -inf  ;;  %v3659_v57 = vmax.f32 %v3657_v10, %v3658_v47  ;;  %v5679_v11 = vpop.xlane.xlu0 %1923  ;;  %v5686_v42 = vpop.xlane.xlu1 %2986 }
 0x288   : > { %v3665_v24 = vrot.slane %v3664_v35, 2  ;;  %v3672_v43 = vrot.slane %v3671_v16, 2  ;;  %v3679_v36 = vrot.slane %v3678_v44, 2  ;;  %v3685_v26 = vmax.f32 %v3683_v62, %v3684_v13 }
 0x289   : > { %v3654_v56 = vmax.f32 %v3652_v19, %v3653_v7  ;;  %v3691_v45 = vrot.slane %v3690_v20, 4  ;;  %v3697_v21 = vsel %vm3262_vm11, %v3260_v63, -inf  ;;  %v3660_v29 = vrot.slane %v3659_v57, 1 }
 0x28a   : > { %v3666_v58 = vmax.f32 %v3664_v35, %v3665_v24  ;;  %v3673_v15 = vmax.f32 %v3671_v16, %v3672_v43  ;;  %v3680_v32 = vmax.f32 %v3678_v44, %v3679_v36  ;;  %v3686_v38 = vrot.slane %v3685_v26, 2 }
 0x28b   : > { %v3692_v37 = vmax.f32 %v3690_v20, %v3691_v45  ;;  %v3698_v18 = vrot.slane %v3697_v21, 4  ;;  %v3704_v17 = vsel %vm3262_vm11, %v3261_v46, -inf  ;;  %v3661_v41 = vmax.f32 %v3659_v57, %v3660_v29  ;;  %v1930_v45 = vpop.xlane.xlu0 %1929 }
 0x28c   : > { %v3667_v5 = vrot.slane %v3666_v58, 1  ;;  %v3674_v6 = vrot.slane %v3673_v15, 1  ;;  %v3681_v48 = vrot.slane %v3680_v32, 1  ;;  %v3687_v3 = vmax.f32 %v3685_v26, %v3686_v38 }
 0x28d   : > { %v3693_v59 = vrot.slane %v3692_v37, 2  ;;  %v3699_v51 = vmax.f32 %v3697_v21, %v3698_v18  ;;  %v3705_v54 = vrot.slane %v3704_v17, 4  ;;  %v3795_v2 = vsel %vm1456_vm1, %v5643_v27, -inf }
 0x28e   : > { %v3668_v9 = vmax.f32 %v3666_v58, %v3667_v5  ;;  %v3675_v50 = vmax.f32 %v3673_v15, %v3674_v6  ;;  %v3682_v60 = vmax.f32 %v3680_v32, %v3681_v48  ;;  %v3688_v39 = vrot.slane %v3687_v3, 1  ;;  %v2990_v15 = vpop.xlane.xlu1 %2989 }
 0x28f   : > { %v3694_v52 = vmax.f32 %v3692_v37, %v3693_v59  ;;  %v3700_v28 = vrot.slane %v3699_v51, 2  ;;  %v3706_v12 = vmax.f32 %v3704_v17, %v3705_v54  ;;  %v3796_v10 = vsel %vm1456_vm1, %v3633_v22, -inf }
 0x290   : > { %v3798_v25 = vsel %vm1456_vm1, %v3661_v41, -inf  ;;  %v3802_v53 = vsel %vm1456_vm1, %v5651_v49, -inf  ;;  %v3803_v23 = vsel %vm1456_vm1, %v3640_v31, -inf  ;;  %v3689_v19 = vmax.f32 %v3687_v3, %v3688_v39  ;;  %v4264_v41 = vld [vmem:[%s5825_s3] ss:$0 sm:$0xff] }
 0x291   : > { %v3695_v62 = vrot.slane %v3694_v52, 1  ;;  %v3701_v27 = vmax.f32 %v3699_v51, %v3700_v28  ;;  %v3707_v63 = vrot.slane %v3706_v12, 2  ;;  %v3797_v47 = vmax.f32 %v3795_v2, %v3796_v10 }
 0x292   : > { %v3804_v35 = vmax.f32 %v3802_v53, %v3803_v23  ;;  %v3805_v16 = vsel %vm1456_vm1, %v3668_v9, -inf  ;;  %v3809_v22 = vsel %vm1456_vm1, %v5653_v8, -inf  ;;  %v3800_v49 = vsel %vm1456_vm1, %v3689_v19, -inf  ;;  %v2993_v2 = vpop.xlane.xlu1 %2992 }
 0x293   : > { %v3696_v44 = vmax.f32 %v3694_v52, %v3695_v62  ;;  %v3702_v7 = vrot.slane %v3701_v27, 1  ;;  %v3708_v13 = vmax.f32 %v3706_v12, %v3707_v63  ;;  %v3799_v20 = vmax.f32 %v3797_v47, %v3798_v25 }
 0x294   : > { %v3806_v31 = vmax.f32 %v3804_v35, %v3805_v16  ;;  %v3810_v46 = vsel %vm1456_vm1, %v3647_v34, -inf  ;;  %v3812_v57 = vsel %vm1456_vm1, %v3675_v50, -inf  ;;  %v3816_v8 = vsel %vm1456_vm1, %v5655_v14, -inf  ;;  %v5705_v50 = vpop.permute.xlu0 %1940 }
 0x295   : > { %v3703_v24 = vmax.f32 %v3701_v27, %v3702_v7  ;;  %v3709_v43 = vrot.slane %v3708_v13, 1  ;;  %v3807_v36 = vsel %vm1456_vm1, %v3696_v44, -inf  ;;  %v3811_v26 = vmax.f32 %v3809_v22, %v3810_v46 }
 0x296   : > { %v3801_v21 = vmax.f32 %v3799_v20, %v3800_v49  ;;  %v3808_v29 = vmax.f32 %v3806_v31, %v3807_v36  ;;  %v3817_v58 = vsel %vm1456_vm1, %v3654_v56, -inf  ;;  %v3819_v18 = vsel %vm1456_vm1, %v3682_v60, -inf  ;;  %v2996_v35 = vpop.xlane.xlu1 %2995 }
 0x297   : > { %v3710_v32 = vmax.f32 %v3708_v13, %v3709_v43  ;;  %v3813_v38 = vmax.f32 %v3811_v26, %v3812_v57  ;;  %v3814_v34 = vsel %vm1456_vm1, %v3703_v24, -inf  ;;  %v3818_v37 = vmax.f32 %v3816_v8, %v3817_v58 }
 0x298   : > { %v3835_v17 = vmul.f32 %v5480_v61, %v3801_v21  ;;  %v3836_v5 = vmul.f32 %v4264_v41, %v3808_v29  ;;  %v1960_v6 = vlaneseq  ;;  %v1951_v61 = vld [vmem:[%s5828_s6] sm:$0xff]  ;;  %v4274_v28 = vmov 0.0  }
 0x299   : > { %v3815_v48 = vmax.f32 %v3813_v38, %v3814_v34  ;;  %v3820_v14 = vmax.f32 %v3818_v37, %v3819_v18  ;;  %v3821_v56 = vsel %vm1456_vm1, %v3710_v32, -inf  ;;  %4216 = vmatprep.subr.mxu0 %v4274_v28  ;;  %vm4275_vm12 = vmmov 0   ;;  %v3899_v18 = vld [vmem:[%s5832_s10] sm:$0xf] }
 0x29a   : > { %v3873_v3 = vrot.slane %v3836_v5, 7  ;;  %v1961_v59 = vand.u32 127, %v1960_v6  ;;  %v1963_v51 = vshrl.u32 %v1960_v6, 7  ;;  %4218 = vmatprep.mubr.msk.f32.mxu0 %vm4275_vm12, %v4274_v28  ;;  %4217 = vmatpush3.msra.mxu0 %v1951_v61  ;;  %v1943_v10 = vadd.f32 %v5705_v50, %v5662_v30 }
 0x29b   : > { %v3822_v54 = vmax.f32 %v3820_v14, %v3821_v56  ;;  %v3837_v9 = vmul.f32 %v4264_v41, %v3815_v48  ;;  %v1944_v23 = vadd.f32 %v5705_v50, %v5672_v33  ;;  %4226 = vmatprep.subr.mxu0 %v4274_v28  ;;  %v1945_v19 = vadd.f32 %v5705_v50, %v5620_v55 }
 0x29c   : > { %v3874_v60 = vsel %vm1784_vm2, %v3873_v3, %v3835_v17  ;;  %v5712_v12 = vsub.s32 %v1961_v59, %v1963_v51  ;;  %v1947_v62 = vadd.f32 %v5705_v50, %v5679_v11  ;;  %v2997_v63 = vadd.f32 %v5674_v0, %v5705_v50  ;;  %v2074_v17 = vld [vmem:[%s5827_s5] sm:$0xff] }
 0x29d   : > { %v3838_v39 = vmul.f32 %v4264_v41, %v3822_v54  ;;  %v3875_v52 = vrot.slane %v3837_v9, 6  ;;  %v1946_v30 = vadd.f32 %v5705_v50, %v5634_v40  ;;  %v2998_v33 = vadd.f32 %v5686_v42, %v5705_v50 }
 0x29e   : > { %v1949_v16 = vadd.f32 %v5705_v50, %v1930_v45  ;;  %v1965_v55 = vrot.slane %v1943_v10, %v5712_v12  ;;  %v2999_v11 = vadd.f32 %v2990_v15, %v5705_v50  ;;  %v1948_v22 = vadd.f32 %v5705_v50, %v5647_v1  ;;  %v3002_v15 = vld [vmem:[%s5830_s8] sm:$0x1f] }
 0x29f   : > { %v3876_v25 = vsel %vm1787_vm3, %v3875_v52, %v3874_v60  ;;  %v3877_v53 = vrot.slane %v3838_v39, 5  ;;  %v1969_v0 = vrot.slane %v1944_v23, %v5712_v12  ;;  %v1973_v40 = vrot.slane %v1945_v19, %v5712_v12  ;;  %v3999_v23 = vld [vmem:[%s5831_s9] sm:$0xff] }
 0x2a0   : > { %v3000_v44 = vadd.f32 %v2993_v2, %v5705_v50  ;;  %v1981_v7 = vrot.slane %v1947_v62, %v5712_v12  ;;  %v3001_v42 = vadd.f32 %v2996_v35, %v5705_v50  ;;  %v1950_v13 = vadd.f32 %v5705_v50, %v5665_v4  ;;  %v4000_v62 = vld [vmem:[%s5831_s9 + $0x8] sm:$0xff] }
 0x2a1   : > { %v3878_v27 = vsel %vm1790_vm4, %v3877_v53, %v3876_v25  ;;  %v1977_v49 = vrot.slane %v1946_v30, %v5712_v12  ;;  %v1994_v20 = vsel %vm1784_vm2, %v1969_v0, %v1965_v55  ;;  %v3011_v31 = vrot.slane %v2997_v63, %v5712_v12  ;;  %v3110_v25 = vld [vmem:[%s5829_s7 + $0x8] sm:$0xff] }
 0x2a2   : > { %v3892_v47 = vsel %vm3262_vm11, %v3878_v27, 0.0  ;;  %v3015_v1 = vrot.slane %v2998_v33, %v5712_v12  ;;  %v1989_v46 = vrot.slane %v1949_v16, %v5712_v12  ;;  %v1995_v57 = vsel %vm1787_vm3, %v1973_v40, %v1994_v20 }
 0x2a3   : > { %3893 = vadd.xlane.f32.xlu1 %v3892_v47  ;;  %v3019_v24 = vrot.slane %v2999_v11, %v5712_v12  ;;  %v1985_v43 = vrot.slane %v1948_v22, %v5712_v12  ;;  %v1996_v36 = vsel %vm1790_vm4, %v1977_v49, %v1995_v57  ;;  %v3023_v4 = vrot.slane %v3000_v44, %v5712_v12 }
 0x2a4   : > { %v1997_v26 = vsel %vm1793_vm5, %v1981_v7, %v1996_v36  ;;  %v3027_v45 = vrot.slane %v3001_v42, %v5712_v12  ;;  %v1993_v21 = vrot.slane %v1950_v13, %v5712_v12  ;;  %vm2001_vm13 = vcmask 64512  }
 0x2a5   : > { %v1998_v29 = vsel %vm1796_vm6, %v1985_v43, %v1997_v26  ;;  %v3028_v8 = vsel %vm1784_vm2, %v3015_v1, %v3011_v31  ;;  %vm3035_vm14 = vcmask 1044480   ;;  %vm3032_vm15 = vcmask 39936   ;;  %4223 = vmatprep.mubr.msk.f32.mxu1 %vm2001_vm13, %v2074_v17 }
 0x2a6   : > { %v1999_v58 = vsel %vm1799_vm7, %v1989_v46, %v1998_v29  ;;  %v3029_v32 = vsel %vm1787_vm3, %v3019_v24, %v3028_v8  ;;  %vm3925_vm0 = vcmask 1043456  }
 0x2a7   : > { %v2000_v38 = vsel %vm1802_vm8, %v1993_v21, %v1999_v58  ;;  %v3030_v34 = vsel %vm1790_vm4, %v3023_v4, %v3029_v32 }
 0x2a8   : > { %4219 = vmatmul.mubr.msk.f32.vlgmr.msra.gmra.mxu0 %vm2001_vm13, %v2000_v38  ;;  %v3031_v37 = vsel %vm1793_vm5, %v3027_v45, %v3030_v34 }
 0x2a9   : > { %4227 = vmatpush3.msk.msra.mxu0 %vm3035_vm14, %v3002_v15  ;;  %4228 = vmatprep.mubr.msk.f32.mxu0 %vm4275_vm12, %v4274_v28 }
 0x2aa   : > { %4236 = vmatprep.subr.mxu0 %v4274_v28 }
 0x2ac   : > { %4229 = vmatmul.mubr.msk.f32.vlgmr.msra.gmra.mxu0 %vm3032_vm15, %v3031_v37 }
 0x2ad   : > { %4237 = vmatpush3.msk.msra.mxu0 %vm3925_vm0, %v3899_v18  ;;  %4238 = vmatprep.mubr.msk.f32.mxu0 %vm4275_vm12, %v4274_v28  ;;  %v2075_v28 = vld [vmem:[%s5827_s5 + $0x8] sm:$0xff] }
 0x2bb   : > { %v3885_v41 = vpop.xlane.xlu1 %3884 }
 0x2bc   : > { %v3895_v56 = vadd.f32 %v3885_v41, %v5705_v50 }
 0x2be   : > { %v3907_v54 = vrot.slane %v3895_v56, %v5712_v12 }
 0x2e1   : > { %v3888_v5 = vpop.xlane.xlu1 %3887 }
 0x2e2   : > { %v3896_v48 = vadd.f32 %v3888_v5, %v5705_v50 }
 0x2e4   : > { %v3911_v3 = vrot.slane %v3896_v48, %v5712_v12 }
 0x2e6   : > { %v3920_v61 = vsel %vm1784_vm2, %v3911_v3, %v3907_v54  ;;  %vm2157_vm2 = vcmask 130048  }
 0x306   : > { %v3891_v6 = vpop.xlane.xlu1 %3890 }
 0x307   : > { %v3897_v14 = vadd.f32 %v3891_v6, %v5705_v50 }
 0x309   : > { %v3915_v59 = vrot.slane %v3897_v14, %v5712_v12 }
 0x30b   : > { %v3921_v2 = vsel %vm1787_vm3, %v3915_v59, %v3920_v61 }
 0x32c   : > { %v3894_v51 = vpop.xlane.xlu1 %3893 }
 0x32d   : > { %v3898_v9 = vadd.f32 %v3894_v51, %v5705_v50  ;;  %v3109_v50 = vld [vmem:[%s5829_s7] sm:$0xff] }
 0x32f   : > { %v3919_v60 = vrot.slane %v3898_v9, %v5712_v12 }
 0x331   : > { %v3922_v39 = vsel %vm1790_vm4, %v3919_v60, %v3921_v2 }
 0x332   : > { %4239 = vmatmul.mubr.msk.f32.vlgmr.msra.gmra.mxu0 %vm1456_vm1, %v3922_v39 }
 0x368   : > { %v2070_v52 = vpop.f32.mrf.mxu0 }
 0x369   : > { %4221 = vmatprep.subr.mxu1 %v2070_v52 }
 0x36a   : > { %v4220_v10 = vpop.f32.mrf.mxu0  ;;  %4222 = vmatpush3.msra.mxu1 %v2070_v52 }
 0x36b   : > { %4224 = vmatmul.mubr.msk.f32.vlgmr.msra.gmra.mxu1 %vm2001_vm13, %v2075_v28 }
 0x36c   : > { %v3105_v12 = vpop.f32.mrf.mxu0  ;;  %4233 = vmatprep.mubr.msk.f32.mxu1 %vm3032_vm15, %v3109_v50 }
 0x36d   : > { %4231 = vmatprep.subr.msk.mxu1 %vm3035_vm14, %v3105_v12 }
 0x36e   : > { %v4230_v53 = vpop.f32.mrf.mxu0  ;;  %4232 = vmatpush3.msk.msra.mxu1 %vm3035_vm14, %v3105_v12 }
 0x36f   : > { %4234 = vmatmul.mubr.msk.f32.vlgmr.msra.gmra.mxu1 %vm3032_vm15, %v3110_v25 }
 0x370   : > { %4243 = vmatprep.mubr.msk.f32.mxu1 %vm1456_vm1, %v3999_v23 }
 0x3f2   : > { %v3995_v19 = vpop.f32.mrf.mxu0 }
 0x3f3   : > { %4241 = vmatprep.subr.msk.mxu1 %vm3925_vm0, %v3995_v19 }
 0x3f4   : > { %v4240_v27 = vpop.f32.mrf.mxu0  ;;  %4242 = vmatpush3.msk.msra.mxu1 %vm3925_vm0, %v3995_v19 }
 0x3f5   : > { %4244 = vmatmul.mubr.msk.f32.vlgmr.msra.gmra.mxu1 %vm1456_vm1, %v4000_v62 }
 0x42b   : > { %v4225_v63 = vpop.f32.mrf.mxu1 }
 0x42c   : > { %2159 = vst.msk [vmem:[%s428_s28 + $0x8] sm:$0xff] %vm2157_vm2, %v4225_v63 }
 0x42d   : > { %v2148_v30 = vpop.f32.mrf.mxu1 }
 0x42e   : > { %2158 = vst.msk [vmem:[%s428_s28] sm:$0xff] %vm2157_vm2, %v2148_v30 }
 0x42f   : > { %v4235_v47 = vpop.f32.mrf.mxu1 }
 0x430   : > { %4189 = vst.msk [vmem:[%s428_s28 + $0x18] sm:$0xff] %vm2157_vm2, %v4235_v47 }
 0x431   : > { %v3186_v33 = vpop.f32.mrf.mxu1 }
 0x432   : > { %4188 = vst.msk [vmem:[%s428_s28 + $0x10] sm:$0xff] %vm2157_vm2, %v3186_v33 }
 0x4b5   : > { %v4245_v35 = vpop.f32.mrf.mxu1 }
 0x4b6   : > { %4196 = vst.msk [vmem:[%s428_s28 + $0x28] sm:$0xff] %vm2157_vm2, %v4245_v35 }
 0x4b7   : > { %v4076_v16 = vpop.f32.mrf.mxu1 }
 0x4b8   : > { %4195 = vst.msk [vmem:[%s428_s28 + $0x20] sm:$0xff] %vm2157_vm2, %v4076_v16 }
 0x4b9 PF: > { %s23_s19 = sadd.s32 1, %s4271_s19  }
 0x4ba   : > { %p20_p4 = scmp.ge.s32.totalorder %s23_s19, 4  }
 0x4bc   :  { %22 = sbr.rel (!%p20_p4) target bundleno = 3 (0x3), region = 102 }

</bundles_post_ra>
